<compile_context>
chip_gen: v6e
topology: v6e:2x2x1
jax: 0.10.0
libtpu: 0.0.40
codegen_flags: <defaults>
</compile_context>

<pallas_src>
import functools

import jax
import jax.numpy as jnp
from jax.experimental import pallas as pl
from jax.experimental.pallas import tpu as pltpu


def _layernorm(v, g, b, eps=1e-5):
    # v: (T, H), g/b: (1, H)
    mu = jnp.mean(v, axis=-1, keepdims=True)
    var = jnp.mean((v - mu) ** 2, axis=-1, keepdims=True)
    return (v - mu) * jax.lax.rsqrt(var + eps) * g + b


# --------------------------------------------------------------------------
# Kernel 1: LayerNorm (pre-attention) + fused Q/K/V projections over
# flattened (B*S) rows. grid = (rows // tr,). 1/sqrt(dk) folded into Q.
# --------------------------------------------------------------------------
def qkv_kernel(x_ref, g_ref, b_ref, wq_ref, bq_ref, wk_ref, bk_ref,
               wv_ref, bv_ref, q_ref, k_ref, v_ref, *, scale):
    y = _layernorm(x_ref[...], g_ref[...], b_ref[...])
    yc = y.astype(wq_ref.dtype)                      # bf16 (or f32) into the MXU
    q = (jnp.dot(yc, wq_ref[...], preferred_element_type=jnp.float32)
         + bq_ref[...]) * scale                      # fold attention scale into q
    k = jnp.dot(yc, wk_ref[...], preferred_element_type=jnp.float32) + bk_ref[...]
    v = jnp.dot(yc, wv_ref[...], preferred_element_type=jnp.float32) + bv_ref[...]
    q_ref[...] = q.astype(q_ref.dtype)
    k_ref[...] = k.astype(k_ref.dtype)
    v_ref[...] = v.astype(v_ref.dtype)


# --------------------------------------------------------------------------
# Kernel 2: flash-style attention.
# grid = (B, NH, S // tq, S // tkv); heads are lane-blocks (last-dim block = dk)
# of the (B, S, H) q/k/v/ctx arrays selected purely via BlockSpec index maps.
# --------------------------------------------------------------------------
def flash_attn_kernel(q_ref, k_ref, v_ref, bias_ref, o_ref, m_s, l_s, acc_s):
    ki = pl.program_id(3)

    @pl.when(ki == 0)
    def _init():
        m_s[...] = jnp.full(m_s.shape, -jnp.inf, m_s.dtype)
        l_s[...] = jnp.zeros(l_s.shape, l_s.dtype)
        acc_s[...] = jnp.zeros(acc_s.shape, acc_s.dtype)

    q = q_ref[0]                                     # (tq, dk), already scaled
    k = k_ref[0]                                     # (tkv, dk)
    v = v_ref[0]                                     # (tkv, dk)

    # QK^T without materializing a transposed K: contract both operands on dk.
    s = jax.lax.dot_general(q, k, (((1,), (1,)), ((), ())),
                            preferred_element_type=jnp.float32)
    s = s + bias_ref[0, 0].astype(jnp.float32)       # (tq, tkv), f32

    m_prev = m_s[...]
    m_new = jnp.maximum(m_prev, jnp.max(s, axis=-1, keepdims=True))
    # Guard fully-masked rows (all -inf) so exp(-inf - (-inf)) never produces NaN.
    m_safe = jnp.maximum(m_new, jnp.float32(-1e30))
    alpha = jnp.exp(m_prev - m_safe)
    p = jnp.exp(s - m_safe)
    l_s[...] = alpha * l_s[...] + jnp.sum(p, axis=-1, keepdims=True)
    acc_s[...] = alpha * acc_s[...] + jnp.dot(
        p.astype(v.dtype), v, preferred_element_type=jnp.float32)
    m_s[...] = m_new

    @pl.when(ki == pl.num_programs(3) - 1)
    def _finalize():
        l = l_s[...]
        inv_l = pl.reciprocal(jnp.where(l == 0.0, 1.0, l), approx=True)  # EUP vrcp
        o_ref[0] = (acc_s[...] * inv_l).astype(o_ref.dtype)


# --------------------------------------------------------------------------
# Kernel 3: attention output projection + residual + LN2 + FFN + residual,
# over flattened (B*S) rows. grid = (rows // tr,).
# --------------------------------------------------------------------------
def out_ffn_kernel(x_ref, ctx_ref, wo_ref, bo_ref, g_ref, b_ref,
                   w1_ref, b1_ref, w2_ref, b2_ref, o_ref):
    x = x_ref[...]                                   # (tr, H) f32 residual stream
    attn = jnp.dot(ctx_ref[...], wo_ref[...],
                   preferred_element_type=jnp.float32) + bo_ref[...]
    x1 = x + attn                                    # residual (attn dropout = identity)

    y2 = _layernorm(x1, g_ref[...], b_ref[...]).astype(w1_ref.dtype)
    h = jnp.dot(y2, w1_ref[...], preferred_element_type=jnp.float32) + b1_ref[...]
    h = jax.nn.gelu(h, approximate=False)            # nn.GELU() default = exact (erf)
    ffn = jnp.dot(h.astype(w2_ref.dtype), w2_ref[...],
                  preferred_element_type=jnp.float32) + b2_ref[...]
    o_ref[...] = (x1 + ffn).astype(o_ref.dtype)      # residual (ffn dropout = identity)


# --------------------------------------------------------------------------
# Wrapper
# --------------------------------------------------------------------------
def _pick_vmem_limit():
    cap = None
    try:
        cap = getattr(pltpu.get_tpu_info(), "vmem_capacity_bytes", None)
    except Exception:
        cap = None
    if cap is None:
        cap = 64 * 1024 * 1024                       # conservative fallback
    if cap <= 64 * 1024 * 1024:
        return 48 * 1024 * 1024                      # v7x-class: leave headroom
    return 96 * 1024 * 1024                          # v5e/v6e: 128 MiB physical


def _device_kind():
    try:
        return jax.devices()[0].device_kind.lower()
    except Exception:
        return ""


def encoder_layer(x, attn_bias, params, num_heads, *,
                  compute_dtype=jnp.bfloat16, q_block=None, kv_block=None,
                  row_block=256):
    B, S, H = x.shape
    NH = num_heads
    assert H % NH == 0
    dk = H // NH
    scale = dk ** (-0.5)
    assert attn_bias.shape == (B, NH, S, S), \
        f"attn_bias must be exactly (B, NH, S, S) = {(B, NH, S, S)}, got {attn_bias.shape}"
    # Head split/merge is done via lane-blocked BlockSpecs, so dk must be lane aligned.
    assert dk % 128 == 0 or dk == H, "head dim must be a multiple of 128 (or NH == 1)"

    kind = _device_kind()
    if q_block is None:
        q_block = 256
    if kv_block is None:
        kv_block = 128 if "v5" in kind else 256      # v5e MXU is 128-wide; v6e/v7x 256-wide
    tq = min(q_block, S)
    tkv = min(kv_block, S)
    assert S % tq == 0 and S % tkv == 0

    rows = B * S
    tr = min(row_block, rows)
    assert rows % tr == 0

    cd = compute_dtype

    def wcast(a):                      # weight matrices in compute dtype; biases stay f32
        return a.astype(cd)

    # Constant-index weight/bias blocks: whole array, single-buffered (index map never
    # changes, so double-buffering would only double VMEM residency).
    def weight_spec(a):
        nd = a.ndim
        return pl.BlockSpec(a.shape, lambda i, nd=nd: (0,) * nd,
                            pipeline_mode=pl.Buffered(1))

    vmem_limit = _pick_vmem_limit()

    def cparams(sem):
        return pltpu.CompilerParams(dimension_semantics=sem,
                                    vmem_limit_bytes=vmem_limit)

    x2 = x.reshape(rows, H)
    row_spec = pl.BlockSpec((tr, H), lambda i: (i, 0))

    # ---- 1) LN1 + Q/K/V projections (flattened rows) -----------------------
    w_qkv = [params["ln1_g"], params["ln1_b"],
             wcast(params["wq"]), params["bq"],
             wcast(params["wk"]), params["bk"],
             wcast(params["wv"]), params["bv"]]
    q, k, v = pl.pallas_call(
        functools.partial(qkv_kernel, scale=scale),
        out_shape=tuple(jax.ShapeDtypeStruct((rows, H), cd) for _ in range(3)),
        grid=(rows // tr,),
        in_specs=[row_spec] + [weight_spec(a) for a in w_qkv],
        out_specs=(row_spec, row_spec, row_spec),
        compiler_params=cparams(("parallel",)),
    )(x2, *w_qkv)
    q = q.reshape(B, S, H)
    k = k.reshape(B, S, H)
    v = v.reshape(B, S, H)

    # ---- 2) flash attention over (batch, head, q-tile, kv-tile) ------------
    bias_c = attn_bias.astype(cd)                    # halve the dominant HBM stream (bf16 path)
    ctx = pl.pallas_call(
        flash_attn_kernel,
        out_shape=jax.ShapeDtypeStruct((B, S, H), cd),
        grid=(B, NH, S // tq, S // tkv),
        in_specs=[
            pl.BlockSpec((1, tq, dk), lambda b, h, qi, ki: (b, qi, h)),
            pl.BlockSpec((1, tkv, dk), lambda b, h, qi, ki: (b, ki, h)),
            pl.BlockSpec((1, tkv, dk), lambda b, h, qi, ki: (b, ki, h)),
            pl.BlockSpec((1, 1, tq, tkv), lambda b, h, qi, ki: (b, h, qi, ki)),
        ],
        out_specs=pl.BlockSpec((1, tq, dk), lambda b, h, qi, ki: (b, qi, h)),
        scratch_shapes=[
            pltpu.VMEM((tq, 1), jnp.float32),    # running max
            pltpu.VMEM((tq, 1), jnp.float32),    # running denominator
            pltpu.VMEM((tq, dk), jnp.float32),   # running numerator
        ],
        compiler_params=cparams(("parallel", "parallel", "parallel", "arbitrary")),
    )(q, k, v, bias_c)

    # ---- 3) output projection + residual + LN2 + FFN + residual ------------
    ctx2 = ctx.reshape(rows, H)
    w_ffn = [wcast(params["wo"]), params["bo"],
             params["ln2_g"], params["ln2_b"],
             wcast(params["w1"]), params["b1"],
             wcast(params["w2"]), params["b2"]]
    out = pl.pallas_call(
        out_ffn_kernel,
        out_shape=jax.ShapeDtypeStruct((rows, H), jnp.float32),
        grid=(rows // tr,),
        in_specs=[row_spec, row_spec] + [weight_spec(a) for a in w_ffn],
        out_specs=row_spec,
        compiler_params=cparams(("parallel",)),
    )(x2, ctx2, *w_ffn)
    return out.reshape(B, S, H)


# --------------------------------------------------------------------------
# Plain-JAX reference mirroring the PyTorch EncoderLayer (eval mode).
# --------------------------------------------------------------------------
def encoder_layer_ref(x, attn_bias, params, num_heads):
    B, S, H = x.shape
    dk = H // num_heads
    scale = dk ** (-0.5)

    def ln(v, g, b):
        mu = jnp.mean(v, axis=-1, keepdims=True)
        var = jnp.mean((v - mu) ** 2, axis=-1, keepdims=True)
        return (v - mu) * jax.lax.rsqrt(var + 1e-5) * g + b

    y = ln(x, params["ln1_g"], params["ln1_b"])
    q = (y @ params["wq"] + params["bq"]).reshape(B, S, num_heads, dk).transpose(0, 2, 1, 3)
    k = (y @ params["wk"] + params["bk"]).reshape(B, S, num_heads, dk).transpose(0, 2, 1, 3)
    v = (y @ params["wv"] + params["bv"]).reshape(B, S, num_heads, dk).transpose(0, 2, 1, 3)
    s = jnp.einsum("bhsd,bhtd->bhst", q * scale, k) + attn_bias
    p = jax.nn.softmax(s, axis=-1)
    ctx = jnp.einsum("bhst,bhtd->bhsd", p, v).transpose(0, 2, 1, 3).reshape(B, S, H)
    x1 = x + (ctx @ params["wo"] + params["bo"])

    y2 = ln(x1, params["ln2_g"], params["ln2_b"])
    h = jax.nn.gelu(y2 @ params["w1"] + params["b1"], approximate=False)
    return x1 + (h @ params["w2"] + params["b2"])


def make_params(key, hidden_size, ffn_size):
    ks = jax.random.split(key, 8)
    std = 0.02
    return {
        "ln1_g": jnp.ones((1, hidden_size), jnp.float32),
        "ln1_b": jnp.zeros((1, hidden_size), jnp.float32),
        "wq": jax.random.normal(ks[0], (hidden_size, hidden_size), jnp.float32) * std,
        "bq": jax.random.normal(ks[1], (1, hidden_size), jnp.float32) * std,
        "wk": jax.random.normal(ks[2], (hidden_size, hidden_size), jnp.float32) * std,
        "bk": jnp.zeros((1, hidden_size), jnp.float32),
        "wv": jax.random.normal(ks[3], (hidden_size, hidden_size), jnp.float32) * std,
        "bv": jnp.zeros((1, hidden_size), jnp.float32),
        "wo": jax.random.normal(ks[4], (hidden_size, hidden_size), jnp.float32) * std,
        "bo": jnp.zeros((1, hidden_size), jnp.float32),
        "ln2_g": jnp.ones((1, hidden_size), jnp.float32),
        "ln2_b": jnp.zeros((1, hidden_size), jnp.float32),
        "w1": jax.random.normal(ks[5], (hidden_size, ffn_size), jnp.float32) * std,
        "b1": jnp.zeros((1, ffn_size), jnp.float32),
        "w2": jax.random.normal(ks[6], (ffn_size, hidden_size), jnp.float32) * std,
        "b2": jnp.zeros((1, hidden_size), jnp.float32),
    }


if __name__ == "__main__":
    # (8,128)-aligned small shapes: 2 heads of dk=128, multiple q/kv tiles so the
    # online-softmax accumulation path and lane-blocked head split are exercised.
    B, S, H, NH, F = 2, 256, 256, 2, 512

    key = jax.random.PRNGKey(0)
    kx, kb, kp = jax.random.split(key, 3)
    x = jax.random.normal(kx, (B, S, H), jnp.float32)
    attn_bias = jax.random.normal(kb, (B, NH, S, S), jnp.float32) * 0.1
    params = make_params(kp, H, F)

    ref = encoder_layer_ref(x, attn_bias, params, NH)

    # f32 parity run (strict check of the kernel structure / softmax / residuals).
    out_f32 = jax.block_until_ready(
        encoder_layer(x, attn_bias, params, NH, compute_dtype=jnp.float32))
    assert out_f32.shape == (B, S, H)
    err = float(jnp.max(jnp.abs(out_f32 - ref)))
    assert err < 2e-3, f"f32 kernel mismatch vs reference: {err}"

    # Default fast path: bf16 weights/intermediates/bias, f32 MXU accumulation.
    out_bf16 = jax.block_until_ready(encoder_layer(x, attn_bias, params, NH))
    err_bf16 = float(jnp.max(jnp.abs(out_bf16 - ref)))
    assert err_bf16 < 5e-2, f"bf16 kernel mismatch vs reference: {err_bf16}"

    print("KERNEL_OK")
</pallas_src>

<mosaic_0001>
module attributes {stable_mosaic.version = 11 : i64} {
  func.func @qkv_kernel(%arg0: i32, %arg1: memref<256x256xf32, #tpu.memory_space<vmem>>, %arg2: memref<1x256xf32, #tpu.memory_space<vmem>>, %arg3: memref<1x256xf32, #tpu.memory_space<vmem>>, %arg4: memref<256x256xf32, #tpu.memory_space<vmem>>, %arg5: memref<1x256xf32, #tpu.memory_space<vmem>>, %arg6: memref<256x256xf32, #tpu.memory_space<vmem>>, %arg7: memref<1x256xf32, #tpu.memory_space<vmem>>, %arg8: memref<256x256xf32, #tpu.memory_space<vmem>>, %arg9: memref<1x256xf32, #tpu.memory_space<vmem>>, %arg10: memref<256x256xf32, #tpu.memory_space<vmem>>, %arg11: memref<256x256xf32, #tpu.memory_space<vmem>>, %arg12: memref<256x256xf32, #tpu.memory_space<vmem>>) attributes {dimension_semantics = [#tpu.dimension_semantics<parallel>], iteration_bounds = array<i64: 2>, scalar_prefetch = 0 : i64, scratch_operands = 0 : i64, tpu.core_type = #tpu.core_type<tc>, window_params = [{transform_indices = @transform_0, window_bounds = array<i64: 256, 256>}, {pipeline_mode = #tpu.pipeline_mode<synchronous>, transform_indices = @transform_1, window_bounds = array<i64: 1, 256>}, {pipeline_mode = #tpu.pipeline_mode<synchronous>, transform_indices = @transform_2, window_bounds = array<i64: 1, 256>}, {pipeline_mode = #tpu.pipeline_mode<synchronous>, transform_indices = @transform_3, window_bounds = array<i64: 256, 256>}, {pipeline_mode = #tpu.pipeline_mode<synchronous>, transform_indices = @transform_4, window_bounds = array<i64: 1, 256>}, {pipeline_mode = #tpu.pipeline_mode<synchronous>, transform_indices = @transform_5, window_bounds = array<i64: 256, 256>}, {pipeline_mode = #tpu.pipeline_mode<synchronous>, transform_indices = @transform_6, window_bounds = array<i64: 1, 256>}, {pipeline_mode = #tpu.pipeline_mode<synchronous>, transform_indices = @transform_7, window_bounds = array<i64: 256, 256>}, {pipeline_mode = #tpu.pipeline_mode<synchronous>, transform_indices = @transform_8, window_bounds = array<i64: 1, 256>}, {transform_indices = @transform_9, window_bounds = array<i64: 256, 256>}, {transform_indices = @transform_10, window_bounds = array<i64: 256, 256>}, {transform_indices = @transform_11, window_bounds = array<i64: 256, 256>}]} {
    %c0 = arith.constant 0 : index
    %c0_0 = arith.constant 0 : index
    %0 = vector.load %arg1[%c0, %c0_0] : memref<256x256xf32, #tpu.memory_space<vmem>>, vector<256x256xf32>
    %c0_1 = arith.constant 0 : index
    %c0_2 = arith.constant 0 : index
    %1 = vector.load %arg2[%c0_1, %c0_2] : memref<1x256xf32, #tpu.memory_space<vmem>>, vector<1x256xf32>
    %c0_3 = arith.constant 0 : index
    %c0_4 = arith.constant 0 : index
    %2 = vector.load %arg3[%c0_3, %c0_4] : memref<1x256xf32, #tpu.memory_space<vmem>>, vector<1x256xf32>
    %cst = arith.constant dense<0.000000e+00> : vector<256xf32>
    %3 = vector.multi_reduction <add>, %0, %cst [1] : vector<256x256xf32> to vector<256xf32>
    %4 = vector.shape_cast %3 : vector<256xf32> to vector<256x1xf32>
    %cst_5 = arith.constant 2.560000e+02 : f32
    %5 = vector.broadcast %cst_5 : f32 to vector<256x1xf32>
    %6 = arith.divf %4, %5 : vector<256x1xf32>
    %7 = vector.broadcast %6 : vector<256x1xf32> to vector<256x256xf32>
    %8 = arith.subf %0, %7 : vector<256x256xf32>
    %9 = arith.mulf %8, %8 : vector<256x256xf32>
    %cst_6 = arith.constant dense<0.000000e+00> : vector<256xf32>
    %10 = vector.multi_reduction <add>, %9, %cst_6 [1] : vector<256x256xf32> to vector<256xf32>
    %11 = vector.shape_cast %10 : vector<256xf32> to vector<256x1xf32>
    %cst_7 = arith.constant 2.560000e+02 : f32
    %12 = vector.broadcast %cst_7 : f32 to vector<256x1xf32>
    %13 = arith.divf %11, %12 : vector<256x1xf32>
    %14 = vector.broadcast %6 : vector<256x1xf32> to vector<256x256xf32>
    %15 = arith.subf %0, %14 : vector<256x256xf32>
    %cst_8 = arith.constant 9.99999974E-6 : f32
    %16 = vector.broadcast %cst_8 : f32 to vector<256x1xf32>
    %17 = arith.addf %13, %16 : vector<256x1xf32>
    %18 = math.rsqrt %17 : vector<256x1xf32>
    %19 = vector.broadcast %18 : vector<256x1xf32> to vector<256x256xf32>
    %20 = arith.mulf %15, %19 : vector<256x256xf32>
    %21 = vector.broadcast %1 : vector<1x256xf32> to vector<256x256xf32>
    %22 = arith.mulf %20, %21 : vector<256x256xf32>
    %23 = vector.broadcast %2 : vector<1x256xf32> to vector<256x256xf32>
    %24 = arith.addf %22, %23 : vector<256x256xf32>
    %c0_9 = arith.constant 0 : index
    %c0_10 = arith.constant 0 : index
    %25 = vector.load %arg4[%c0_9, %c0_10] : memref<256x256xf32, #tpu.memory_space<vmem>>, vector<256x256xf32>
    %cst_11 = arith.constant dense<0.000000e+00> : vector<256x256xf32>
    %26 = tpu.matmul %24, %25, %cst_11 {dimension_numbers = #tpu.dot_dimension_numbers<[1], [0], [0], [1], [0, 0, 1, 1], [], []>} : vector<256x256xf32>, vector<256x256xf32>, vector<256x256xf32> -> vector<256x256xf32>
    %c0_12 = arith.constant 0 : index
    %c0_13 = arith.constant 0 : index
    %27 = vector.load %arg5[%c0_12, %c0_13] : memref<1x256xf32, #tpu.memory_space<vmem>>, vector<1x256xf32>
    %28 = vector.broadcast %27 : vector<1x256xf32> to vector<256x256xf32>
    %29 = arith.addf %26, %28 : vector<256x256xf32>
    %cst_14 = arith.constant 0.0883883461 : f32
    %30 = vector.broadcast %cst_14 : f32 to vector<256x256xf32>
    %31 = arith.mulf %29, %30 : vector<256x256xf32>
    %c0_15 = arith.constant 0 : index
    %c0_16 = arith.constant 0 : index
    %32 = vector.load %arg6[%c0_15, %c0_16] : memref<256x256xf32, #tpu.memory_space<vmem>>, vector<256x256xf32>
    %cst_17 = arith.constant dense<0.000000e+00> : vector<256x256xf32>
    %33 = tpu.matmul %24, %32, %cst_17 {dimension_numbers = #tpu.dot_dimension_numbers<[1], [0], [0], [1], [0, 0, 1, 1], [], []>} : vector<256x256xf32>, vector<256x256xf32>, vector<256x256xf32> -> vector<256x256xf32>
    %c0_18 = arith.constant 0 : index
    %c0_19 = arith.constant 0 : index
    %34 = vector.load %arg7[%c0_18, %c0_19] : memref<1x256xf32, #tpu.memory_space<vmem>>, vector<1x256xf32>
    %35 = vector.broadcast %34 : vector<1x256xf32> to vector<256x256xf32>
    %36 = arith.addf %33, %35 : vector<256x256xf32>
    %c0_20 = arith.constant 0 : index
    %c0_21 = arith.constant 0 : index
    %37 = vector.load %arg8[%c0_20, %c0_21] : memref<256x256xf32, #tpu.memory_space<vmem>>, vector<256x256xf32>
    %cst_22 = arith.constant dense<0.000000e+00> : vector<256x256xf32>
    %38 = tpu.matmul %24, %37, %cst_22 {dimension_numbers = #tpu.dot_dimension_numbers<[1], [0], [0], [1], [0, 0, 1, 1], [], []>} : vector<256x256xf32>, vector<256x256xf32>, vector<256x256xf32> -> vector<256x256xf32>
    %c0_23 = arith.constant 0 : index
    %c0_24 = arith.constant 0 : index
    %39 = vector.load %arg9[%c0_23, %c0_24] : memref<1x256xf32, #tpu.memory_space<vmem>>, vector<1x256xf32>
    %40 = vector.broadcast %39 : vector<1x256xf32> to vector<256x256xf32>
    %41 = arith.addf %38, %40 : vector<256x256xf32>
    %c0_25 = arith.constant 0 : index
    %c0_26 = arith.constant 0 : index
    %42 = vector.load %arg10[%c0_25, %c0_26] : memref<256x256xf32, #tpu.memory_space<vmem>>, vector<256x256xf32>
    tpu.vector_store %arg10[%c0_25, %c0_26], %31 {strides = array<i32>} : memref<256x256xf32, #tpu.memory_space<vmem>>, vector<256x256xf32>,
    %c0_27 = arith.constant 0 : index
    %c0_28 = arith.constant 0 : index
    %43 = vector.load %arg11[%c0_27, %c0_28] : memref<256x256xf32, #tpu.memory_space<vmem>>, vector<256x256xf32>
    tpu.vector_store %arg11[%c0_27, %c0_28], %36 {strides = array<i32>} : memref<256x256xf32, #tpu.memory_space<vmem>>, vector<256x256xf32>,
    %c0_29 = arith.constant 0 : index
    %c0_30 = arith.constant 0 : index
    %44 = vector.load %arg12[%c0_29, %c0_30] : memref<256x256xf32, #tpu.memory_space<vmem>>, vector<256x256xf32>
    tpu.vector_store %arg12[%c0_29, %c0_30], %41 {strides = array<i32>} : memref<256x256xf32, #tpu.memory_space<vmem>>, vector<256x256xf32>,
    return
  }
  func.func @transform_0(%arg0: i32) -> (i32, i32) {
    %c0_i32 = arith.constant 0 : i32
    %c0_i32_0 = arith.constant 0 : i32
    return %arg0, %c0_i32 : i32, i32
  }
  func.func @transform_1(%arg0: i32) -> (i32, i32) {
    %c0_i32 = arith.constant 0 : i32
    %c0_i32_0 = arith.constant 0 : i32
    %c0_i32_1 = arith.constant 0 : i32
    return %c0_i32, %c0_i32_0 : i32, i32
  }
  func.func @transform_2(%arg0: i32) -> (i32, i32) {
    %c0_i32 = arith.constant 0 : i32
    %c0_i32_0 = arith.constant 0 : i32
    %c0_i32_1 = arith.constant 0 : i32
    return %c0_i32, %c0_i32_0 : i32, i32
  }
  func.func @transform_3(%arg0: i32) -> (i32, i32) {
    %c0_i32 = arith.constant 0 : i32
    %c0_i32_0 = arith.constant 0 : i32
    %c0_i32_1 = arith.constant 0 : i32
    return %c0_i32, %c0_i32_0 : i32, i32
  }
  func.func @transform_4(%arg0: i32) -> (i32, i32) {
    %c0_i32 = arith.constant 0 : i32
    %c0_i32_0 = arith.constant 0 : i32
    %c0_i32_1 = arith.constant 0 : i32
    return %c0_i32, %c0_i32_0 : i32, i32
  }
  func.func @transform_5(%arg0: i32) -> (i32, i32) {
    %c0_i32 = arith.constant 0 : i32
    %c0_i32_0 = arith.constant 0 : i32
    %c0_i32_1 = arith.constant 0 : i32
    return %c0_i32, %c0_i32_0 : i32, i32
  }
  func.func @transform_6(%arg0: i32) -> (i32, i32) {
    %c0_i32 = arith.constant 0 : i32
    %c0_i32_0 = arith.constant 0 : i32
    %c0_i32_1 = arith.constant 0 : i32
    return %c0_i32, %c0_i32_0 : i32, i32
  }
  func.func @transform_7(%arg0: i32) -> (i32, i32) {
    %c0_i32 = arith.constant 0 : i32
    %c0_i32_0 = arith.constant 0 : i32
    %c0_i32_1 = arith.constant 0 : i32
    return %c0_i32, %c0_i32_0 : i32, i32
  }
  func.func @transform_8(%arg0: i32) -> (i32, i32) {
    %c0_i32 = arith.constant 0 : i32
    %c0_i32_0 = arith.constant 0 : i32
    %c0_i32_1 = arith.constant 0 : i32
    return %c0_i32, %c0_i32_0 : i32, i32
  }
  func.func @transform_9(%arg0: i32) -> (i32, i32) {
    %c0_i32 = arith.constant 0 : i32
    %c0_i32_0 = arith.constant 0 : i32
    return %arg0, %c0_i32 : i32, i32
  }
  func.func @transform_10(%arg0: i32) -> (i32, i32) {
    %c0_i32 = arith.constant 0 : i32
    %c0_i32_0 = arith.constant 0 : i32
    return %arg0, %c0_i32 : i32, i32
  }
  func.func @transform_11(%arg0: i32) -> (i32, i32) {
    %c0_i32 = arith.constant 0 : i32
    %c0_i32_0 = arith.constant 0 : i32
    return %arg0, %c0_i32 : i32, i32
  }
}

</mosaic_0001>

<bundles_post_ra>
// kernel: tpu_custom_call.1
= control target key start
LH: loop header
LB: loop body
LE: loop exit
PB: predicated region body
PF: predicated region fallthrough
CT: control target
= control target key end

     0   :  { %s5144_s0 = inlined_call_operand.hbm [shape: f32[512,256], index: 0, kind: input, shape index: {}]   ;;  %s5145_s1 = inlined_call_operand.hbm [shape: f32[1,256], index: 1, kind: input, shape index: {}]   ;;  %s5146_s2 = inlined_call_operand.vmem [shape: f32[1,256], index: 2, kind: input, shape index: {}]   ;;  %s5147_s3 = inlined_call_operand.hbm [shape: f32[256,256], index: 3, kind: input, shape index: {}]   ;;  %s5148_s4 = inlined_call_operand.vmem [shape: f32[1,256], index: 4, kind: input, shape index: {}]   ;;  %s5149_s5 = inlined_call_operand.hbm [shape: f32[256,256], index: 5, kind: input, shape index: {}]   ;;  %s5150_s6 = inlined_call_operand.vmem [shape: f32[1,256], index: 6, kind: input, shape index: {}]   ;;  %s5151_s7 = inlined_call_operand.hbm [shape: f32[256,256], index: 7, kind: input, shape index: {}]   ;;  %s5152_s8 = inlined_call_operand.vmem [shape: f32[1,256], index: 8, kind: input, shape index: {}]   ;;  %s5153_s9 = inlined_call_operand.hbm [shape: f32[512,256], index: 9, kind: output, shape index: {0}]   ;;  %s5154_s10 = inlined_call_operand.hbm [shape: f32[512,256], index: 10, kind: output, shape index: {1}]   ;;  %s5155_s11 = inlined_call_operand.hbm [shape: f32[512,256], index: 11, kind: output, shape index: {2}]  }
   0x1   :  { %5240 = sst [smem:[#allocation53_spill]] %s5145_s1 }
   0x2   :  { %5241 = sst [smem:[#allocation54_spill]] %s5147_s3 }
   0x3   :  { %5242 = sst [smem:[#allocation55_spill]] %s5149_s5 }
   0x4   :  { %5243 = sst [smem:[#allocation56_spill]] %s5151_s7 }
   0x5   :  { %17 = vsyncpa [#allocation3], 0 }
   0x6   :  { %19 = vsyncpa [#allocation3 + $0x1], 0 }
   0x7   :  { %20 = vsyncpa [#allocation6], 0 }
   0x8   :  { %21 = vsyncpa [#allocation9], 0 }
   0x9   :  { %22 = vsyncpa [#allocation4], 0 }
   0xa   :  { %24 = vsyncpa [#allocation4 + $0x1], 0 }
   0xb   :  { %25 = vsyncpa [#allocation13], 0 }
   0xc   :  { %27 = vsyncpa [#allocation13 + $0x1], 0  ;;  %s3304_s17 = smov 0   ;;  %s3306_s18 = smov 0  }
   0xd   :  { %s3308_s19 = smov 0   ;;  %s3310_s20 = smov 0  }
   0xe LB: > { %s3325_s21 = sadd.s32 4294967295, %s3230_s20   ;;  %s5159_s22 = sadd.s32 4294967294, %s3230_s20   ;;  %s3230_s20 = sphi %s3310_s20, %s5386_s20   ;;  %s3226_s19 = sphi %s3308_s19, %s5385_s19   ;;  %s3222_s18 = sphi %s3306_s18, %s5384_s18   ;;  %s3218_s17 = sphi %s3304_s17, %s5383_s17  }
   0xf   : > { %p53_p0 = scmp.ne.s32.totalorder %s3222_s18, %s3218_s17  ;;  %p5156_p1 = scmp.eq.s32.totalorder %s3325_s21, 0 }
  0x10   : > { %p251_p3 = scmp.eq.s32.totalorder %s5159_s22, 1  ;;  %p2700_p5 = scmp.ge.s32.totalorder %s3230_s20, 1 }
  0x11   : > { %p3336_p4 = por %p5156_p1, %p53_p0  ;;  %p310_p7 = scmp.lt.s32.totalorder %s3230_s20, 3 }
  0x12   : > { %p3341_p6 = por %p251_p3, %p53_p0  ;;  %s3232_s26 = smov [#allocation5]  }
  0x13   : > { %s5244_s23 = scalar_select %p3336_p4, 1, 0 }
  0x14   : > { %s5245_s24 = scalar_select %p3341_p6, 1, 0 }
  0x15   : > { %p3346_p8 = pnand %p2700_p5, %p310_p7  ;;  %s323_s27 = sshll.u32 %s3232_s26, 4  ;;  %s324_s27 = int_to_ptr.vmem [resolvable:$true] %s323_s27 }
  0x16   : > { %s3233_s29 = smov [#allocation8]   ;;  %s3234_s12 = smov [#allocation7]  }
  0x17   : > { %s5246_s25 = scalar_select %p3346_p8, 1, 0 }
  0x18   : > { %p2829_p10 = pneg %p3346_p8  ;;  %s352_s30 = sshll.u32 %s3233_s29, 4  ;;  %s353_s30 = int_to_ptr.vmem [resolvable:$true] %s352_s30 }
  0x19   : > { %s336_s13 = sshll.u32 %s3234_s12, 4  ;;  %s2981_s14 = scalar_lea.vmem %s324_s27, 32  ;;  %s337_s13 = int_to_ptr.vmem [resolvable:$true] %s336_s13 }
  0x1a   : > { %p3355_p11 = pnand %p2829_p10, %p5156_p1  ;;  %p2982_p13 = scmp.ne.s32.totalorder %s324_s27, %s2981_s14 }
  0x1b   : > { %p2989_p5 = scmp.lt.s32.totalorder %s324_s27, %s324_s27  ;;  %p2990_p7 = scmp.lt.s32.totalorder %s2981_s14, %s2981_s14 }
  0x1c   : > { %p2972_p12 = pneg %p3355_p11 }
  0x1d   : > { %p2991_p10 = por %p2990_p7, %p2989_p5 }
  0x1e   : > { %p2984_p0 = pnand %p2982_p13, %p2972_p12 }
  0x20   : > { %p2985_p3 = pneg %p2984_p0 }
  0x22   : > { %p2992_p9 = pnand %p2991_p10, %p2985_p3 }
  0x24   : > { %2995 = shalt.err (!%p2992_p9)
}
  0x25   : > { %s5248_s1 = sld [smem:[#allocation53_spill]]  ;;  %s3007_s26 = scalar_lea.vmem %s353_s30, 8192 }
  0x26   : > { %p3008_p1 = scmp.ne.s32.totalorder %s353_s30, %s3007_s26  ;;  %p3015_p13 = scmp.lt.s32.totalorder %s353_s30, %s353_s30 }
  0x27   : > { %p3016_p0 = scmp.lt.s32.totalorder %s3007_s26, %s3007_s26 }
  0x28   : > { %p3010_p2 = pnand %p3008_p1, %p2972_p12 }
  0x29   : > { %p3017_p4 = por %p3016_p0, %p3015_p13 }
  0x2a   : > { %p3011_p6 = pneg %p3010_p2 }
  0x2b   : > { %2832 = dma.hbm_to_vmem [thread:$0]  (!%p3355_p11), %s5248_s1, 32, %s324_s27, [#allocation6]  }
  0x2c   : > { %p3018_p8 = pnand %p3017_p4, %p3011_p6 }
  0x2e   : > { %3021 = shalt.err (!%p3018_p8)
}
  0x2f   : > { %s5160_s29 = smov 256   ;;  %s5161_s12 = smov 16  }
  0x30   : > { %s5249_s5 = sld [smem:[#allocation55_spill]]  ;;  %s3033_s15 = scalar_lea.vmem %s337_s13, 8192 }
  0x31   : > { %p3034_p1 = scmp.ne.s32.totalorder %s337_s13, %s3033_s15  ;;  %p3041_p6 = scmp.lt.s32.totalorder %s337_s13, %s337_s13 }
  0x32   : > { %p3042_p8 = scmp.lt.s32.totalorder %s3033_s15, %s3033_s15 }
  0x33   : > { %p3036_p2 = pnand %p3034_p1, %p2972_p12 }
  0x34   : > { %p3043_p9 = por %p3042_p8, %p3041_p6 }
  0x35   : > { %p3037_p4 = pneg %p3036_p2 }
  0x36   : > { %2838 = dma.hbm_to_vmem [thread:$0]  (!%p3355_p11), %s5249_s5, 8192, %s353_s30, [#allocation9], %s5160_s29, %s5160_s29, %s5161_s12  }
  0x37   : > { %p3044_p3 = pnand %p3043_p9, %p3037_p4 }
  0x39   : > { %3047 = shalt.err (!%p3044_p3)
}
  0x3a   : > { %s5250_s3 = sld [smem:[#allocation54_spill]]  ;;  %s3237_s30 = smov [#allocation10]  }
  0x3b   : > { %s368_s27 = sshll.u32 %s3237_s30, 4  ;;  %s369_s27 = int_to_ptr.vmem [resolvable:$true] %s368_s27 }
  0x3c   : > { %s3059_s14 = scalar_lea.vmem %s369_s27, 8192  ;;  %p3067_p13 = scmp.lt.s32.totalorder %s369_s27, %s369_s27 }
  0x3d   : > { %p3060_p5 = scmp.ne.s32.totalorder %s369_s27, %s3059_s14  ;;  %p3068_p0 = scmp.lt.s32.totalorder %s3059_s14, %s3059_s14 }
  0x3f   : > { %p3062_p7 = pnand %p3060_p5, %p2972_p12  ;;  %p3069_p1 = por %p3068_p0, %p3067_p13 }
  0x40   : > { %2835 = dma.hbm_to_vmem [thread:$0]  (!%p3355_p11), %s5250_s3, 8192, %s337_s13, [#allocation6], %s5160_s29, %s5160_s29, %s5161_s12  }
  0x41   : > { %p3063_p10 = pneg %p3062_p7 }
  0x43   : > { %p3070_p2 = pnand %p3069_p1, %p3063_p10 }
  0x45   : > { %3073 = shalt.err (!%p3070_p2)
}
  0x46   : > { %s5251_s7 = sld [smem:[#allocation56_spill]]  ;;  %s3403_s16 = sadd.s32 1, %s3230_s20  }
  0x47   : > { %s40_s28 = sadd.s32 1, %s3226_s19  ;;  %s37_s26 = ssub.s32 %s3230_s20, %s3403_s16 }
  0x48   : > { %p47_p12 = scmp.ne.s32.totalorder %s3226_s19, %s3222_s18  ;;  %p38_p4 = scmp.eq.s32.totalorder %s37_s26, 0 }
  0x49   : > { %p48_p6 = scmp.eq.s32.totalorder %s3230_s20, 0  ;;  %p5252_p8 = scmp.eq.s32.totalorder %s3325_s21, 1 }
  0x4a   : > { %p2860_p3 = scmp.lt.s32.totalorder %s3230_s20, 2  ;;  %s385_s13 = sand.u32 1, %s3226_s19  }
  0x4b   : > { %p3413_p9 = por %p5252_p8, %p47_p12  ;;  %p49_p5 = por %p48_p6, %p47_p12 }
  0x4c   : > { %2841 = dma.hbm_to_vmem [thread:$0]  (!%p3355_p11), %s5251_s7, 8192, %s369_s27, [#allocation9], %s5160_s29, %s5160_s29, %s5161_s12  }
  0x4d   : > { %s5253_s30 = scalar_select %p3413_p9, 1, 0 }
  0x4e   : > { %s3419_s14 = scalar_select %p38_p4, %s3226_s19, %s40_s28  }
  0x4f   : > { %s2706_s15 = sshll.u32 %s385_s13, 9  ;;  %s2734_s27 = sshll.u32 %s3230_s20, 13 }
  0x50   : > { %5254 = sst [smem:[#allocation20_spill]] %s3419_s14  ;;  %s3426_s12 = scalar_lea.hbm %s5144_s0, %s2734_s27 }
  0x51   : > { %s389_s26 = scalar_lea.vmem [#allocation2], %s2706_s15  ;;  %p3430_p11 = pnand %p2860_p3, %p49_p5 }
  0x52   : > { %s397_s1 = sshll.u32 %s389_s26, 4  ;;  %s3434_s28 = scalar_lea.sflag [#allocation3], %s385_s13  ;;  %s3428_s1 = int_to_ptr.vmem [resolvable:$true] %s397_s1 }
  0x53   : > { %s3074_s5 = scalar_lea.hbm %s3426_s12, 8192  ;;  %p3076_p10 = pneg %p3430_p11 }
  0x54   : > { %p3075_p7 = scmp.ne.s32.totalorder %s3426_s12, %s3074_s5  ;;  %s3079_s15 = scalar_lea.hbm %s5144_s0, 16384 }
  0x55   : > { %p3080_p1 = scmp.lt.s32.totalorder %s3426_s12, %s5144_s0  ;;  %p3081_p2 = scmp.lt.s32.totalorder %s3079_s15, %s3074_s5 }
  0x56   : > { %p3077_p13 = pnand %p3076_p10, %p3075_p7 }
  0x57   : > { %p3082_p12 = por %p3081_p2, %p3080_p1 }
  0x58   : > { %p3078_p0 = pneg %p3077_p13 }
  0x5a   : > { %p3083_p4 = pnand %p3082_p12, %p3078_p0 }
  0x5c   : > { %3086 = shalt.err (!%p3083_p4)
}
  0x5d   : > { %s3087_s13 = scalar_lea.vmem %s3428_s1, 8192  ;;  %s3238_s7 = smov [#allocation2]  }
  0x5e   : > { %p3088_p6 = scmp.ne.s32.totalorder %s3428_s1, %s3087_s13  ;;  %s3092_s14 = sshll.u32 %s3238_s7, 4  ;;  %s3093_s14 = int_to_ptr.vmem [resolvable:$false] %s3092_s14 }
  0x5f   : > { %s3094_s22 = scalar_lea.vmem %s3093_s14, 16384  ;;  %p3095_p5 = scmp.lt.s32.totalorder %s3428_s1, %s3093_s14 }
  0x60   : > { %p3090_p8 = pnand %p3088_p6, %p3076_p10  ;;  %p3096_p7 = scmp.lt.s32.totalorder %s3094_s22, %s3087_s13 }
  0x62   : > { %p3091_p3 = pneg %p3090_p8  ;;  %p3097_p13 = por %p3096_p7, %p3095_p5 }
  0x64   : > { %p3098_p9 = pnand %p3097_p13, %p3091_p3 }
  0x66   : > { %3101 = shalt.err (!%p3098_p9)
}
  0x67   : > { %s5256_s5 = smov 16   ;;  %s5257_s29 = smov 256  }
  0x68   : > { %2845 = dma.hbm_to_vmem [thread:$0]  (!%p3430_p11), %s3426_s12, 8192, %s3428_s1, %s3434_s28, %s5257_s29, %s5257_s29, %s5256_s5  }
  0x69   : > { %p5258_p10 = scmp.ne.s32.totalorder %s5246_s25, 0 }
  0x6b   : > { %409 = sbr.rel (%p5258_p10) target bundleno = 907 (0x38b), region = 56 }
  0x70   : > { %s3461_s7 = sand.u32 1, %s3222_s18   ;;  %p5259_p9 = scmp.ne.s32.totalorder %s5244_s23, 0 }
  0x71   : > { %s3464_s14 = sshll.u32 %s3461_s7, 9  ;;  %s412_s3 = scalar_lea.sflag [#allocation3], %s3461_s7 }
  0x72   : > { %s3468_s15 = scalar_lea.vmem [#allocation2], %s3464_s14 }
  0x73   : > { %3197 = dma.done.wait (%p5259_p9), %s412_s3, 8192  }
  0x74   : > { %3199 = vsyncadd (%p5259_p9), %s412_s3, 4294959104  ;;  %p5260_p11 = scmp.eq.s32.totalorder %s3325_s21, 0 }
  0x76   : > { %3201 = dma.done.wait (%p5260_p11), [#allocation6], 8224   ;;  %p5261_p0 = pmov %p5260_p11 }
  0x78   : > { %3203 = vsyncadd (%p5261_p0), [#allocation6], 4294959072  ;;  %p5262_p1 = pmov %p5261_p0 }
  0x79   : > { %p5263_p2 = pmov %p5261_p0 }
  0x7a   : > { %3205 = dma.done.wait (%p5262_p1), [#allocation9], 16384  }
  0x7b   : > { %3207 = vsyncadd (%p5263_p2), [#allocation9], 4294950912  ;;  %v3483_v0 = vld [vmem:[%s3468_s15 + $0x100] sm:$0xff]  ;;  %v3486_v1 = vld [vmem:[%s3468_s15 + $0x108] sm:$0xff]  ;;  %s4585_s28 = scalar_lea.vmem [#allocation11], %s3464_s14  ;;  %s4755_s5 = scalar_lea.vmem [#allocation12], %s3464_s14 }
  0x7c   : > { %v3489_v2 = vld [vmem:[%s3468_s15 + $0x110] sm:$0xff]  ;;  %v598_v3 = vadd.f32 %v3486_v1, %v3483_v0  ;;  %v3494_v4 = vld [vmem:[%s3468_s15 + $0x118] sm:$0xff]  ;;  %v3497_v5 = vld [vmem:[%s3468_s15] sm:$0xff]  ;;  %s4765_s29 = scalar_lea.vmem [#allocation14], %s3464_s14  ;;  %s4770_s3 = sshll.u32 %s3325_s21, 13 }
  0x7d   : > { %v3500_v6 = vld [vmem:[%s3468_s15 + $0x8] sm:$0xff]  ;;  %v601_v7 = vadd.f32 %v3494_v4, %v3489_v2  ;;  %v3505_v8 = vld [vmem:[%s3468_s15 + $0x10] sm:$0xff]  ;;  %v3508_v9 = vld [vmem:[%s3468_s15 + $0x18] sm:$0xff]  ;;  %s4782_s1 = scalar_lea.hbm %s5153_s9, %s4770_s3  ;;  %s2493_s23 = sshll.u32 %s4585_s28, 4  ;;  %s4787_s23 = int_to_ptr.vmem [resolvable:$true] %s2493_s23 }
  0x7e   : > { %599 = vadd.xlane.f32.xlu0 %v598_v3  ;;  %v550_v10 = vadd.f32 %v3500_v6, %v3497_v5  ;;  %v553_v11 = vadd.f32 %v3508_v9, %v3505_v8  ;;  %v3515_v12 = vld [vmem:[%s3468_s15 + $0x120] sm:$0xff]  ;;  %v3518_v13 = vld [vmem:[%s3468_s15 + $0x128] sm:$0xff]  ;;  %v3531_v18 = vld [vmem:[%s3468_s15 + $0x130] sm:$0xff]  ;;  %s3102_s12 = scalar_lea.vmem %s4787_s23, 8192  ;;  %p5376_p4 = scmp.ne.s32.totalorder %s5253_s30, 0 }
  0x7f   : > { %602 = vadd.xlane.f32.xlu1 %v601_v7  ;;  %v3521_v14 = vld [vmem:[%s3468_s15 + $0x20] sm:$0xff]  ;;  %v3524_v15 = vld [vmem:[%s3468_s15 + $0x28] sm:$0xff]  ;;  %v604_v16 = vadd.f32 %v3518_v13, %v3515_v12  ;;  %v3534_v19 = vld [vmem:[%s3468_s15 + $0x138] sm:$0xff]  ;;  %p3103_p12 = scmp.ne.s32.totalorder %s4787_s23, %s3102_s12 }
  0x80   : > { %v556_v17 = vadd.f32 %v3524_v15, %v3521_v14  ;;  %v3537_v20 = vld [vmem:[%s3468_s15 + $0x30] sm:$0xff]  ;;  %v3540_v21 = vld [vmem:[%s3468_s15 + $0x38] sm:$0xff]  ;;  %v607_v22 = vadd.f32 %v3534_v19, %v3531_v18  ;;  %v3547_v24 = vld [vmem:[%s3468_s15 + $0x140] sm:$0xff] }
  0x81   : > { %v559_v23 = vadd.f32 %v3540_v21, %v3537_v20  ;;  %v3550_v25 = vld [vmem:[%s3468_s15 + $0x148] sm:$0xff]  ;;  %v3553_v26 = vld [vmem:[%s3468_s15 + $0x40] sm:$0xff]  ;;  %v3563_v30 = vld [vmem:[%s3468_s15 + $0x150] sm:$0xff]  ;;  %p3104_p6 = pnand %p3103_p12, %p5376_p4 }
  0x82   : > { %551 = vadd.xlane.f32.xlu0 %v550_v10  ;;  %v3556_v27 = vld [vmem:[%s3468_s15 + $0x48] sm:$0xff]  ;;  %v610_v28 = vadd.f32 %v3550_v25, %v3547_v24  ;;  %v3566_v31 = vld [vmem:[%s3468_s15 + $0x158] sm:$0xff]  ;;  %v3569_v32 = vld [vmem:[%s3468_s15 + $0x50] sm:$0xff] }
  0x83   : > { %554 = vadd.xlane.f32.xlu1 %v553_v11  ;;  %v562_v29 = vadd.f32 %v3556_v27, %v3553_v26  ;;  %v3572_v33 = vld [vmem:[%s3468_s15 + $0x58] sm:$0xff]  ;;  %v613_v34 = vadd.f32 %v3566_v31, %v3563_v30  ;;  %v3579_v36 = vld [vmem:[%s3468_s15 + $0x160] sm:$0xff]  ;;  %v3582_v37 = vld [vmem:[%s3468_s15 + $0x168] sm:$0xff]  ;;  %p3105_p8 = pneg %p3104_p6 }
  0x84   : > { %v565_v35 = vadd.f32 %v3572_v33, %v3569_v32  ;;  %v3585_v38 = vld [vmem:[%s3468_s15 + $0x60] sm:$0xff]  ;;  %v3588_v39 = vld [vmem:[%s3468_s15 + $0x68] sm:$0xff]  ;;  %v616_v40 = vadd.f32 %v3582_v37, %v3579_v36  ;;  %v3595_v42 = vld [vmem:[%s3468_s15 + $0x170] sm:$0xff] }
  0x85   : > { %v568_v41 = vadd.f32 %v3588_v39, %v3585_v38  ;;  %v3598_v43 = vld [vmem:[%s3468_s15 + $0x178] sm:$0xff]  ;;  %v3601_v44 = vld [vmem:[%s3468_s15 + $0x70] sm:$0xff]  ;;  %v3611_v48 = vld [vmem:[%s3468_s15 + $0x180] sm:$0xff] }
  0x86   : > { %605 = vadd.xlane.f32.xlu0 %v604_v16  ;;  %v3604_v45 = vld [vmem:[%s3468_s15 + $0x78] sm:$0xff]  ;;  %v619_v46 = vadd.f32 %v3598_v43, %v3595_v42  ;;  %v3614_v49 = vld [vmem:[%s3468_s15 + $0x188] sm:$0xff]  ;;  %v3617_v50 = vld [vmem:[%s3468_s15 + $0x80] sm:$0xff] }
  0x87   : > { %557 = vadd.xlane.f32.xlu1 %v556_v17  ;;  %v571_v47 = vadd.f32 %v3604_v45, %v3601_v44  ;;  %v3620_v51 = vld [vmem:[%s3468_s15 + $0x88] sm:$0xff]  ;;  %v622_v52 = vadd.f32 %v3614_v49, %v3611_v48  ;;  %v3627_v54 = vld [vmem:[%s3468_s15 + $0x190] sm:$0xff]  ;;  %v3630_v55 = vld [vmem:[%s3468_s15 + $0x198] sm:$0xff] }
  0x88   : > { %v574_v53 = vadd.f32 %v3620_v51, %v3617_v50  ;;  %v3633_v56 = vld [vmem:[%s3468_s15 + $0x90] sm:$0xff]  ;;  %v3636_v57 = vld [vmem:[%s3468_s15 + $0x98] sm:$0xff]  ;;  %v625_v58 = vadd.f32 %v3630_v55, %v3627_v54  ;;  %v3643_v60 = vld [vmem:[%s3468_s15 + $0x1a0] sm:$0xff] }
  0x89   : > { %v577_v59 = vadd.f32 %v3636_v57, %v3633_v56  ;;  %v3646_v61 = vld [vmem:[%s3468_s15 + $0x1a8] sm:$0xff]  ;;  %v3649_v62 = vld [vmem:[%s3468_s15 + $0xa0] sm:$0xff]  ;;  %v3659_v10 = vld [vmem:[%s3468_s15 + $0x1b0] sm:$0xff] }
  0x8a   : > { %608 = vadd.xlane.f32.xlu0 %v607_v22  ;;  %v3652_v63 = vld [vmem:[%s3468_s15 + $0xa8] sm:$0xff]  ;;  %v628_v3 = vadd.f32 %v3646_v61, %v3643_v60  ;;  %v3662_v11 = vld [vmem:[%s3468_s15 + $0x1b8] sm:$0xff]  ;;  %v3665_v16 = vld [vmem:[%s3468_s15 + $0xb0] sm:$0xff] }
  0x8b   : > { %560 = vadd.xlane.f32.xlu1 %v559_v23  ;;  %v580_v7 = vadd.f32 %v3652_v63, %v3649_v62  ;;  %v3668_v17 = vld [vmem:[%s3468_s15 + $0xb8] sm:$0xff]  ;;  %v631_v22 = vadd.f32 %v3662_v11, %v3659_v10 }
  0x8c   : > { %v583_v23 = vadd.f32 %v3668_v17, %v3665_v16 }
  0x8e   : > { %611 = vadd.xlane.f32.xlu0 %v610_v28  ;;  %v3675_v28 = vld [vmem:[%s3468_s15 + $0x1c0] sm:$0xff] }
  0x8f   : > { %563 = vadd.xlane.f32.xlu1 %v562_v29  ;;  %v3678_v29 = vld [vmem:[%s3468_s15 + $0x1c8] sm:$0xff] }
  0x92   : > { %614 = vadd.xlane.f32.xlu0 %v613_v34  ;;  %v3681_v34 = vld [vmem:[%s3468_s15 + $0xc0] sm:$0xff] }
  0x93   : > { %566 = vadd.xlane.f32.xlu1 %v565_v35  ;;  %v3684_v35 = vld [vmem:[%s3468_s15 + $0xc8] sm:$0xff] }
  0x94   : > { %5264 = vst [vmem:[#allocation21_spill] sm:$0xff] %v3684_v35 }
  0x96   : > { %617 = vadd.xlane.f32.xlu0 %v616_v40  ;;  %v634_v40 = vadd.f32 %v3678_v29, %v3675_v28 }
  0x97   : > { %569 = vadd.xlane.f32.xlu1 %v568_v41  ;;  %v586_v41 = vadd.f32 %v3684_v35, %v3681_v34 }
  0x9a   : > { %620 = vadd.xlane.f32.xlu0 %v619_v46  ;;  %v3691_v46 = vld [vmem:[%s3468_s15 + $0x1d0] sm:$0xff] }
  0x9b   : > { %572 = vadd.xlane.f32.xlu1 %v571_v47  ;;  %5265 = vst [vmem:[#allocation22_spill] sm:$0xff] %v3691_v46  ;;  %v3694_v47 = vld [vmem:[%s3468_s15 + $0x1d8] sm:$0xff] }
  0x9c   : > { %5266 = vst [vmem:[#allocation23_spill] sm:$0xff] %v3694_v47 }
  0x9e   : > { %623 = vadd.xlane.f32.xlu0 %v622_v52  ;;  %v3697_v52 = vld [vmem:[%s3468_s15 + $0xd0] sm:$0xff] }
  0x9f   : > { %575 = vadd.xlane.f32.xlu1 %v574_v53  ;;  %5267 = vst [vmem:[#allocation24_spill] sm:$0xff] %v3697_v52  ;;  %v3700_v53 = vld [vmem:[%s3468_s15 + $0xd8] sm:$0xff] }
  0xa0   : > { %5268 = vst [vmem:[#allocation25_spill] sm:$0xff] %v3700_v53 }
  0xa2   : > { %626 = vadd.xlane.f32.xlu0 %v625_v58  ;;  %v637_v58 = vadd.f32 %v3694_v47, %v3691_v46  ;;  %v3726_v47 = vld [vmem:[%s3468_s15 + $0x1f8] sm:$0xff] }
  0xa3   : > { %578 = vadd.xlane.f32.xlu1 %v577_v59  ;;  %v589_v59 = vadd.f32 %v3700_v53, %v3697_v52  ;;  %5273 = vst [vmem:[#allocation30_spill] sm:$0xff] %v3726_v47  ;;  %v3729_v53 = vld [vmem:[%s3468_s15 + $0xf0] sm:$0xff]  ;;  %v3732_v52 = vld [vmem:[%s3468_s15 + $0xf8] sm:$0xff] }
  0xa4   : > { %5274 = vst [vmem:[#allocation31_spill] sm:$0xff] %v3729_v53  ;;  %5275 = vst [vmem:[#allocation32_spill] sm:$0xff] %v3732_v52 }
  0xa6   : > { %629 = vadd.xlane.f32.xlu0 %v628_v3  ;;  %v3707_v3 = vld [vmem:[%s3468_s15 + $0x1e0] sm:$0xff] }
  0xa7   : > { %581 = vadd.xlane.f32.xlu1 %v580_v7  ;;  %5269 = vst [vmem:[#allocation26_spill] sm:$0xff] %v3707_v3  ;;  %v3710_v7 = vld [vmem:[%s3468_s15 + $0x1e8] sm:$0xff] }
  0xa8   : > { %5270 = vst [vmem:[#allocation27_spill] sm:$0xff] %v3710_v7  ;;  %v640_v35 = vadd.f32 %v3710_v7, %v3707_v3  ;;  %v1241_v7 = vld [vmem:[#allocation7 + $0xe0] sm:$0xff]  ;;  %v1240_v3 = vld [vmem:[#allocation7 + $0xd8] sm:$0xff] }
  0xaa   : > { %632 = vadd.xlane.f32.xlu0 %v631_v22  ;;  %v3713_v22 = vld [vmem:[%s3468_s15 + $0xe0] sm:$0xff] }
  0xab   : > { %584 = vadd.xlane.f32.xlu1 %v583_v23  ;;  %5271 = vst [vmem:[#allocation28_spill] sm:$0xff] %v3713_v22  ;;  %v3716_v23 = vld [vmem:[%s3468_s15 + $0xe8] sm:$0xff] }
  0xac   : > { %5272 = vst [vmem:[#allocation29_spill] sm:$0xff] %v3716_v23 }
  0xae   : > { %635 = vadd.xlane.f32.xlu0 %v634_v40  ;;  %v592_v40 = vadd.f32 %v3716_v23, %v3713_v22  ;;  %v1243_v23 = vld [vmem:[#allocation7 + $0xf0] sm:$0xff]  ;;  %v1242_v22 = vld [vmem:[#allocation7 + $0xe8] sm:$0xff] }
  0xaf   : > { %587 = vadd.xlane.f32.xlu1 %v586_v41  ;;  %v3723_v41 = vld [vmem:[%s3468_s15 + $0x1f0] sm:$0xff] }
  0xb0   : > { %v643_v46 = vadd.f32 %v3726_v47, %v3723_v41 }
  0xb2   : > { %638 = vadd.xlane.f32.xlu0 %v637_v58  ;;  %v595_v58 = vadd.f32 %v3732_v52, %v3729_v53  ;;  %v1237_v52 = vld [vmem:[#allocation7 + $0xc0] sm:$0xff] }
  0xb3   : > { %590 = vadd.xlane.f32.xlu1 %v589_v59  ;;  %v1244_v59 = vld [vmem:[#allocation7 + $0xf8] sm:$0xff] }
  0xb4   : > { %2741 = vmatprep.subr.mxu1 %v1244_v59  ;;  %1289 = vmatprep.subr.mxu0 %v1244_v59  ;;  %v1234_v59 = vld [vmem:[#allocation7 + $0xa8] sm:$0xff] }
  0xb5   : > { %2773 = vmatpush1.msra.mxu1 %v1243_v23  ;;  %1290 = vmatpush1.msra.mxu0 %v1243_v23  ;;  %v1233_v23 = vld [vmem:[#allocation7 + $0xa0] sm:$0xff] }
  0xb6   : > { %641 = vadd.xlane.f32.xlu0 %v640_v35  ;;  %2742 = vmatprep.subr.mxu1 %v1242_v22  ;;  %v1239_v35 = vld [vmem:[#allocation7 + $0xd0] sm:$0xff] }
  0xb7   : > { %593 = vadd.xlane.f32.xlu1 %v592_v40  ;;  %1291 = vmatprep.subr.mxu0 %v1242_v22  ;;  %v1238_v40 = vld [vmem:[#allocation7 + $0xc8] sm:$0xff]  ;;  %v1232_v22 = vld [vmem:[#allocation7 + $0x98] sm:$0xff] }
  0xb8   : > { %2774 = vmatpush1.msra.mxu1 %v1241_v7  ;;  %1292 = vmatpush1.msra.mxu0 %v1241_v7  ;;  %v1231_v7 = vld [vmem:[#allocation7 + $0x90] sm:$0xff] }
  0xb9   : > { %2743 = vmatprep.subr.mxu1 %v1240_v3  ;;  %1293 = vmatprep.subr.mxu0 %v1240_v3  ;;  %v1230_v3 = vld [vmem:[#allocation7 + $0x88] sm:$0xff] }
  0xba   : > { %644 = vadd.xlane.f32.xlu0 %v643_v46  ;;  %2775 = vmatpush1.msra.mxu1 %v1239_v35  ;;  %v1236_v46 = vld [vmem:[#allocation7 + $0xb8] sm:$0xff] }
  0xbb   : > { %596 = vadd.xlane.f32.xlu1 %v595_v58  ;;  %1294 = vmatpush1.msra.mxu0 %v1239_v35  ;;  %v1235_v58 = vld [vmem:[#allocation7 + $0xb0] sm:$0xff]  ;;  %v1229_v35 = vld [vmem:[#allocation7 + $0x80] sm:$0xff] }
  0xbc   : > { %2744 = vmatprep.subr.mxu1 %v1238_v40  ;;  %1295 = vmatprep.subr.mxu0 %v1238_v40  ;;  %v1228_v40 = vld [vmem:[#allocation7 + $0x78] sm:$0xff] }
  0xbd   : > { %2776 = vmatpush1.msra.mxu1 %v1237_v52  ;;  %1296 = vmatpush1.msra.mxu0 %v1237_v52  ;;  %v1227_v52 = vld [vmem:[#allocation7 + $0x70] sm:$0xff] }
  0xbe   : > { %2745 = vmatprep.subr.mxu1 %v1236_v46  ;;  %1297 = vmatprep.subr.mxu0 %v1236_v46  ;;  %v1226_v46 = vld [vmem:[#allocation7 + $0x68] sm:$0xff] }
  0xbf   : > { %2777 = vmatpush1.msra.mxu1 %v1235_v58  ;;  %1298 = vmatpush1.msra.mxu0 %v1235_v58  ;;  %v1225_v58 = vld [vmem:[#allocation7 + $0x60] sm:$0xff] }
  0xc0   : > { %2746 = vmatprep.subr.mxu1 %v1234_v59  ;;  %1299 = vmatprep.subr.mxu0 %v1234_v59  ;;  %v1224_v59 = vld [vmem:[#allocation7 + $0x58] sm:$0xff] }
  0xc1   : > { %2778 = vmatpush1.msra.mxu1 %v1233_v23  ;;  %1300 = vmatpush1.msra.mxu0 %v1233_v23  ;;  %v1223_v23 = vld [vmem:[#allocation7 + $0x50] sm:$0xff] }
  0xc2   : > { %2747 = vmatprep.subr.mxu1 %v1232_v22  ;;  %1301 = vmatprep.subr.mxu0 %v1232_v22  ;;  %v1222_v22 = vld [vmem:[#allocation7 + $0x48] sm:$0xff] }
  0xc3   : > { %2779 = vmatpush1.msra.mxu1 %v1231_v7  ;;  %1302 = vmatpush1.msra.mxu0 %v1231_v7  ;;  %v1221_v7 = vld [vmem:[#allocation7 + $0x40] sm:$0xff] }
  0xc4   : > { %2748 = vmatprep.subr.mxu1 %v1230_v3  ;;  %1303 = vmatprep.subr.mxu0 %v1230_v3  ;;  %v1220_v3 = vld [vmem:[#allocation7 + $0x38] sm:$0xff] }
  0xc5   : > { %2780 = vmatpush1.msra.mxu1 %v1229_v35  ;;  %1304 = vmatpush1.msra.mxu0 %v1229_v35  ;;  %v1219_v35 = vld [vmem:[#allocation7 + $0x30] sm:$0xff] }
  0xc6   : > { %2749 = vmatprep.subr.mxu1 %v1228_v40  ;;  %1305 = vmatprep.subr.mxu0 %v1228_v40  ;;  %v1218_v40 = vld [vmem:[#allocation7 + $0x28] sm:$0xff] }
  0xc7   : > { %2781 = vmatpush1.msra.mxu1 %v1227_v52  ;;  %1306 = vmatpush1.msra.mxu0 %v1227_v52  ;;  %v1217_v52 = vld [vmem:[#allocation7 + $0x20] sm:$0xff] }
  0xc8   : > { %2750 = vmatprep.subr.mxu1 %v1226_v46  ;;  %1307 = vmatprep.subr.mxu0 %v1226_v46  ;;  %v1216_v46 = vld [vmem:[#allocation7 + $0x18] sm:$0xff] }
  0xc9   : > { %2782 = vmatpush1.msra.mxu1 %v1225_v58  ;;  %1308 = vmatpush1.msra.mxu0 %v1225_v58  ;;  %v1215_v58 = vld [vmem:[#allocation7 + $0x10] sm:$0xff] }
  0xca   : > { %2751 = vmatprep.subr.mxu1 %v1224_v59  ;;  %1309 = vmatprep.subr.mxu0 %v1224_v59  ;;  %v1214_v59 = vld [vmem:[#allocation7 + $0x8] sm:$0xff] }
  0xcb   : > { %2783 = vmatpush1.msra.mxu1 %v1223_v23  ;;  %1310 = vmatpush1.msra.mxu0 %v1223_v23  ;;  %v1213_v23 = vld [vmem:[#allocation7] sm:$0xff] }
  0xcc   : > { %2752 = vmatprep.subr.mxu1 %v1222_v22  ;;  %1311 = vmatprep.subr.mxu0 %v1222_v22  ;;  %v1276_v22 = vld [vmem:[#allocation7 + $0x1f8] sm:$0xff] }
  0xcd   : > { %2784 = vmatpush1.msra.mxu1 %v1221_v7  ;;  %1312 = vmatpush1.msra.mxu0 %v1221_v7  ;;  %v1275_v7 = vld [vmem:[#allocation7 + $0x1f0] sm:$0xff] }
  0xce   : > { %2753 = vmatprep.subr.mxu1 %v1220_v3  ;;  %1313 = vmatprep.subr.mxu0 %v1220_v3  ;;  %v1274_v3 = vld [vmem:[#allocation7 + $0x1e8] sm:$0xff] }
  0xcf   : > { %2785 = vmatpush1.msra.mxu1 %v1219_v35  ;;  %1314 = vmatpush1.msra.mxu0 %v1219_v35  ;;  %v1273_v35 = vld [vmem:[#allocation7 + $0x1e0] sm:$0xff] }
  0xd0   : > { %2754 = vmatprep.subr.mxu1 %v1218_v40  ;;  %1315 = vmatprep.subr.mxu0 %v1218_v40  ;;  %v1272_v40 = vld [vmem:[#allocation7 + $0x1d8] sm:$0xff] }
  0xd1   : > { %2786 = vmatpush1.msra.mxu1 %v1217_v52  ;;  %1316 = vmatpush1.msra.mxu0 %v1217_v52  ;;  %v1271_v52 = vld [vmem:[#allocation7 + $0x1d0] sm:$0xff] }
  0xd2   : > { %2755 = vmatprep.subr.mxu1 %v1216_v46  ;;  %1317 = vmatprep.subr.mxu0 %v1216_v46  ;;  %v1270_v46 = vld [vmem:[#allocation7 + $0x1c8] sm:$0xff] }
  0xd3   : > { %2787 = vmatpush1.msra.mxu1 %v1215_v58  ;;  %1318 = vmatpush1.msra.mxu0 %v1215_v58 }
  0xd4   : > { %2756 = vmatprep.subr.mxu1 %v1214_v59  ;;  %1319 = vmatprep.subr.mxu0 %v1214_v59 }
  0xd5   : > { %2788 = vmatpush1.msra.mxu1 %v1213_v23  ;;  %1320 = vmatpush1.msra.mxu0 %v1213_v23 }
  0xd6   : > { %2757 = vmatprep.subr.mxu1 %v1276_v22  ;;  %1321 = vmatprep.subr.mxu0 %v1276_v22 }
  0xd7   : > { %2789 = vmatpush2.msra.mxu1 %v1275_v7  ;;  %1322 = vmatpush2.msra.mxu0 %v1275_v7 }
  0xd8   : > { %2758 = vmatprep.subr.mxu1 %v1274_v3  ;;  %1323 = vmatprep.subr.mxu0 %v1274_v3 }
  0xd9   : > { %2790 = vmatpush2.msra.mxu1 %v1273_v35  ;;  %1324 = vmatpush2.msra.mxu0 %v1273_v35 }
  0xda   : > { %2759 = vmatprep.subr.mxu1 %v1272_v40  ;;  %1325 = vmatprep.subr.mxu0 %v1272_v40 }
  0xdb   : > { %2791 = vmatpush2.msra.mxu1 %v1271_v52  ;;  %1326 = vmatpush2.msra.mxu0 %v1271_v52 }
  0xdc   : > { %2760 = vmatprep.subr.mxu1 %v1270_v46  ;;  %1327 = vmatprep.subr.mxu0 %v1270_v46 }
 0x107   : > { %v600_v58 = vpop.xlane.xlu0 %599 }
 0x108   : > { %v663_v59 = vmul.f32 0.00390625, %v600_v58  ;;  %v603_v23 = vpop.xlane.xlu1 %602 }
 0x109   : > { %v664_v22 = vmul.f32 0.00390625, %v603_v23 }
 0x10a   : > { %v3739_v53 = vsub.f32 %v3483_v0, %v663_v59  ;;  %v3742_v7 = vsub.f32 %v3486_v1, %v663_v59 }
 0x10b   : > { %v3745_v3 = vsub.f32 %v3489_v2, %v664_v22  ;;  %v3748_v35 = vsub.f32 %v3494_v4, %v664_v22  ;;  %v552_v40 = vpop.xlane.xlu0 %551 }
 0x10c   : > { %5276 = vst [vmem:[#allocation33_spill] sm:$0xff] %v3739_v53  ;;  %5277 = vst [vmem:[#allocation34_spill] sm:$0xff] %v3742_v7  ;;  %v647_v52 = vmul.f32 0.00390625, %v552_v40  ;;  %v555_v47 = vpop.xlane.xlu1 %554  ;;  %v775_v46 = vmul.f32 %v3739_v53, %v3739_v53  ;;  %v776_v58 = vmul.f32 %v3742_v7, %v3742_v7 }
 0x10d   : > { %5278 = vst [vmem:[#allocation35_spill] sm:$0xff] %v3745_v3  ;;  %5279 = vst [vmem:[#allocation36_spill] sm:$0xff] %v3748_v35  ;;  %v648_v0 = vmul.f32 0.00390625, %v555_v47  ;;  %v777_v1 = vmul.f32 %v3745_v3, %v3745_v3  ;;  %v778_v2 = vmul.f32 %v3748_v35, %v3748_v35 }
 0x10e   : > { %v3759_v59 = vsub.f32 %v3497_v5, %v647_v52  ;;  %v3762_v4 = vsub.f32 %v3500_v6, %v647_v52  ;;  %v855_v23 = vadd.f32 %v776_v58, %v775_v46 }
 0x10f   : > { %v3765_v22 = vsub.f32 %v3505_v8, %v648_v0  ;;  %v3768_v40 = vsub.f32 %v3508_v9, %v648_v0  ;;  %v606_v47 = vpop.xlane.xlu0 %605  ;;  %v858_v7 = vadd.f32 %v778_v2, %v777_v1 }
 0x110   : > { %v665_v53 = vmul.f32 0.00390625, %v606_v47  ;;  %856 = vadd.xlane.f32.xlu0 %v855_v23  ;;  %v558_v3 = vpop.xlane.xlu1 %557  ;;  %v743_v35 = vmul.f32 %v3759_v59, %v3759_v59  ;;  %v744_v5 = vmul.f32 %v3762_v4, %v3762_v4 }
 0x111   : > { %v649_v6 = vmul.f32 0.00390625, %v558_v3  ;;  %v745_v52 = vmul.f32 %v3765_v22, %v3765_v22  ;;  %v746_v8 = vmul.f32 %v3768_v40, %v3768_v40 }
 0x112   : > { %v3779_v9 = vsub.f32 %v3515_v12, %v665_v53  ;;  %v3782_v46 = vsub.f32 %v3518_v13, %v665_v53  ;;  %v807_v58 = vadd.f32 %v744_v5, %v743_v35 }
 0x113   : > { %v3785_v0 = vsub.f32 %v3521_v14, %v649_v6  ;;  %v3788_v1 = vsub.f32 %v3524_v15, %v649_v6  ;;  %v609_v3 = vpop.xlane.xlu0 %608  ;;  %v810_v47 = vadd.f32 %v746_v8, %v745_v52 }
 0x114   : > { %v666_v2 = vmul.f32 0.00390625, %v609_v3  ;;  %859 = vadd.xlane.f32.xlu0 %v858_v7  ;;  %808 = vadd.xlane.f32.xlu1 %v807_v58  ;;  %v561_v23 = vpop.xlane.xlu1 %560  ;;  %v779_v12 = vmul.f32 %v3779_v9, %v3779_v9  ;;  %v780_v13 = vmul.f32 %v3782_v46, %v3782_v46 }
 0x115   : > { %v650_v53 = vmul.f32 0.00390625, %v561_v23  ;;  %v747_v14 = vmul.f32 %v3785_v0, %v3785_v0  ;;  %v748_v15 = vmul.f32 %v3788_v1, %v3788_v1 }
 0x116   : > { %v3799_v35 = vsub.f32 %v3531_v18, %v666_v2  ;;  %v3802_v7 = vsub.f32 %v3534_v19, %v666_v2  ;;  %v861_v5 = vadd.f32 %v780_v13, %v779_v12  ;;  %v1269_v12 = vld [vmem:[#allocation7 + $0x1c0] sm:$0xff] }
 0x117   : > { %v3805_v6 = vsub.f32 %v3537_v20, %v650_v53  ;;  %v3808_v52 = vsub.f32 %v3540_v21, %v650_v53  ;;  %v612_v8 = vpop.xlane.xlu0 %611  ;;  %v813_v23 = vadd.f32 %v748_v15, %v747_v14  ;;  %2792 = vmatpush2.msra.mxu1 %v1269_v12  ;;  %v1268_v14 = vld [vmem:[#allocation7 + $0x1b8] sm:$0xff]  ;;  %1328 = vmatpush2.msra.mxu0 %v1269_v12  ;;  %v1265_v12 = vld [vmem:[#allocation7 + $0x1a0] sm:$0xff] }
 0x118   : > { %v667_v58 = vmul.f32 0.00390625, %v612_v8  ;;  %811 = vadd.xlane.f32.xlu1 %v810_v47  ;;  %862 = vadd.xlane.f32.xlu0 %v861_v5  ;;  %v564_v3 = vpop.xlane.xlu1 %563  ;;  %v781_v18 = vmul.f32 %v3799_v35, %v3799_v35  ;;  %v782_v19 = vmul.f32 %v3802_v7, %v3802_v7 }
 0x119   : > { %5280 = vst [vmem:[#allocation37_spill] sm:$0xff] %v3805_v6  ;;  %v651_v2 = vmul.f32 0.00390625, %v564_v3  ;;  %v749_v20 = vmul.f32 %v3805_v6, %v3805_v6  ;;  %v750_v21 = vmul.f32 %v3808_v52, %v3808_v52  ;;  %2761 = vmatprep.subr.mxu1 %v1268_v14  ;;  %v1267_v3 = vld [vmem:[#allocation7 + $0x1b0] sm:$0xff]  ;;  %1329 = vmatprep.subr.mxu0 %v1268_v14 }
 0x11a   : > { %v3819_v13 = vsub.f32 %v3547_v24, %v667_v58  ;;  %v3822_v47 = vsub.f32 %v3550_v25, %v667_v58  ;;  %v864_v53 = vadd.f32 %v782_v19, %v781_v18  ;;  %2793 = vmatpush2.msra.mxu1 %v1267_v3  ;;  %1330 = vmatpush2.msra.mxu0 %v1267_v3 }
 0x11b   : > { %v3825_v15 = vsub.f32 %v3553_v26, %v651_v2  ;;  %v3828_v5 = vsub.f32 %v3556_v27, %v651_v2  ;;  %v615_v8 = vpop.xlane.xlu0 %614  ;;  %v816_v25 = vadd.f32 %v750_v21, %v749_v20  ;;  %v1266_v26 = vld [vmem:[#allocation7 + $0x1a8] sm:$0xff] }
 0x11c   : > { %v668_v6 = vmul.f32 0.00390625, %v615_v8  ;;  %814 = vadd.xlane.f32.xlu1 %v813_v23  ;;  %865 = vadd.xlane.f32.xlu0 %v864_v53  ;;  %v567_v24 = vpop.xlane.xlu1 %566  ;;  %v783_v58 = vmul.f32 %v3819_v13, %v3819_v13  ;;  %v784_v18 = vmul.f32 %v3822_v47, %v3822_v47 }
 0x11d   : > { %v652_v19 = vmul.f32 0.00390625, %v567_v24  ;;  %v751_v27 = vmul.f32 %v3825_v15, %v3825_v15  ;;  %v752_v2 = vmul.f32 %v3828_v5, %v3828_v5  ;;  %2762 = vmatprep.subr.mxu1 %v1266_v26  ;;  %1331 = vmatprep.subr.mxu0 %v1266_v26  ;;  %v1264_v24 = vld [vmem:[#allocation7 + $0x198] sm:$0xff] }
 0x11e   : > { %v3839_v23 = vsub.f32 %v3563_v30, %v668_v6  ;;  %v3842_v20 = vsub.f32 %v3566_v31, %v668_v6  ;;  %v867_v21 = vadd.f32 %v784_v18, %v783_v58  ;;  %2794 = vmatpush2.msra.mxu1 %v1265_v12  ;;  %1332 = vmatpush2.msra.mxu0 %v1265_v12 }
 0x11f   : > { %v3845_v53 = vsub.f32 %v3569_v32, %v652_v19  ;;  %v3848_v14 = vsub.f32 %v3572_v33, %v652_v19  ;;  %v618_v8 = vpop.xlane.xlu0 %617  ;;  %v819_v31 = vadd.f32 %v752_v2, %v751_v27  ;;  %v1263_v32 = vld [vmem:[#allocation7 + $0x190] sm:$0xff]  ;;  %2763 = vmatprep.subr.mxu1 %v1264_v24  ;;  %v1262_v19 = vld [vmem:[#allocation7 + $0x188] sm:$0xff]  ;;  %1333 = vmatprep.subr.mxu0 %v1264_v24 }
 0x120   : > { %v669_v3 = vmul.f32 0.00390625, %v618_v8  ;;  %817 = vadd.xlane.f32.xlu1 %v816_v25  ;;  %868 = vadd.xlane.f32.xlu0 %v867_v21  ;;  %v570_v30 = vpop.xlane.xlu1 %569  ;;  %v785_v6 = vmul.f32 %v3839_v23, %v3839_v23  ;;  %v786_v58 = vmul.f32 %v3842_v20, %v3842_v20  ;;  %v1261_v21 = vld [vmem:[#allocation7 + $0x180] sm:$0xff] }
 0x121   : > { %5281 = vst [vmem:[#allocation38_spill] sm:$0xff] %v3845_v53  ;;  %v653_v18 = vmul.f32 0.00390625, %v570_v30  ;;  %v753_v33 = vmul.f32 %v3845_v53, %v3845_v53  ;;  %v754_v26 = vmul.f32 %v3848_v14, %v3848_v14  ;;  %2795 = vmatpush2.msra.mxu1 %v1263_v32  ;;  %1334 = vmatpush2.msra.mxu0 %v1263_v32  ;;  %v1260_v53 = vld [vmem:[#allocation7 + $0x178] sm:$0xff] }
 0x122   : > { %v3859_v25 = vsub.f32 %v3579_v36, %v669_v3  ;;  %v3862_v27 = vsub.f32 %v3582_v37, %v669_v3  ;;  %v870_v2 = vadd.f32 %v786_v58, %v785_v6  ;;  %2764 = vmatprep.subr.mxu1 %v1262_v19  ;;  %1335 = vmatprep.subr.mxu0 %v1262_v19 }
 0x123   : > { %v3865_v12 = vsub.f32 %v3585_v38, %v653_v18  ;;  %v3868_v8 = vsub.f32 %v3588_v39, %v653_v18  ;;  %v621_v30 = vpop.xlane.xlu0 %620  ;;  %v822_v37 = vadd.f32 %v754_v26, %v753_v33  ;;  %v1259_v38 = vld [vmem:[#allocation7 + $0x170] sm:$0xff]  ;;  %2796 = vmatpush2.msra.mxu1 %v1261_v21  ;;  %1336 = vmatpush2.msra.mxu0 %v1261_v21  ;;  %v1258_v26 = vld [vmem:[#allocation7 + $0x168] sm:$0xff] }
 0x124   : > { %v670_v24 = vmul.f32 0.00390625, %v621_v30  ;;  %820 = vadd.xlane.f32.xlu1 %v819_v31  ;;  %871 = vadd.xlane.f32.xlu0 %v870_v2  ;;  %v573_v36 = vpop.xlane.xlu1 %572  ;;  %v787_v3 = vmul.f32 %v3859_v25, %v3859_v25  ;;  %v788_v6 = vmul.f32 %v3862_v27, %v3862_v27 }
 0x125   : > { %v654_v58 = vmul.f32 0.00390625, %v573_v36  ;;  %v755_v39 = vmul.f32 %v3865_v12, %v3865_v12  ;;  %v756_v32 = vmul.f32 %v3868_v8, %v3868_v8  ;;  %2765 = vmatprep.subr.mxu1 %v1260_v53  ;;  %1337 = vmatprep.subr.mxu0 %v1260_v53  ;;  %v1257_v36 = vld [vmem:[#allocation7 + $0x160] sm:$0xff] }
 0x126   : > { %v3879_v31 = vsub.f32 %v3595_v42, %v670_v24  ;;  %v3882_v18 = vsub.f32 %v3598_v43, %v670_v24  ;;  %v873_v33 = vadd.f32 %v788_v6, %v787_v3  ;;  %2797 = vmatpush2.msra.mxu1 %v1259_v38  ;;  %1338 = vmatpush2.msra.mxu0 %v1259_v38 }
 0x127   : > { %v3885_v19 = vsub.f32 %v3601_v44, %v654_v58  ;;  %v3888_v2 = vsub.f32 %v3604_v45, %v654_v58  ;;  %v624_v30 = vpop.xlane.xlu0 %623  ;;  %v825_v43 = vadd.f32 %v756_v32, %v755_v39  ;;  %v1256_v44 = vld [vmem:[#allocation7 + $0x158] sm:$0xff]  ;;  %2766 = vmatprep.subr.mxu1 %v1258_v26  ;;  %1339 = vmatprep.subr.mxu0 %v1258_v26  ;;  %v1255_v39 = vld [vmem:[#allocation7 + $0x150] sm:$0xff] }
 0x128   : > { %v671_v21 = vmul.f32 0.00390625, %v624_v30  ;;  %823 = vadd.xlane.f32.xlu1 %v822_v37  ;;  %874 = vadd.xlane.f32.xlu0 %v873_v33  ;;  %v576_v42 = vpop.xlane.xlu1 %575  ;;  %v789_v24 = vmul.f32 %v3879_v31, %v3879_v31  ;;  %v790_v53 = vmul.f32 %v3882_v18, %v3882_v18 }
 0x129   : > { %v655_v3 = vmul.f32 0.00390625, %v576_v42  ;;  %v757_v45 = vmul.f32 %v3885_v19, %v3885_v19  ;;  %v758_v6 = vmul.f32 %v3888_v2, %v3888_v2  ;;  %2798 = vmatpush2.msra.mxu1 %v1257_v36  ;;  %1340 = vmatpush2.msra.mxu0 %v1257_v36  ;;  %v1254_v42 = vld [vmem:[#allocation7 + $0x148] sm:$0xff] }
 0x12a   : > { %v3899_v37 = vsub.f32 %v3611_v48, %v671_v21  ;;  %v3902_v38 = vsub.f32 %v3614_v49, %v671_v21  ;;  %v876_v58 = vadd.f32 %v790_v53, %v789_v24  ;;  %2767 = vmatprep.subr.mxu1 %v1256_v44  ;;  %1341 = vmatprep.subr.mxu0 %v1256_v44 }
 0x12b   : > { %v3905_v32 = vsub.f32 %v3617_v50, %v655_v3  ;;  %v3908_v33 = vsub.f32 %v3620_v51, %v655_v3  ;;  %v627_v30 = vpop.xlane.xlu0 %626  ;;  %v828_v49 = vadd.f32 %v758_v6, %v757_v45  ;;  %v1253_v50 = vld [vmem:[#allocation7 + $0x140] sm:$0xff]  ;;  %2799 = vmatpush2.msra.mxu1 %v1255_v39  ;;  %1342 = vmatpush2.msra.mxu0 %v1255_v39  ;;  %v1252_v45 = vld [vmem:[#allocation7 + $0x138] sm:$0xff] }
 0x12c   : > { %v672_v26 = vmul.f32 0.00390625, %v627_v30  ;;  %826 = vadd.xlane.f32.xlu1 %v825_v43  ;;  %877 = vadd.xlane.f32.xlu0 %v876_v58  ;;  %v579_v48 = vpop.xlane.xlu1 %578  ;;  %v791_v21 = vmul.f32 %v3899_v37, %v3899_v37  ;;  %v792_v36 = vmul.f32 %v3902_v38, %v3902_v38 }
 0x12d   : > { %v656_v24 = vmul.f32 0.00390625, %v579_v48  ;;  %v759_v51 = vmul.f32 %v3905_v32, %v3905_v32  ;;  %v760_v53 = vmul.f32 %v3908_v33, %v3908_v33  ;;  %2768 = vmatprep.subr.mxu1 %v1254_v42  ;;  %1343 = vmatprep.subr.mxu0 %v1254_v42  ;;  %v1251_v48 = vld [vmem:[#allocation7 + $0x130] sm:$0xff] }
 0x12e   : > { %v3919_v43 = vsub.f32 %v3627_v54, %v672_v26  ;;  %v3922_v44 = vsub.f32 %v3630_v55, %v672_v26  ;;  %v879_v3 = vadd.f32 %v792_v36, %v791_v21  ;;  %2800 = vmatpush2.msra.mxu1 %v1253_v50  ;;  %1344 = vmatpush2.msra.mxu0 %v1253_v50 }
 0x12f   : > { %v3925_v6 = vsub.f32 %v3633_v56, %v656_v24  ;;  %v3928_v58 = vsub.f32 %v3636_v57, %v656_v24  ;;  %v630_v30 = vpop.xlane.xlu0 %629  ;;  %v831_v55 = vadd.f32 %v760_v53, %v759_v51  ;;  %v1250_v56 = vld [vmem:[#allocation7 + $0x128] sm:$0xff]  ;;  %2769 = vmatprep.subr.mxu1 %v1252_v45  ;;  %1345 = vmatprep.subr.mxu0 %v1252_v45  ;;  %v1249_v51 = vld [vmem:[#allocation7 + $0x120] sm:$0xff] }
 0x130   : > { %v673_v39 = vmul.f32 0.00390625, %v630_v30  ;;  %829 = vadd.xlane.f32.xlu1 %v828_v49  ;;  %880 = vadd.xlane.f32.xlu0 %v879_v3  ;;  %v582_v54 = vpop.xlane.xlu1 %581  ;;  %v793_v26 = vmul.f32 %v3919_v43, %v3919_v43  ;;  %v794_v42 = vmul.f32 %v3922_v44, %v3922_v44 }
 0x131   : > { %v657_v21 = vmul.f32 0.00390625, %v582_v54  ;;  %v761_v57 = vmul.f32 %v3925_v6, %v3925_v6  ;;  %v762_v36 = vmul.f32 %v3928_v58, %v3928_v58  ;;  %2801 = vmatpush2.msra.mxu1 %v1251_v48  ;;  %1346 = vmatpush2.msra.mxu0 %v1251_v48  ;;  %v1248_v54 = vld [vmem:[#allocation7 + $0x118] sm:$0xff] }
 0x132   : > { %v3939_v49 = vsub.f32 %v3643_v60, %v673_v39  ;;  %v3942_v50 = vsub.f32 %v3646_v61, %v673_v39  ;;  %v882_v24 = vadd.f32 %v794_v42, %v793_v26  ;;  %2770 = vmatprep.subr.mxu1 %v1250_v56  ;;  %1347 = vmatprep.subr.mxu0 %v1250_v56 }
 0x133   : > { %v3945_v53 = vsub.f32 %v3649_v62, %v657_v21  ;;  %v3948_v3 = vsub.f32 %v3652_v63, %v657_v21  ;;  %v633_v30 = vpop.xlane.xlu0 %632  ;;  %v834_v61 = vadd.f32 %v762_v36, %v761_v57  ;;  %v1247_v62 = vld [vmem:[#allocation7 + $0x110] sm:$0xff]  ;;  %2802 = vmatpush2.msra.mxu1 %v1249_v51  ;;  %1348 = vmatpush2.msra.mxu0 %v1249_v51  ;;  %v1246_v57 = vld [vmem:[#allocation7 + $0x108] sm:$0xff] }
 0x134   : > { %v674_v45 = vmul.f32 0.00390625, %v633_v30  ;;  %832 = vadd.xlane.f32.xlu1 %v831_v55  ;;  %883 = vadd.xlane.f32.xlu0 %v882_v24  ;;  %v585_v60 = vpop.xlane.xlu1 %584  ;;  %v795_v39 = vmul.f32 %v3939_v49, %v3939_v49  ;;  %v796_v48 = vmul.f32 %v3942_v50, %v3942_v50 }
 0x135   : > { %v658_v26 = vmul.f32 0.00390625, %v585_v60  ;;  %v763_v63 = vmul.f32 %v3945_v53, %v3945_v53  ;;  %v764_v42 = vmul.f32 %v3948_v3, %v3948_v3  ;;  %2771 = vmatprep.subr.mxu1 %v1248_v54  ;;  %1349 = vmatprep.subr.mxu0 %v1248_v54  ;;  %v1245_v60 = vld [vmem:[#allocation7 + $0x100] sm:$0xff] }
 0x136   : > { %v3959_v55 = vsub.f32 %v3659_v10, %v674_v45  ;;  %v3962_v56 = vsub.f32 %v3662_v11, %v674_v45  ;;  %v885_v21 = vadd.f32 %v796_v48, %v795_v39  ;;  %2803 = vmatpush2.msra.mxu1 %v1247_v62  ;;  %1350 = vmatpush2.msra.mxu0 %v1247_v62  ;;  %v1974_v39 = vld [vmem:[#allocation10 + $0xf8] sm:$0xff] }
 0x137   : > { %v3965_v36 = vsub.f32 %v3665_v16, %v658_v26  ;;  %v3968_v24 = vsub.f32 %v3668_v17, %v658_v26  ;;  %v636_v30 = vpop.xlane.xlu0 %635  ;;  %v837_v11 = vadd.f32 %v764_v42, %v763_v63  ;;  %v1641_v16 = vld [vmem:[#allocation8 + $0xf8] sm:$0xff]  ;;  %2772 = vmatprep.subr.mxu1 %v1246_v57  ;;  %1351 = vmatprep.subr.mxu0 %v1246_v57 }
 0x138   : > { %5282 = vst [vmem:[#allocation39_spill] sm:$0xff] %v3959_v55  ;;  %v675_v51 = vmul.f32 0.00390625, %v636_v30  ;;  %835 = vadd.xlane.f32.xlu1 %v834_v61  ;;  %886 = vadd.xlane.f32.xlu0 %v885_v21  ;;  %v588_v10 = vpop.xlane.xlu1 %587  ;;  %v797_v45 = vmul.f32 %v3959_v55, %v3959_v55  ;;  %v798_v54 = vmul.f32 %v3962_v56, %v3962_v56  ;;  %v5288_v21 = vld [vmem:[#allocation21_spill] sm:$0xff] }
 0x139   : > { %5283 = vst [vmem:[#allocation40_spill] sm:$0xff] %v3965_v36  ;;  %5284 = vst [vmem:[#allocation41_spill] sm:$0xff] %v3968_v24  ;;  %v659_v48 = vmul.f32 0.00390625, %v588_v10  ;;  %v765_v17 = vmul.f32 %v3965_v36, %v3965_v36  ;;  %v766_v62 = vmul.f32 %v3968_v24, %v3968_v24  ;;  %2804 = vmatpush2.msra.mxu1 %v1245_v60  ;;  %1352 = vmatpush2.msra.mxu0 %v1245_v60  ;;  %v1638_v55 = vld [vmem:[#allocation8 + $0xe0] sm:$0xff] }
 0x13a   : > { %v3979_v61 = vsub.f32 %v3675_v28, %v675_v51  ;;  %v3982_v26 = vsub.f32 %v3678_v29, %v675_v51  ;;  %v888_v63 = vadd.f32 %v798_v54, %v797_v45  ;;  %1686 = vmatprep.subr.mxu1 %v1641_v16  ;;  %2019 = vmatprep.subr.mxu0 %v1974_v39  ;;  %v5290_v54 = vld [vmem:[#allocation22_spill] sm:$0xff] }
 0x13b   : > { %v3985_v42 = vsub.f32 %v3681_v34, %v659_v48  ;;  %v3988_v30 = vsub.f32 %v5288_v21, %v659_v48  ;;  %v639_v10 = vpop.xlane.xlu0 %638  ;;  %v840_v57 = vadd.f32 %v766_v62, %v765_v17  ;;  %v5294_v17 = vld [vmem:[#allocation24_spill] sm:$0xff] }
 0x13c   : > { %5285 = vst [vmem:[#allocation42_spill] sm:$0xff] %v3979_v61  ;;  %5286 = vst [vmem:[#allocation43_spill] sm:$0xff] %v3982_v26  ;;  %v676_v36 = vmul.f32 0.00390625, %v639_v10  ;;  %838 = vadd.xlane.f32.xlu1 %v837_v11  ;;  %889 = vadd.xlane.f32.xlu0 %v888_v63  ;;  %v591_v28 = vpop.xlane.xlu1 %590  ;;  %v799_v29 = vmul.f32 %v3979_v61, %v3979_v61  ;;  %v800_v60 = vmul.f32 %v3982_v26, %v3982_v26  ;;  %v5292_v11 = vld [vmem:[#allocation23_spill] sm:$0xff]  ;;  %v5296_v63 = vld [vmem:[#allocation25_spill] sm:$0xff] }
 0x13d   : > { %5287 = vst [vmem:[#allocation44_spill] sm:$0xff] %v3985_v42  ;;  %5289 = vst [vmem:[#allocation21_spill] sm:$0xff] %v3988_v30  ;;  %v660_v51 = vmul.f32 0.00390625, %v591_v28  ;;  %v767_v34 = vmul.f32 %v3985_v42, %v3985_v42  ;;  %v768_v45 = vmul.f32 %v3988_v30, %v3988_v30 }
 0x13e   : > { %v3999_v16 = vsub.f32 %v5290_v54, %v676_v36  ;;  %v4002_v39 = vsub.f32 %v5292_v11, %v676_v36  ;;  %v891_v48 = vadd.f32 %v800_v60, %v799_v29 }
 0x13f   : > { %v4005_v62 = vsub.f32 %v5294_v17, %v660_v51  ;;  %v4008_v21 = vsub.f32 %v5296_v63, %v660_v51  ;;  %v642_v10 = vpop.xlane.xlu0 %641  ;;  %v843_v61 = vadd.f32 %v768_v45, %v767_v34  ;;  %v5298_v51 = vld [vmem:[#allocation26_spill] sm:$0xff]  ;;  %v5302_v45 = vld [vmem:[#allocation28_spill] sm:$0xff] }
 0x140   : > { %5291 = vst [vmem:[#allocation22_spill] sm:$0xff] %v3999_v16  ;;  %5293 = vst [vmem:[#allocation23_spill] sm:$0xff] %v4002_v39  ;;  %v677_v28 = vmul.f32 0.00390625, %v642_v10  ;;  %841 = vadd.xlane.f32.xlu1 %v840_v57  ;;  %892 = vadd.xlane.f32.xlu0 %v891_v48  ;;  %v594_v42 = vpop.xlane.xlu1 %593  ;;  %v801_v54 = vmul.f32 %v3999_v16, %v3999_v16  ;;  %v802_v36 = vmul.f32 %v4002_v39, %v4002_v39  ;;  %v5300_v57 = vld [vmem:[#allocation27_spill] sm:$0xff]  ;;  %v5304_v10 = vld [vmem:[#allocation29_spill] sm:$0xff] }
 0x141   : > { %5295 = vst [vmem:[#allocation24_spill] sm:$0xff] %v4005_v62  ;;  %5297 = vst [vmem:[#allocation25_spill] sm:$0xff] %v4008_v21  ;;  %v661_v11 = vmul.f32 0.00390625, %v594_v42  ;;  %v769_v29 = vmul.f32 %v4005_v62, %v4005_v62  ;;  %v770_v60 = vmul.f32 %v4008_v21, %v4008_v21 }
 0x142   : > { %v4019_v17 = vsub.f32 %v5298_v51, %v677_v28  ;;  %v4022_v48 = vsub.f32 %v5300_v57, %v677_v28  ;;  %v894_v34 = vadd.f32 %v802_v36, %v801_v54 }
 0x143   : > { %v4025_v63 = vsub.f32 %v5302_v45, %v661_v11  ;;  %v4028_v16 = vsub.f32 %v5304_v10, %v661_v11  ;;  %v645_v42 = vpop.xlane.xlu0 %644  ;;  %v846_v30 = vadd.f32 %v770_v60, %v769_v29  ;;  %v5309_v60 = vld [vmem:[#allocation31_spill] sm:$0xff]  ;;  %v5311_v10 = vld [vmem:[#allocation32_spill] sm:$0xff] }
 0x144   : > { %5299 = vst [vmem:[#allocation26_spill] sm:$0xff] %v4019_v17  ;;  %5301 = vst [vmem:[#allocation27_spill] sm:$0xff] %v4022_v48  ;;  %v678_v39 = vmul.f32 0.00390625, %v645_v42  ;;  %844 = vadd.xlane.f32.xlu1 %v843_v61  ;;  %895 = vadd.xlane.f32.xlu0 %v894_v34  ;;  %v597_v62 = vpop.xlane.xlu1 %596  ;;  %v803_v51 = vmul.f32 %v4019_v17, %v4019_v17  ;;  %v804_v28 = vmul.f32 %v4022_v48, %v4022_v48  ;;  %v5307_v61 = vld [vmem:[#allocation30_spill] sm:$0xff] }
 0x145   : > { %5303 = vst [vmem:[#allocation28_spill] sm:$0xff] %v4025_v63  ;;  %5305 = vst [vmem:[#allocation29_spill] sm:$0xff] %v4028_v16  ;;  %v662_v57 = vmul.f32 0.00390625, %v597_v62  ;;  %v771_v54 = vmul.f32 %v4025_v63, %v4025_v63  ;;  %v772_v36 = vmul.f32 %v4028_v16, %v4028_v16 }
 0x146   : > { %v4039_v11 = vsub.f32 %v3723_v41, %v678_v39  ;;  %v4042_v34 = vsub.f32 %v5307_v61, %v678_v39  ;;  %v897_v29 = vadd.f32 %v804_v28, %v803_v51 }
 0x147   : > { %v4045_v45 = vsub.f32 %v5309_v60, %v662_v57  ;;  %v4048_v42 = vsub.f32 %v5311_v10, %v662_v57  ;;  %v849_v62 = vadd.f32 %v772_v36, %v771_v54 }
 0x148   : > { %5306 = vst [vmem:[#allocation45_spill] sm:$0xff] %v4039_v11  ;;  %5308 = vst [vmem:[#allocation30_spill] sm:$0xff] %v4042_v34  ;;  %847 = vadd.xlane.f32.xlu1 %v846_v30  ;;  %898 = vadd.xlane.f32.xlu0 %v897_v29  ;;  %v805_v63 = vmul.f32 %v4039_v11, %v4039_v11  ;;  %v806_v41 = vmul.f32 %v4042_v34, %v4042_v34  ;;  %v1064_v11 = vlaneseq }
 0x149   : > { %5310 = vst [vmem:[#allocation31_spill] sm:$0xff] %v4045_v45  ;;  %5312 = vst [vmem:[#allocation32_spill] sm:$0xff] %v4048_v42  ;;  %v773_v39 = vmul.f32 %v4045_v45, %v4045_v45  ;;  %v774_v51 = vmul.f32 %v4048_v42, %v4048_v42 }
 0x14a   : > { %v900_v28 = vadd.f32 %v806_v41, %v805_v63 }
 0x14b   : > { %v852_v57 = vadd.f32 %v774_v51, %v773_v39 }
 0x14c   : > { %850 = vadd.xlane.f32.xlu1 %v849_v62  ;;  %901 = vadd.xlane.f32.xlu0 %v900_v28  ;;  %v1065_v62 = vshrl.u32 %v1064_v11, 7 }
 0x150   : > { %853 = vadd.xlane.f32.xlu1 %v852_v57 }
 0x199   : > { %v857_v30 = vpop.xlane.xlu0 %856 }
 0x19a   : > { %v919_v61 = vmul.f32 0.00390625, %v857_v30 }
 0x19c   : > { %v951_v54 = vadd.f32 1e-05, %v919_v61  ;;  %v4058_v61 = vsub.s32 1, %v1065_v62 }
 0x19d   : > { %v809_v36 = vpop.xlane.xlu1 %808  ;;  %v860_v29 = vpop.xlane.xlu0 %859 }
 0x19e   : > { %2906 = vrsqrt.f32 %v951_v54  ;;  %v903_v60 = vmul.f32 0.00390625, %v809_v36  ;;  %v920_v10 = vmul.f32 0.00390625, %v860_v29  ;;  %5313 = vst [vmem:[#allocation46_spill] sm:$0xff] %v4058_v61  ;;  %v548_v54 = vld [vmem:[#allocation5] sm:$0x3]  ;;  %v4060_v36 = vsub.s32 0, %v1065_v62 }
 0x1a0   : > { %v935_v34 = vadd.f32 1e-05, %v903_v60  ;;  %v952_v16 = vadd.f32 1e-05, %v920_v10  ;;  %5314 = vst [vmem:[#allocation47_spill] sm:$0xff] %v4060_v36  ;;  %v4072_v62 = vrot.slane %v548_v54, %v4060_v36 }
 0x1a1   : > { %v812_v45 = vpop.xlane.xlu1 %811  ;;  %v863_v17 = vpop.xlane.xlu0 %862 }
 0x1a2   : > { %2908 = vrsqrt.f32 %v935_v34  ;;  %v904_v42 = vmul.f32 0.00390625, %v812_v45  ;;  %v921_v63 = vmul.f32 0.00390625, %v863_v17  ;;  %v549_v17 = vld [vmem:[%s5146_s2] sm:$0x3] }
 0x1a3   : > { %2910 = vrsqrt.f32 %v952_v16 }
 0x1a4   : > { %v936_v41 = vadd.f32 1e-05, %v904_v42  ;;  %v953_v39 = vadd.f32 1e-05, %v921_v63  ;;  %v4066_v42 = vrot.slane %v548_v54, %v4058_v61  ;;  %v4069_v63 = vrot.slane %v549_v17, %v4058_v61 }
 0x1a5   : > { %v815_v51 = vpop.xlane.xlu1 %814  ;;  %v866_v28 = vpop.xlane.xlu0 %865 }
 0x1a6   : > { %2912 = vrsqrt.f32 %v936_v41  ;;  %v905_v57 = vmul.f32 0.00390625, %v815_v51  ;;  %v922_v30 = vmul.f32 0.00390625, %v866_v28  ;;  %v5315_v51 = vld [vmem:[#allocation34_spill] sm:$0xff] }
 0x1a7   : > { %2914 = vrsqrt.f32 %v953_v39 }
 0x1a8   : > { %v937_v29 = vadd.f32 1e-05, %v905_v57  ;;  %v954_v60 = vadd.f32 1e-05, %v922_v30  ;;  %v5316_v57 = vld [vmem:[#allocation33_spill] sm:$0xff] }
 0x1a9   : > { %v818_v16 = vpop.xlane.xlu1 %817  ;;  %v869_v11 = vpop.xlane.xlu0 %868 }
 0x1aa   : > { %2916 = vrsqrt.f32 %v937_v29  ;;  %v906_v34 = vmul.f32 0.00390625, %v818_v16  ;;  %v923_v45 = vmul.f32 0.00390625, %v869_v11  ;;  %v4077_v11 = vrot.slane %v549_v17, %v4060_v36  ;;  %v5320_v36 = vld [vmem:[#allocation35_spill] sm:$0xff] }
 0x1ab   : > { %v2907_v10 = vpop.eup %2906  ;;  %2918 = vrsqrt.f32 %v954_v60 }
 0x1ac   : > { %v938_v41 = vadd.f32 1e-05, %v906_v34  ;;  %v955_v39 = vadd.f32 1e-05, %v923_v45  ;;  %v1032_v28 = vmul.f32 %v2907_v10, %v5315_v51  ;;  %v1031_v30 = vmul.f32 %v2907_v10, %v5316_v57 }
 0x1ad   : > { %v821_v29 = vpop.xlane.xlu1 %820  ;;  %v872_v16 = vpop.xlane.xlu0 %871 }
 0x1ae   : > { %2920 = vrsqrt.f32 %v938_v41  ;;  %v907_v48 = vmul.f32 0.00390625, %v821_v29  ;;  %v924_v60 = vmul.f32 0.00390625, %v872_v16  ;;  %v1107_v61 = vmul.f32 %v4066_v42, %v1032_v28  ;;  %v1640_v29 = vld [vmem:[#allocation8 + $0xf0] sm:$0xff]  ;;  %v5319_v16 = vld [vmem:[#allocation36_spill] sm:$0xff] }
 0x1af   : > { %v2909_v21 = vpop.eup %2908  ;;  %2922 = vrsqrt.f32 %v955_v39  ;;  %v1106_v54 = vmul.f32 %v4072_v62, %v1031_v30 }
 0x1b0   : > { %v2911_v34 = vpop.eup %2910  ;;  %v939_v45 = vadd.f32 1e-05, %v907_v48  ;;  %v956_v26 = vadd.f32 1e-05, %v924_v60  ;;  %v4082_v51 = vadd.f32 %v4069_v63, %v1107_v61  ;;  %v1000_v10 = vmul.f32 %v2909_v21, %v3762_v4  ;;  %v1639_v61 = vld [vmem:[#allocation8 + $0xe8] sm:$0xff] }
 0x1b1   : > { %v824_v57 = vpop.xlane.xlu1 %823  ;;  %v875_v17 = vpop.xlane.xlu0 %874  ;;  %v4086_v41 = vadd.f32 %v4077_v11, %v1106_v54  ;;  %v1034_v28 = vmul.f32 %v2911_v34, %v5319_v16  ;;  %v999_v39 = vmul.f32 %v2909_v21, %v3759_v59  ;;  %v1033_v30 = vmul.f32 %v2911_v34, %v5320_v36 }
 0x1b2   : > { %5317 = vst [vmem:[#allocation34_spill] sm:$0xff] %v4082_v51  ;;  %2924 = vrsqrt.f32 %v939_v45  ;;  %v908_v48 = vmul.f32 0.00390625, %v824_v57  ;;  %v925_v60 = vmul.f32 0.00390625, %v875_v17  ;;  %1449 = vmatprep.mubr.f32.mxu1 %v4082_v51  ;;  %v1075_v4 = vmul.f32 %v4066_v42, %v1000_v10 }
 0x1b3   : > { %5318 = vst [vmem:[#allocation33_spill] sm:$0xff] %v4086_v41  ;;  %v2913_v24 = vpop.eup %2912  ;;  %2926 = vrsqrt.f32 %v956_v26  ;;  %1450 = vmatmul.mubr.f32.vlgmr.msra.gmra.mxu1 %v4086_v41  ;;  %v1109_v54 = vmul.f32 %v4066_v42, %v1034_v28  ;;  %v1074_v16 = vmul.f32 %v4072_v62, %v999_v39  ;;  %v1108_v59 = vmul.f32 %v4072_v62, %v1033_v30  ;;  %v1637_v30 = vld [vmem:[#allocation8 + $0xd8] sm:$0xff] }
 0x1b4   : > { %v2915_v21 = vpop.eup %2914  ;;  %v940_v36 = vadd.f32 1e-05, %v908_v48  ;;  %v957_v34 = vadd.f32 1e-05, %v925_v60  ;;  %1687 = vmatpush1.msra.mxu1 %v1640_v29  ;;  %v4098_v45 = vadd.f32 %v4069_v63, %v1075_v4  ;;  %v1002_v10 = vmul.f32 %v2913_v24, %v3768_v40  ;;  %v1973_v40 = vld [vmem:[#allocation10 + $0xf0] sm:$0xff] }
 0x1b5   : > { %v827_v57 = vpop.xlane.xlu1 %826  ;;  %1688 = vmatprep.subr.mxu1 %v1639_v61  ;;  %v878_v26 = vpop.xlane.xlu0 %877  ;;  %v4102_v17 = vadd.f32 %v4069_v63, %v1109_v54  ;;  %v4105_v28 = vadd.f32 %v4077_v11, %v1074_v16  ;;  %v4108_v39 = vadd.f32 %v4077_v11, %v1108_v59  ;;  %v1036_v29 = vmul.f32 %v2915_v21, %v3782_v46  ;;  %v1636_v61 = vld [vmem:[#allocation8 + $0xd0] sm:$0xff]  ;;  %v1972_v16 = vld [vmem:[#allocation10 + $0xe8] sm:$0xff] }
 0x1b6   : > { %v909_v48 = vmul.f32 0.00390625, %v827_v57  ;;  %v926_v60 = vmul.f32 0.00390625, %v878_v26  ;;  %1353 = vmatprep.mubr.f32.mxu0 %v4098_v45  ;;  %1689 = vmatpush1.msra.mxu1 %v1638_v55  ;;  %v1077_v4 = vmul.f32 %v4066_v42, %v1002_v10  ;;  %2928 = vrsqrt.f32 %v940_v36  ;;  %v1635_v59 = vld [vmem:[#allocation8 + $0xc8] sm:$0xff]  ;;  %v1971_v55 = vld [vmem:[#allocation10 + $0xe0] sm:$0xff] }
 0x1b7   : > { %5321 = vst [vmem:[#allocation36_spill] sm:$0xff] %v4102_v17  ;;  %v2917_v54 = vpop.eup %2916  ;;  %1455 = vmatprep.mubr.f32.mxu1 %v4102_v17  ;;  %1354 = vmatmul.mubr.f32.vlgmr.msra.gmra.mxu0 %v4105_v28  ;;  %v1111_v41 = vmul.f32 %v4066_v42, %v1036_v29  ;;  %v1001_v46 = vmul.f32 %v2913_v24, %v3765_v22  ;;  %2930 = vrsqrt.f32 %v957_v34 }
 0x1b8   : > { %v1035_v57 = vmul.f32 %v2915_v21, %v3779_v9  ;;  %v2919_v26 = vpop.eup %2918  ;;  %1456 = vmatmul.mubr.f32.gmra.mxu1 %v4108_v39  ;;  %1690 = vmatprep.subr.mxu1 %v1637_v30  ;;  %v4120_v36 = vadd.f32 %v4069_v63, %v1077_v4  ;;  %v1004_v10 = vmul.f32 %v2917_v54, %v3788_v1  ;;  %v941_v17 = vadd.f32 1e-05, %v909_v48  ;;  %v1634_v9 = vld [vmem:[#allocation8 + $0xc0] sm:$0xff]  ;;  %v1970_v30 = vld [vmem:[#allocation10 + $0xd8] sm:$0xff] }
 0x1b9   : > { %2020 = vmatpush1.msra.mxu0 %v1973_v40  ;;  %1691 = vmatpush1.msra.mxu1 %v1636_v61  ;;  %v830_v51 = vpop.xlane.xlu1 %829  ;;  %v881_v29 = vpop.xlane.xlu0 %880  ;;  %v4124_v22 = vadd.f32 %v4069_v63, %v1111_v41  ;;  %v1076_v24 = vmul.f32 %v4072_v62, %v1001_v46  ;;  %v958_v34 = vadd.f32 1e-05, %v926_v60  ;;  %v1633_v61 = vld [vmem:[#allocation8 + $0xb8] sm:$0xff]  ;;  %v1038_v46 = vmul.f32 %v2919_v26, %v3802_v7 }
 0x1ba   : > { %v1110_v21 = vmul.f32 %v4072_v62, %v1035_v57  ;;  %2021 = vmatprep.subr.mxu0 %v1972_v16  ;;  %1692 = vmatprep.subr.mxu1 %v1635_v59  ;;  %v1079_v4 = vmul.f32 %v4066_v42, %v1004_v10  ;;  %v910_v48 = vmul.f32 0.00390625, %v830_v51  ;;  %v927_v16 = vmul.f32 0.00390625, %v881_v29  ;;  %v1969_v59 = vld [vmem:[#allocation10 + $0xd0] sm:$0xff]  ;;  %v1968_v10 = vld [vmem:[#allocation10 + $0xc8] sm:$0xff] }
 0x1bb   : > { %5322 = vst [vmem:[#allocation35_spill] sm:$0xff] %v4124_v22  ;;  %v2921_v1 = vpop.eup %2920  ;;  %2022 = vmatpush1.msra.mxu0 %v1971_v55  ;;  %1359 = vmatprep.mubr.f32.mxu0 %v4120_v36  ;;  %v4131_v40 = vadd.f32 %v4077_v11, %v1076_v24  ;;  %v1632_v57 = vld [vmem:[#allocation8 + $0xb0] sm:$0xff]  ;;  %v1003_v55 = vmul.f32 %v2917_v54, %v3785_v0  ;;  %2932 = vrsqrt.f32 %v941_v17  ;;  %v1631_v24 = vld [vmem:[#allocation8 + $0xa8] sm:$0xff] }
 0x1bc   : > { %v4134_v41 = vadd.f32 %v4077_v11, %v1110_v21  ;;  %v2923_v60 = vpop.eup %2922  ;;  %1461 = vmatprep.mubr.f32.mxu1 %v4124_v22  ;;  %1693 = vmatpush1.msra.mxu1 %v1634_v9  ;;  %v4139_v51 = vadd.f32 %v4069_v63, %v1079_v4  ;;  %v1113_v7 = vmul.f32 %v4066_v42, %v1038_v46  ;;  %2934 = vrsqrt.f32 %v958_v34  ;;  %v1967_v9 = vld [vmem:[#allocation10 + $0xc0] sm:$0xff] }
 0x1bd   : > { %2023 = vmatprep.subr.mxu0 %v1970_v30  ;;  %1360 = vmatmul.mubr.f32.gmra.mxu0 %v4131_v40  ;;  %v1037_v29 = vmul.f32 %v2919_v26, %v3799_v35  ;;  %v1006_v21 = vmul.f32 %v2921_v1, %v3808_v52  ;;  %v833_v4 = vpop.xlane.xlu1 %832  ;;  %v1078_v0 = vmul.f32 %v4072_v62, %v1003_v55  ;;  %v942_v54 = vadd.f32 1e-05, %v910_v48  ;;  %v884_v30 = vpop.xlane.xlu0 %883  ;;  %v1630_v35 = vld [vmem:[#allocation8 + $0xa0] sm:$0xff] }
 0x1be   : > { %5323 = vst [vmem:[#allocation48_spill] sm:$0xff] %v4134_v41  ;;  %1462 = vmatmul.mubr.f32.gmra.mxu1 %v4134_v41  ;;  %1694 = vmatprep.subr.mxu1 %v1633_v61  ;;  %v4151_v46 = vadd.f32 %v4069_v63, %v1113_v7  ;;  %v959_v61 = vadd.f32 1e-05, %v927_v16  ;;  %v1966_v41 = vld [vmem:[#allocation10 + $0xb8] sm:$0xff]  ;;  %v1040_v48 = vmul.f32 %v2923_v60, %v3822_v47  ;;  %v928_v22 = vmul.f32 0.00390625, %v884_v30  ;;  %v1965_v16 = vld [vmem:[#allocation10 + $0xb0] sm:$0xff] }
 0x1bf   : > { %v4148_v17 = vpop.eup %2924  ;;  %2024 = vmatpush1.msra.mxu0 %v1969_v59  ;;  %1695 = vmatpush1.msra.mxu1 %v1632_v57  ;;  %v1112_v52 = vmul.f32 %v4072_v62, %v1037_v29  ;;  %v1081_v26 = vmul.f32 %v4066_v42, %v1006_v21  ;;  %v4156_v55 = vadd.f32 %v4077_v11, %v1078_v0  ;;  %v911_v59 = vmul.f32 0.00390625, %v833_v4  ;;  %v1629_v7 = vld [vmem:[#allocation8 + $0x98] sm:$0xff]  ;;  %v5325_v29 = vld [vmem:[#allocation37_spill] sm:$0xff]  ;;  %v1627_v4 = vld [vmem:[#allocation8 + $0x88] sm:$0xff] }
 0x1c0   : > { %v2927_v34 = vpop.eup %2926  ;;  %2025 = vmatprep.subr.mxu0 %v1968_v10  ;;  %1696 = vmatprep.subr.mxu1 %v1631_v24  ;;  %v1005_v21 = vmul.f32 %v2921_v1, %v5325_v29  ;;  %v1628_v10 = vld [vmem:[#allocation8 + $0x90] sm:$0xff]  ;;  %v1115_v47 = vmul.f32 %v4066_v42, %v1040_v48  ;;  %2936 = vrsqrt.f32 %v942_v54  ;;  %v1039_v1 = vmul.f32 %v2923_v60, %v3819_v13  ;;  %v1626_v60 = vld [vmem:[#allocation8 + $0x80] sm:$0xff] }
 0x1c1   : > { %2026 = vmatpush1.msra.mxu0 %v1967_v9  ;;  %1365 = vmatprep.mubr.f32.mxu0 %v4139_v51  ;;  %v4161_v57 = vadd.f32 %v4077_v11, %v1112_v52  ;;  %v4166_v24 = vadd.f32 %v4069_v63, %v1081_v26  ;;  %v1964_v9 = vld [vmem:[#allocation10 + $0xa8] sm:$0xff]  ;;  %v1008_v30 = vmul.f32 %v4148_v17, %v3828_v5  ;;  %2938 = vrsqrt.f32 %v959_v61  ;;  %v1963_v52 = vld [vmem:[#allocation10 + $0xa0] sm:$0xff]  ;;  %v836_v54 = vpop.xlane.xlu1 %835  ;;  %v887_v13 = vpop.xlane.xlu0 %886 }
 0x1c2   : > { %1467 = vmatprep.mubr.f32.mxu1 %v4151_v46  ;;  %1697 = vmatpush1.msra.mxu1 %v1630_v35  ;;  %v1080_v0 = vmul.f32 %v4072_v62, %v1005_v21  ;;  %v1042_v26 = vmul.f32 %v2927_v34, %v3842_v20  ;;  %v943_v29 = vadd.f32 1e-05, %v911_v59  ;;  %v1114_v61 = vmul.f32 %v4072_v62, %v1039_v1 }
 0x1c3   : > { %5324 = vst [vmem:[#allocation49_spill] sm:$0xff] %v4161_v57  ;;  %2027 = vmatprep.subr.mxu0 %v1966_v41  ;;  %1366 = vmatmul.mubr.f32.gmra.mxu0 %v4156_v55  ;;  %v4174_v35 = vpop.eup %2928  ;;  %v4178_v41 = vadd.f32 %v4069_v63, %v1115_v47  ;;  %v960_v21 = vadd.f32 1e-05, %v928_v22  ;;  %v1962_v47 = vld [vmem:[#allocation10 + $0x98] sm:$0xff]  ;;  %v912_v20 = vmul.f32 0.00390625, %v836_v54  ;;  %v1961_v22 = vld [vmem:[#allocation10 + $0x90] sm:$0xff]  ;;  %v1041_v1 = vmul.f32 %v2927_v34, %v3839_v23 }
 0x1c4   : > { %1468 = vmatmul.mubr.f32.gmra.mxu1 %v4161_v57  ;;  %1698 = vmatprep.subr.mxu1 %v1629_v7  ;;  %v2931_v48 = vpop.eup %2930  ;;  %v4182_v5 = vadd.f32 %v4077_v11, %v1080_v0  ;;  %v1083_v7 = vmul.f32 %v4066_v42, %v1008_v30  ;;  %v1117_v57 = vmul.f32 %v4066_v42, %v1042_v26  ;;  %v929_v0 = vmul.f32 0.00390625, %v887_v13  ;;  %v1960_v30 = vld [vmem:[#allocation10 + $0x88] sm:$0xff]  ;;  %v1959_v13 = vld [vmem:[#allocation10 + $0x80] sm:$0xff] }
 0x1c5   : > { %2028 = vmatpush1.msra.mxu0 %v1965_v16  ;;  %1699 = vmatpush1.msra.mxu1 %v1628_v10  ;;  %v4189_v59 = vadd.f32 %v4077_v11, %v1114_v61  ;;  %v1625_v16 = vld [vmem:[#allocation8 + $0x78] sm:$0xff]  ;;  %v1007_v10 = vmul.f32 %v4148_v17, %v3825_v15  ;;  %2940 = vrsqrt.f32 %v943_v29  ;;  %v1010_v15 = vmul.f32 %v4174_v35, %v3848_v14  ;;  %v839_v23 = vpop.xlane.xlu1 %838  ;;  %v1622_v14 = vld [vmem:[#allocation8 + $0x60] sm:$0xff] }
 0x1c6   : > { %2029 = vmatprep.subr.mxu0 %v1964_v9  ;;  %1700 = vmatprep.subr.mxu1 %v1627_v4  ;;  %v1624_v9 = vld [vmem:[#allocation8 + $0x70] sm:$0xff]  ;;  %v4195_v4 = vadd.f32 %v4069_v63, %v1083_v7  ;;  %v1044_v17 = vmul.f32 %v2931_v48, %v3862_v27  ;;  %2942 = vrsqrt.f32 %v960_v21  ;;  %v4205_v34 = vadd.f32 %v4069_v63, %v1117_v57  ;;  %v890_v7 = vpop.xlane.xlu0 %889 }
 0x1c7   : > { %2030 = vmatpush1.msra.mxu0 %v1963_v52  ;;  %1371 = vmatprep.mubr.f32.mxu0 %v4166_v24  ;;  %v1623_v52 = vld [vmem:[#allocation8 + $0x68] sm:$0xff]  ;;  %v1082_v54 = vmul.f32 %v4072_v62, %v1007_v10  ;;  %v1116_v29 = vmul.f32 %v4072_v62, %v1041_v1  ;;  %v944_v61 = vadd.f32 1e-05, %v912_v20  ;;  %v1085_v21 = vmul.f32 %v4066_v42, %v1010_v15 }
 0x1c8   : > { %1473 = vmatprep.mubr.f32.mxu1 %v4178_v41  ;;  %1701 = vmatpush1.msra.mxu1 %v1626_v60  ;;  %v2933_v26 = vpop.eup %2932  ;;  %v1119_v10 = vmul.f32 %v4066_v42, %v1044_v17  ;;  %v5326_v1 = vld [vmem:[#allocation38_spill] sm:$0xff]  ;;  %v930_v15 = vmul.f32 0.00390625, %v890_v7  ;;  %v1955_v7 = vld [vmem:[#allocation10 + $0x60] sm:$0xff] }
 0x1c9   : > { %2031 = vmatprep.subr.mxu0 %v1962_v47  ;;  %1372 = vmatmul.mubr.f32.gmra.mxu0 %v4182_v5  ;;  %v2935_v60 = vpop.eup %2934  ;;  %v4209_v27 = vadd.f32 %v4077_v11, %v1082_v54  ;;  %v961_v47 = vadd.f32 1e-05, %v929_v0  ;;  %v4213_v57 = vadd.f32 %v4077_v11, %v1116_v29  ;;  %v1009_v20 = vmul.f32 %v4174_v35, %v5326_v1  ;;  %v1957_v0 = vld [vmem:[#allocation10 + $0x70] sm:$0xff]  ;;  %v1956_v35 = vld [vmem:[#allocation10 + $0x68] sm:$0xff] }
 0x1ca   : > { %1474 = vmatmul.mubr.f32.gmra.mxu1 %v4189_v59  ;;  %1702 = vmatprep.subr.mxu1 %v1625_v16  ;;  %v1958_v16 = vld [vmem:[#allocation10 + $0x78] sm:$0xff]  ;;  %v1043_v54 = vmul.f32 %v2931_v48, %v3859_v25  ;;  %2944 = vrsqrt.f32 %v944_v61  ;;  %v1012_v25 = vmul.f32 %v2933_v26, %v3868_v8  ;;  %v1046_v48 = vmul.f32 %v2935_v60, %v3882_v18  ;;  %v1618_v8 = vld [vmem:[#allocation8 + $0x40] sm:$0xff] }
 0x1cb   : > { %2032 = vmatpush1.msra.mxu0 %v1961_v22  ;;  %1703 = vmatpush1.msra.mxu1 %v1624_v9  ;;  %v913_v22 = vmul.f32 0.00390625, %v839_v23  ;;  %v1621_v9 = vld [vmem:[#allocation8 + $0x58] sm:$0xff]  ;;  %v1084_v17 = vmul.f32 %v4072_v62, %v1009_v20  ;;  %2946 = vrsqrt.f32 %v961_v47  ;;  %v4231_v61 = vadd.f32 %v4069_v63, %v1119_v10  ;;  %v893_v20 = vpop.xlane.xlu0 %892 }
 0x1cc   : > { %2033 = vmatprep.subr.mxu0 %v1960_v30  ;;  %1704 = vmatprep.subr.mxu1 %v1623_v52  ;;  %v1620_v30 = vld [vmem:[#allocation8 + $0x50] sm:$0xff]  ;;  %v4222_v52 = vadd.f32 %v4069_v63, %v1085_v21  ;;  %v1118_v23 = vmul.f32 %v4072_v62, %v1043_v54  ;;  %v1011_v21 = vmul.f32 %v2933_v26, %v3865_v12  ;;  %v962_v54 = vadd.f32 1e-05, %v930_v15 }
 0x1cd   : > { %2034 = vmatpush1.msra.mxu0 %v1959_v13  ;;  %1377 = vmatprep.mubr.f32.mxu0 %v4195_v4  ;;  %v1619_v13 = vld [vmem:[#allocation8 + $0x48] sm:$0xff]  ;;  %v2937_v29 = vpop.eup %2936  ;;  %v945_v1 = vadd.f32 1e-05, %v913_v22  ;;  %v4235_v18 = vadd.f32 %v4077_v11, %v1084_v17  ;;  %v1087_v47 = vmul.f32 %v4066_v42, %v1012_v25  ;;  %v1121_v12 = vmul.f32 %v4066_v42, %v1046_v48  ;;  %v1953_v15 = vld [vmem:[#allocation10 + $0x50] sm:$0xff] }
 0x1ce   : > { %1479 = vmatprep.mubr.f32.mxu1 %v4205_v34  ;;  %1705 = vmatpush1.msra.mxu1 %v1622_v14  ;;  %v842_v14 = vpop.xlane.xlu1 %841  ;;  %v4239_v10 = vadd.f32 %v4077_v11, %v1118_v23  ;;  %v1045_v26 = vmul.f32 %v2935_v60, %v3879_v31  ;;  %v931_v17 = vmul.f32 0.00390625, %v893_v20  ;;  %v1014_v23 = vmul.f32 %v2937_v29, %v3888_v2  ;;  %v1952_v31 = vld [vmem:[#allocation10 + $0x48] sm:$0xff] }
 0x1cf   : > { %2035 = vmatprep.subr.mxu0 %v1958_v16  ;;  %1378 = vmatmul.mubr.f32.gmra.mxu0 %v4209_v27  ;;  %v2939_v16 = vpop.eup %2938  ;;  %v914_v22 = vmul.f32 0.00390625, %v842_v14  ;;  %2948 = vrsqrt.f32 %v945_v1  ;;  %v1615_v60 = vld [vmem:[#allocation8 + $0x28] sm:$0xff]  ;;  %v4250_v25 = vadd.f32 %v4069_v63, %v1087_v47  ;;  %v4256_v1 = vadd.f32 %v4069_v63, %v1121_v12  ;;  %v896_v47 = vpop.xlane.xlu0 %895 }
 0x1d0   : > { %1480 = vmatmul.mubr.f32.gmra.mxu1 %v4213_v57  ;;  %1706 = vmatprep.subr.mxu1 %v1621_v9  ;;  %v1954_v9 = vld [vmem:[#allocation10 + $0x58] sm:$0xff]  ;;  %v1048_v48 = vmul.f32 %v2939_v16, %v3902_v38  ;;  %2950 = vrsqrt.f32 %v962_v54  ;;  %v1047_v20 = vmul.f32 %v2939_v16, %v3899_v37  ;;  %v1614_v38 = vld [vmem:[#allocation8 + $0x20] sm:$0xff]  ;;  %v963_v54 = vadd.f32 1e-05, %v931_v17  ;;  %v1949_v17 = vld [vmem:[#allocation10 + $0x30] sm:$0xff] }
 0x1d1   : > { %2036 = vmatpush1.msra.mxu0 %v1957_v0  ;;  %1707 = vmatpush1.msra.mxu1 %v1620_v30  ;;  %v1617_v0 = vld [vmem:[#allocation8 + $0x38] sm:$0xff]  ;;  %v1086_v30 = vmul.f32 %v4072_v62, %v1011_v21  ;;  %v1951_v21 = vld [vmem:[#allocation10 + $0x40] sm:$0xff] }
 0x1d2   : > { %2037 = vmatprep.subr.mxu0 %v1956_v35  ;;  %1708 = vmatprep.subr.mxu1 %v1619_v13  ;;  %v1616_v35 = vld [vmem:[#allocation8 + $0x30] sm:$0xff]  ;;  %v1120_v13 = vmul.f32 %v4072_v62, %v1045_v26  ;;  %v2941_v14 = vpop.eup %2940  ;;  %v845_v2 = vpop.xlane.xlu1 %844  ;;  %v1950_v26 = vld [vmem:[#allocation10 + $0x38] sm:$0xff]  ;;  %v1123_v37 = vmul.f32 %v4066_v42, %v1048_v48 }
 0x1d3   : > { %2038 = vmatpush1.msra.mxu0 %v1955_v7  ;;  %1383 = vmatprep.mubr.f32.mxu0 %v4222_v52  ;;  %v1013_v7 = vmul.f32 %v2937_v29, %v3885_v19  ;;  %v4260_v19 = vadd.f32 %v4077_v11, %v1086_v30  ;;  %v1089_v29 = vmul.f32 %v4066_v42, %v1014_v23  ;;  %v915_v16 = vmul.f32 0.00390625, %v845_v2 }
 0x1d4   : > { %1485 = vmatprep.mubr.f32.mxu1 %v4231_v61  ;;  %1709 = vmatpush1.msra.mxu1 %v1618_v8  ;;  %v2943_v8 = vpop.eup %2942  ;;  %v4264_v12 = vadd.f32 %v4077_v11, %v1120_v13  ;;  %v1016_v30 = vmul.f32 %v2941_v14, %v3908_v33  ;;  %v1122_v13 = vmul.f32 %v4072_v62, %v1047_v20 }
 0x1d5   : > { %2039 = vmatprep.subr.mxu0 %v1954_v9  ;;  %1384 = vmatmul.mubr.f32.gmra.mxu0 %v4235_v18  ;;  %v946_v9 = vadd.f32 1e-05, %v914_v22  ;;  %v1613_v22 = vld [vmem:[#allocation8 + $0x18] sm:$0xff]  ;;  %v1050_v23 = vmul.f32 %v2943_v8, %v3922_v44  ;;  %v4275_v48 = vadd.f32 %v4069_v63, %v1089_v29  ;;  %v1015_v33 = vmul.f32 %v2941_v14, %v3905_v32  ;;  %v1610_v29 = vld [vmem:[#allocation8] sm:$0xff] }
 0x1d6   : > { %1486 = vmatmul.mubr.f32.gmra.mxu1 %v4239_v10  ;;  %1710 = vmatprep.subr.mxu1 %v1617_v0  ;;  %v1088_v0 = vmul.f32 %v4072_v62, %v1013_v7  ;;  %v848_v2 = vpop.xlane.xlu1 %847  ;;  %v4280_v44 = vadd.f32 %v4069_v63, %v1123_v37  ;;  %v1049_v20 = vmul.f32 %v2943_v8, %v3919_v43 }
 0x1d7   : > { %2040 = vmatpush1.msra.mxu0 %v1953_v15  ;;  %1711 = vmatpush1.msra.mxu1 %v1616_v35  ;;  %v932_v15 = vmul.f32 0.00390625, %v896_v47  ;;  %v1612_v35 = vld [vmem:[#allocation8 + $0x10] sm:$0xff]  ;;  %2952 = vrsqrt.f32 %v946_v9  ;;  %v2945_v7 = vpop.eup %2944  ;;  %v947_v47 = vadd.f32 1e-05, %v915_v16  ;;  %v1091_v14 = vmul.f32 %v4066_v42, %v1016_v30  ;;  %v1673_v16 = vld [vmem:[#allocation8 + $0x1f8] sm:$0xff] }
 0x1d8   : > { %2041 = vmatprep.subr.mxu0 %v1952_v31  ;;  %1712 = vmatprep.subr.mxu1 %v1615_v60  ;;  %v1948_v31 = vld [vmem:[#allocation10 + $0x28] sm:$0xff]  ;;  %2954 = vrsqrt.f32 %v963_v54  ;;  %5327 = vst [vmem:[#allocation37_spill] sm:$0xff] %v4280_v44  ;;  %v2947_v9 = vpop.eup %2946  ;;  %v4284_v32 = vadd.f32 %v4077_v11, %v1088_v0  ;;  %v4288_v37 = vadd.f32 %v4077_v11, %v1122_v13  ;;  %v916_v8 = vmul.f32 0.00390625, %v848_v2  ;;  %v1945_v30 = vld [vmem:[#allocation10 + $0x10] sm:$0xff] }
 0x1d9   : > { %2042 = vmatpush1.msra.mxu0 %v1951_v21  ;;  %1389 = vmatprep.mubr.f32.mxu0 %v4250_v25  ;;  %v1611_v60 = vld [vmem:[#allocation8 + $0x8] sm:$0xff]  ;;  %v1947_v21 = vld [vmem:[#allocation10 + $0x20] sm:$0xff]  ;;  %v964_v54 = vadd.f32 1e-05, %v932_v15  ;;  %v1125_v43 = vmul.f32 %v4066_v42, %v1050_v23  ;;  %v1018_v0 = vmul.f32 %v2945_v7, %v3928_v58  ;;  %v1672_v15 = vld [vmem:[#allocation8 + $0x1f0] sm:$0xff]  ;;  %v1052_v13 = vmul.f32 %v2947_v9, %v3942_v50 }
 0x1da   : > { %1491 = vmatprep.mubr.f32.mxu1 %v4256_v1  ;;  %1713 = vmatpush1.msra.mxu1 %v1614_v38  ;;  %v899_v38 = vpop.xlane.xlu0 %898  ;;  %5328 = vst [vmem:[#allocation38_spill] sm:$0xff] %v4288_v37  ;;  %2956 = vrsqrt.f32 %v947_v47  ;;  %v1944_v23 = vld [vmem:[#allocation10 + $0x8] sm:$0xff]  ;;  %v1017_v58 = vmul.f32 %v2945_v7, %v3925_v6  ;;  %v851_v2 = vpop.xlane.xlu1 %850 }
 0x1db   : > { %2043 = vmatprep.subr.mxu0 %v1950_v26  ;;  %1390 = vmatmul.mubr.f32.gmra.mxu0 %v4260_v19  ;;  %v1946_v26 = vld [vmem:[#allocation10 + $0x18] sm:$0xff]  ;;  %2958 = vrsqrt.f32 %v964_v54  ;;  %v4304_v50 = vadd.f32 %v4069_v63, %v1125_v43  ;;  %v1093_v7 = vmul.f32 %v4066_v42, %v1018_v0  ;;  %v2005_v0 = vld [vmem:[#allocation10 + $0x1f0] sm:$0xff] }
 0x1dc   : > { %1492 = vmatmul.mubr.f32.gmra.mxu1 %v4264_v12  ;;  %1714 = vmatprep.subr.mxu1 %v1613_v22  ;;  %v1090_v22 = vmul.f32 %v4072_v62, %v1015_v33  ;;  %v2949_v33 = vpop.eup %2948 }
 0x1dd   : > { %2044 = vmatpush1.msra.mxu0 %v1949_v17  ;;  %1715 = vmatpush1.msra.mxu1 %v1612_v35  ;;  %v933_v17 = vmul.f32 0.00390625, %v899_v38  ;;  %v1124_v35 = vmul.f32 %v4072_v62, %v1049_v20  ;;  %5329 = vst [vmem:[#allocation50_spill] sm:$0xff] %v4304_v50  ;;  %v1051_v20 = vmul.f32 %v2947_v9, %v3939_v49  ;;  %v2951_v47 = vpop.eup %2950  ;;  %v948_v38 = vadd.f32 1e-05, %v916_v8  ;;  %v1669_v8 = vld [vmem:[#allocation8 + $0x1d8] sm:$0xff] }
 0x1de   : > { %2045 = vmatprep.subr.mxu0 %v1948_v31  ;;  %1716 = vmatprep.subr.mxu1 %v1611_v60  ;;  %v1671_v31 = vld [vmem:[#allocation8 + $0x1e8] sm:$0xff]  ;;  %v4299_v60 = vadd.f32 %v4069_v63, %v1091_v14  ;;  %v1670_v14 = vld [vmem:[#allocation8 + $0x1e0] sm:$0xff]  ;;  %v4308_v6 = vadd.f32 %v4077_v11, %v1090_v22  ;;  %v1127_v49 = vmul.f32 %v4066_v42, %v1052_v13  ;;  %v917_v9 = vmul.f32 0.00390625, %v851_v2 }
 0x1df   : > { %2046 = vmatpush1.msra.mxu0 %v1947_v21  ;;  %1395 = vmatprep.mubr.f32.mxu0 %v4275_v48  ;;  %v1943_v21 = vld [vmem:[#allocation10] sm:$0xff]  ;;  %v965_v54 = vadd.f32 1e-05, %v933_v17  ;;  %v4312_v43 = vadd.f32 %v4077_v11, %v1124_v35  ;;  %v1020_v22 = vmul.f32 %v2949_v33, %v3948_v3  ;;  %v1668_v17 = vld [vmem:[#allocation8 + $0x1d0] sm:$0xff]  ;;  %v1054_v35 = vmul.f32 %v2951_v47, %v3962_v56  ;;  %v2004_v13 = vld [vmem:[#allocation10 + $0x1e8] sm:$0xff] }
 0x1e0   : > { %1497 = vmatprep.mubr.f32.mxu1 %v4280_v44  ;;  %1717 = vmatpush1.msra.mxu1 %v1610_v29  ;;  %v902_v29 = vpop.xlane.xlu0 %901  ;;  %2960 = vrsqrt.f32 %v948_v38  ;;  %v1019_v3 = vmul.f32 %v2949_v33, %v3945_v53  ;;  %v4328_v2 = vadd.f32 %v4069_v63, %v1127_v49  ;;  %v5332_v56 = vld [vmem:[#allocation39_spill] sm:$0xff] }
 0x1e1   : > { %2047 = vmatprep.subr.mxu0 %v1946_v26  ;;  %1396 = vmatmul.mubr.f32.gmra.mxu0 %v4284_v32  ;;  %v2006_v26 = vld [vmem:[#allocation10 + $0x1f8] sm:$0xff]  ;;  %5330 = vst [vmem:[#allocation51_spill] sm:$0xff] %v4312_v43  ;;  %2962 = vrsqrt.f32 %v965_v54  ;;  %v1095_v53 = vmul.f32 %v4066_v42, %v1020_v22  ;;  %v2001_v22 = vld [vmem:[#allocation10 + $0x1d0] sm:$0xff] }
 0x1e2   : > { %1498 = vmatmul.mubr.f32.gmra.mxu1 %v4288_v37  ;;  %1718 = vmatprep.subr.mxu1 %v1673_v16  ;;  %v1092_v16 = vmul.f32 %v4072_v62, %v1017_v58  ;;  %5331 = vst [vmem:[#allocation52_spill] sm:$0xff] %v4328_v2  ;;  %v2002_v54 = vld [vmem:[#allocation10 + $0x1d8] sm:$0xff] }
 0x1e3   : > { %2048 = vmatpush1.msra.mxu0 %v1945_v30  ;;  %1719 = vmatpush2.msra.mxu1 %v1672_v15  ;;  %v934_v30 = vmul.f32 0.00390625, %v902_v29  ;;  %v1126_v15 = vmul.f32 %v4072_v62, %v1051_v20  ;;  %v1053_v20 = vmul.f32 %v2951_v47, %v5332_v56  ;;  %v949_v29 = vadd.f32 1e-05, %v917_v9  ;;  %v1665_v9 = vld [vmem:[#allocation8 + $0x1b8] sm:$0xff] }
 0x1e4   : > { %2049 = vmatprep.subr.mxu0 %v1944_v23  ;;  %1720 = vmatprep.subr.mxu1 %v1671_v31  ;;  %v1667_v23 = vld [vmem:[#allocation8 + $0x1c8] sm:$0xff]  ;;  %v4323_v31 = vadd.f32 %v4069_v63, %v1093_v7  ;;  %v2953_v58 = vpop.eup %2952  ;;  %v1666_v7 = vld [vmem:[#allocation8 + $0x1c0] sm:$0xff]  ;;  %v1129_v47 = vmul.f32 %v4066_v42, %v1054_v35  ;;  %v5336_v56 = vld [vmem:[#allocation40_spill] sm:$0xff] }
 0x1e5   : > { %2050 = vmatpush1.msra.mxu0 %v1943_v21  ;;  %1401 = vmatprep.mubr.f32.mxu0 %v4299_v60  ;;  %v2003_v21 = vld [vmem:[#allocation10 + $0x1e0] sm:$0xff]  ;;  %v2955_v38 = vpop.eup %2954  ;;  %v966_v33 = vadd.f32 1e-05, %v934_v30  ;;  %v4336_v49 = vadd.f32 %v4077_v11, %v1126_v15  ;;  %v1664_v30 = vld [vmem:[#allocation8 + $0x1b0] sm:$0xff]  ;;  %2964 = vrsqrt.f32 %v949_v29  ;;  %v2000_v35 = vld [vmem:[#allocation10 + $0x1c8] sm:$0xff] }
 0x1e6   : > { %1503 = vmatprep.mubr.f32.mxu1 %v4304_v50  ;;  %1721 = vmatpush2.msra.mxu1 %v1670_v14  ;;  %v854_v14 = vpop.xlane.xlu1 %853  ;;  %v5335_v15 = vld [vmem:[#allocation43_spill] sm:$0xff]  ;;  %v5338_v29 = vld [vmem:[#allocation42_spill] sm:$0xff]  ;;  %v1654_v50 = vld [vmem:[#allocation8 + $0x160] sm:$0xff] }
 0x1e7   : > { %2051 = vmatprep.subr.mxu0 %v2006_v26  ;;  %1402 = vmatmul.mubr.f32.gmra.mxu0 %v4308_v6  ;;  %v4332_v26 = vadd.f32 %v4077_v11, %v1092_v16  ;;  %5333 = vst [vmem:[#allocation39_spill] sm:$0xff] %v4336_v49  ;;  %2966 = vrsqrt.f32 %v966_v33  ;;  %v1998_v33 = vld [vmem:[#allocation10 + $0x1b8] sm:$0xff] }
 0x1e8   : > { %1504 = vmatmul.mubr.f32.gmra.mxu1 %v4312_v43  ;;  %1722 = vmatprep.subr.mxu1 %v1669_v8  ;;  %v1094_v8 = vmul.f32 %v4072_v62, %v1019_v3  ;;  %v4347_v3 = vadd.f32 %v4069_v63, %v1095_v53  ;;  %v1658_v43 = vld [vmem:[#allocation8 + $0x180] sm:$0xff] }
 0x1e9   : > { %2052 = vmatpush2.msra.mxu0 %v2005_v0  ;;  %1723 = vmatpush2.msra.mxu1 %v1668_v17  ;;  %v5334_v0 = vld [vmem:[#allocation41_spill] sm:$0xff]  ;;  %v918_v17 = vmul.f32 0.00390625, %v854_v14  ;;  %v1021_v14 = vmul.f32 %v2953_v58, %v5336_v56 }
 0x1ea   : > { %2053 = vmatprep.subr.mxu0 %v2004_v13  ;;  %1724 = vmatprep.subr.mxu1 %v1667_v23  ;;  %v1022_v16 = vmul.f32 %v2953_v58, %v5334_v0  ;;  %v1128_v13 = vmul.f32 %v4072_v62, %v1053_v20  ;;  %v1056_v23 = vmul.f32 %v2955_v38, %v5335_v15  ;;  %v2957_v0 = vpop.eup %2956 }
 0x1eb   : > { %2054 = vmatpush2.msra.mxu0 %v2003_v21  ;;  %1407 = vmatprep.mubr.f32.mxu0 %v4323_v31  ;;  %v1663_v21 = vld [vmem:[#allocation8 + $0x1a8] sm:$0xff]  ;;  %v4352_v20 = vadd.f32 %v4069_v63, %v1129_v47  ;;  %v2959_v15 = vpop.eup %2958  ;;  %v4356_v53 = vadd.f32 %v4077_v11, %v1094_v8  ;;  %v950_v56 = vadd.f32 1e-05, %v918_v17  ;;  %v1660_v17 = vld [vmem:[#allocation8 + $0x190] sm:$0xff] }
 0x1ec   : > { %1509 = vmatprep.mubr.f32.mxu1 %v4328_v2  ;;  %1725 = vmatpush2.msra.mxu1 %v1666_v7  ;;  %v1999_v7 = vld [vmem:[#allocation10 + $0x1c0] sm:$0xff]  ;;  %v1097_v58 = vmul.f32 %v4066_v42, %v1022_v16  ;;  %v1131_v47 = vmul.f32 %v4066_v42, %v1056_v23  ;;  %v1997_v16 = vld [vmem:[#allocation10 + $0x1b0] sm:$0xff]  ;;  %v1996_v23 = vld [vmem:[#allocation10 + $0x1a8] sm:$0xff] }
 0x1ed   : > { %2055 = vmatprep.subr.mxu0 %v2002_v54  ;;  %1408 = vmatmul.mubr.f32.gmra.mxu0 %v4332_v26  ;;  %5337 = vst [vmem:[#allocation41_spill] sm:$0xff] %v4352_v20  ;;  %v1055_v54 = vmul.f32 %v2955_v38, %v5338_v29  ;;  %v1662_v2 = vld [vmem:[#allocation8 + $0x1a0] sm:$0xff]  ;;  %v1661_v38 = vld [vmem:[#allocation8 + $0x198] sm:$0xff]  ;;  %2968 = vrsqrt.f32 %v950_v56 }
 0x1ee   : > { %1510 = vmatmul.mubr.f32.gmra.mxu1 %v4336_v49  ;;  %1726 = vmatprep.subr.mxu1 %v1665_v9  ;;  %v4360_v9 = vadd.f32 %v4077_v11, %v1128_v13  ;;  %v4371_v29 = vadd.f32 %v4069_v63, %v1097_v58  ;;  %v1994_v56 = vld [vmem:[#allocation10 + $0x198] sm:$0xff] }
 0x1ef   : > { %2056 = vmatpush2.msra.mxu0 %v2001_v22  ;;  %1727 = vmatpush2.msra.mxu1 %v1664_v30  ;;  %v1096_v22 = vmul.f32 %v4072_v62, %v1021_v14  ;;  %v5340_v30 = vld [vmem:[#allocation21_spill] sm:$0xff]  ;;  %v5342_v14 = vld [vmem:[#allocation44_spill] sm:$0xff] }
 0x1f0   : > { %2057 = vmatprep.subr.mxu0 %v2000_v35  ;;  %1728 = vmatprep.subr.mxu1 %v1663_v21  ;;  %5339 = vst [vmem:[#allocation43_spill] sm:$0xff] %v4360_v9  ;;  %v1024_v8 = vmul.f32 %v2957_v0, %v5340_v30  ;;  %v1130_v35 = vmul.f32 %v4072_v62, %v1055_v54  ;;  %v5341_v21 = vld [vmem:[#allocation23_spill] sm:$0xff]  ;;  %v2961_v30 = vpop.eup %2960 }
 0x1f1   : > { %2058 = vmatpush2.msra.mxu0 %v1999_v7  ;;  %1413 = vmatprep.mubr.f32.mxu0 %v4347_v3  ;;  %v1058_v13 = vmul.f32 %v2959_v15, %v5341_v21  ;;  %v1659_v7 = vld [vmem:[#allocation8 + $0x188] sm:$0xff]  ;;  %v1023_v49 = vmul.f32 %v2957_v0, %v5342_v14  ;;  %v4376_v54 = vadd.f32 %v4069_v63, %v1131_v47 }
 0x1f2   : > { %1515 = vmatprep.mubr.f32.mxu1 %v4352_v20  ;;  %1729 = vmatpush2.msra.mxu1 %v1662_v2  ;;  %v1995_v2 = vld [vmem:[#allocation10 + $0x1a0] sm:$0xff]  ;;  %v5344_v21 = vld [vmem:[#allocation22_spill] sm:$0xff]  ;;  %v2963_v20 = vpop.eup %2962  ;;  %v4380_v58 = vadd.f32 %v4077_v11, %v1096_v22  ;;  %v1099_v0 = vmul.f32 %v4066_v42, %v1024_v8  ;;  %v1993_v22 = vld [vmem:[#allocation10 + $0x190] sm:$0xff] }
 0x1f3   : > { %2059 = vmatprep.subr.mxu0 %v1998_v33  ;;  %1414 = vmatmul.mubr.f32.gmra.mxu0 %v4356_v53  ;;  %5343 = vst [vmem:[#allocation40_spill] sm:$0xff] %v4376_v54  ;;  %v1057_v33 = vmul.f32 %v2959_v15, %v5344_v21  ;;  %v1133_v47 = vmul.f32 %v4066_v42, %v1058_v13  ;;  %v1657_v15 = vld [vmem:[#allocation8 + $0x178] sm:$0xff]  ;;  %v1656_v8 = vld [vmem:[#allocation8 + $0x170] sm:$0xff]  ;;  %v1992_v13 = vld [vmem:[#allocation10 + $0x188] sm:$0xff] }
 0x1f4   : > { %1516 = vmatmul.mubr.f32.gmra.mxu1 %v4360_v9  ;;  %1730 = vmatprep.subr.mxu1 %v1661_v38  ;;  %v4384_v38 = vadd.f32 %v4077_v11, %v1130_v35  ;;  %v4395_v21 = vadd.f32 %v4069_v63, %v1099_v0 }
 0x1f5   : > { %2060 = vmatpush2.msra.mxu0 %v1997_v16  ;;  %1731 = vmatpush2.msra.mxu1 %v1660_v17  ;;  %v1098_v16 = vmul.f32 %v4072_v62, %v1023_v49  ;;  %v5346_v17 = vld [vmem:[#allocation25_spill] sm:$0xff]  ;;  %v5348_v49 = vld [vmem:[#allocation24_spill] sm:$0xff] }
 0x1f6   : > { %2061 = vmatprep.subr.mxu0 %v1996_v23  ;;  %1732 = vmatprep.subr.mxu1 %v1659_v7  ;;  %5345 = vst [vmem:[#allocation42_spill] sm:$0xff] %v4384_v38  ;;  %v1026_v14 = vmul.f32 %v2961_v30, %v5346_v17  ;;  %v1132_v23 = vmul.f32 %v4072_v62, %v1057_v33  ;;  %v5347_v7 = vld [vmem:[#allocation27_spill] sm:$0xff]  ;;  %v2965_v17 = vpop.eup %2964  ;;  %v5350_v33 = vld [vmem:[#allocation26_spill] sm:$0xff] }
 0x1f7   : > { %2062 = vmatpush2.msra.mxu0 %v1995_v2  ;;  %1419 = vmatprep.mubr.f32.mxu0 %v4371_v29  ;;  %v1060_v35 = vmul.f32 %v2963_v20, %v5347_v7  ;;  %v1655_v2 = vld [vmem:[#allocation8 + $0x168] sm:$0xff]  ;;  %v1025_v9 = vmul.f32 %v2961_v30, %v5348_v49  ;;  %v1059_v7 = vmul.f32 %v2963_v20, %v5350_v33  ;;  %v1990_v30 = vld [vmem:[#allocation10 + $0x178] sm:$0xff] }
 0x1f8   : > { %1521 = vmatprep.mubr.f32.mxu1 %v4376_v54  ;;  %1733 = vmatpush2.msra.mxu1 %v1658_v43  ;;  %v1991_v43 = vld [vmem:[#allocation10 + $0x180] sm:$0xff]  ;;  %v4400_v54 = vadd.f32 %v4069_v63, %v1133_v47  ;;  %v4404_v37 = vadd.f32 %v4077_v11, %v1098_v16  ;;  %v1101_v0 = vmul.f32 %v4066_v42, %v1026_v14  ;;  %v1653_v20 = vld [vmem:[#allocation8 + $0x158] sm:$0xff]  ;;  %v1989_v16 = vld [vmem:[#allocation10 + $0x170] sm:$0xff] }
 0x1f9   : > { %2063 = vmatprep.subr.mxu0 %v1994_v56  ;;  %1420 = vmatmul.mubr.f32.gmra.mxu0 %v4380_v58  ;;  %v2967_v56 = vpop.eup %2966  ;;  %v1135_v47 = vmul.f32 %v4066_v42, %v1060_v35  ;;  %v1652_v14 = vld [vmem:[#allocation8 + $0x150] sm:$0xff]  ;;  %v1988_v35 = vld [vmem:[#allocation10 + $0x168] sm:$0xff] }
 0x1fa   : > { %1522 = vmatmul.mubr.f32.gmra.mxu1 %v4384_v38  ;;  %1734 = vmatprep.subr.mxu1 %v1657_v15  ;;  %5349 = vst [vmem:[#allocation21_spill] sm:$0xff] %v4400_v54  ;;  %v4408_v15 = vadd.f32 %v4077_v11, %v1132_v23  ;;  %v4419_v33 = vadd.f32 %v4069_v63, %v1101_v0 }
 0x1fb   : > { %2064 = vmatpush2.msra.mxu0 %v1993_v22  ;;  %1735 = vmatpush2.msra.mxu1 %v1656_v8  ;;  %v1100_v22 = vmul.f32 %v4072_v62, %v1025_v9  ;;  %v5351_v8 = vld [vmem:[#allocation29_spill] sm:$0xff]  ;;  %v5353_v9 = vld [vmem:[#allocation28_spill] sm:$0xff] }
 0x1fc   : > { %2065 = vmatprep.subr.mxu0 %v1992_v13  ;;  %1736 = vmatprep.subr.mxu1 %v1655_v2  ;;  %v1028_v49 = vmul.f32 %v2965_v17, %v5351_v8  ;;  %v1134_v13 = vmul.f32 %v4072_v62, %v1059_v7  ;;  %v5352_v2 = vld [vmem:[#allocation30_spill] sm:$0xff]  ;;  %v1027_v38 = vmul.f32 %v2965_v17, %v5353_v9  ;;  %v5354_v7 = vld [vmem:[#allocation45_spill] sm:$0xff]  ;;  %v1986_v17 = vld [vmem:[#allocation10 + $0x158] sm:$0xff] }
 0x1fd   : > { %2066 = vmatpush2.msra.mxu0 %v1991_v43  ;;  %1425 = vmatprep.mubr.f32.mxu0 %v4395_v21  ;;  %v1062_v23 = vmul.f32 %v2967_v56, %v5352_v2  ;;  %v1651_v43 = vld [vmem:[#allocation8 + $0x148] sm:$0xff]  ;;  %v4424_v8 = vadd.f32 %v4069_v63, %v1135_v47  ;;  %v2969_v2 = vpop.eup %2968  ;;  %v4428_v44 = vadd.f32 %v4077_v11, %v1100_v22  ;;  %v1985_v22 = vld [vmem:[#allocation10 + $0x150] sm:$0xff] }
 0x1fe   : > { %1527 = vmatprep.mubr.f32.mxu1 %v4400_v54  ;;  %1737 = vmatpush2.msra.mxu1 %v1654_v50  ;;  %v1987_v50 = vld [vmem:[#allocation10 + $0x160] sm:$0xff]  ;;  %v1061_v54 = vmul.f32 %v2967_v56, %v5354_v7  ;;  %v1103_v0 = vmul.f32 %v4066_v42, %v1028_v49  ;;  %v1649_v56 = vld [vmem:[#allocation8 + $0x138] sm:$0xff] }
 0x1ff   : > { %2067 = vmatprep.subr.mxu0 %v1990_v30  ;;  %1426 = vmatmul.mubr.f32.gmra.mxu0 %v4404_v37  ;;  %v1650_v30 = vld [vmem:[#allocation8 + $0x140] sm:$0xff]  ;;  %v1137_v47 = vmul.f32 %v4066_v42, %v1062_v23  ;;  %v1647_v23 = vld [vmem:[#allocation8 + $0x128] sm:$0xff] }
 0x200   : > { %1528 = vmatmul.mubr.f32.gmra.mxu1 %v4408_v15  ;;  %1738 = vmatprep.subr.mxu1 %v1653_v20  ;;  %v4432_v20 = vadd.f32 %v4077_v11, %v1134_v13  ;;  %v1136_v49 = vmul.f32 %v4072_v62, %v1061_v54  ;;  %v1984_v13 = vld [vmem:[#allocation10 + $0x148] sm:$0xff]  ;;  %v4442_v9 = vadd.f32 %v4069_v63, %v1103_v0  ;;  %v1646_v54 = vld [vmem:[#allocation8 + $0x120] sm:$0xff] }
 0x201   : > { %2068 = vmatpush2.msra.mxu0 %v1989_v16  ;;  %1739 = vmatpush2.msra.mxu1 %v1652_v14  ;;  %v1102_v16 = vmul.f32 %v4072_v62, %v1027_v38  ;;  %v1648_v14 = vld [vmem:[#allocation8 + $0x130] sm:$0xff]  ;;  %v1983_v38 = vld [vmem:[#allocation10 + $0x140] sm:$0xff] }
 0x202   : > { %2069 = vmatprep.subr.mxu0 %v1988_v35  ;;  %1740 = vmatprep.subr.mxu1 %v1651_v43  ;;  %v5355_v35 = vld [vmem:[#allocation32_spill] sm:$0xff]  ;;  %v4453_v0 = vadd.f32 %v4077_v11, %v1136_v49  ;;  %v1643_v49 = vld [vmem:[#allocation8 + $0x108] sm:$0xff] }
 0x203   : > { %2070 = vmatpush2.msra.mxu0 %v1987_v50  ;;  %1431 = vmatprep.mubr.f32.mxu0 %v4419_v33  ;;  %v1030_v43 = vmul.f32 %v2969_v2, %v5355_v35  ;;  %v5356_v50 = vld [vmem:[#allocation31_spill] sm:$0xff]  ;;  %v1982_v35 = vld [vmem:[#allocation10 + $0x138] sm:$0xff] }
 0x204   : > { %1533 = vmatprep.mubr.f32.mxu1 %v4424_v8  ;;  %1741 = vmatpush2.msra.mxu1 %v1650_v30  ;;  %v1029_v7 = vmul.f32 %v2969_v2, %v5356_v50  ;;  %v4447_v30 = vadd.f32 %v4069_v63, %v1137_v47  ;;  %v1977_v50 = vld [vmem:[#allocation10 + $0x110] sm:$0xff] }
 0x205   : > { %2071 = vmatprep.subr.mxu0 %v1986_v17  ;;  %1432 = vmatmul.mubr.f32.gmra.mxu0 %v4428_v44  ;;  %v4450_v17 = vadd.f32 %v4077_v11, %v1102_v16  ;;  %v1105_v2 = vmul.f32 %v4066_v42, %v1030_v43  ;;  %v1644_v16 = vld [vmem:[#allocation8 + $0x110] sm:$0xff]  ;;  %v1979_v42 = vld [vmem:[#allocation10 + $0x120] sm:$0xff] }
 0x206   : > { %1534 = vmatmul.mubr.f32.gmra.mxu1 %v4432_v20  ;;  %1742 = vmatprep.subr.mxu1 %v1649_v56  ;;  %v1645_v56 = vld [vmem:[#allocation8 + $0x118] sm:$0xff]  ;;  %v1104_v47 = vmul.f32 %v4072_v62, %v1029_v7  ;;  %v1642_v62 = vld [vmem:[#allocation8 + $0x100] sm:$0xff]  ;;  %v1976_v7 = vld [vmem:[#allocation10 + $0x108] sm:$0xff] }
 0x207   : > { %2072 = vmatpush2.msra.mxu0 %v1985_v22  ;;  %1743 = vmatpush2.msra.mxu1 %v1648_v14  ;;  %v1981_v22 = vld [vmem:[#allocation10 + $0x130] sm:$0xff]  ;;  %v1980_v14 = vld [vmem:[#allocation10 + $0x128] sm:$0xff]  ;;  %v4462_v43 = vadd.f32 %v4069_v63, %v1105_v2  ;;  %v1975_v63 = vld [vmem:[#allocation10 + $0x100] sm:$0xff] }
 0x208   : > { %2073 = vmatprep.subr.mxu0 %v1984_v13  ;;  %1744 = vmatprep.subr.mxu1 %v1647_v23  ;;  %v4465_v13 = vadd.f32 %v4077_v11, %v1104_v47  ;;  %v1978_v23 = vld [vmem:[#allocation10 + $0x118] sm:$0xff]  ;;  %v5357_v11 = vld [vmem:[#allocation34_spill] sm:$0xff] }
 0x209   : > { %2074 = vmatpush2.msra.mxu0 %v1983_v38  ;;  %1437 = vmatprep.mubr.f32.mxu0 %v4442_v9  ;;  %v5373_v38 = vld [vmem:[#allocation40_spill] sm:$0xff] }
 0x20a   : > { %1539 = vmatprep.mubr.f32.mxu1 %v4447_v30  ;;  %1745 = vmatpush2.msra.mxu1 %v1646_v54 }
 0x20b   : > { %2075 = vmatprep.subr.mxu0 %v1982_v35  ;;  %1438 = vmatmul.mubr.f32.gmra.mxu0 %v4450_v17 }
 0x20c   : > { %1540 = vmatmul.mubr.f32.gmra.mxu1 %v4453_v0  ;;  %1746 = vmatprep.subr.mxu1 %v1645_v56 }
 0x20d   : > { %2076 = vmatpush2.msra.mxu0 %v1981_v22  ;;  %1747 = vmatpush2.msra.mxu1 %v1644_v16  ;;  %v5374_v16 = vld [vmem:[#allocation42_spill] sm:$0xff] }
 0x20e   : > { %1750 = vmatprep.mubr.f32.mxu1 %v4098_v45  ;;  %2077 = vmatprep.subr.mxu0 %v1980_v14 }
 0x20f   : > { %1748 = vmatprep.subr.mxu1 %v1643_v49  ;;  %2078 = vmatpush2.msra.mxu0 %v1979_v42  ;;  %v5375_v49 = vld [vmem:[#allocation21_spill] sm:$0xff] }
 0x210   : > { %1443 = vmatprep.mubr.f32.mxu0 %v4462_v43  ;;  %1749 = vmatpush2.msra.mxu1 %v1642_v62 }
 0x211   : > { %2079 = vmatprep.subr.mxu0 %v1978_v23  ;;  %1444 = vmatmul.mubr.f32.gmra.mxu0 %v4465_v13 }
 0x212   : > { %1751 = vmatmul.mubr.f32.vlgmr.msra.gmra.mxu1 %v4105_v28  ;;  %2080 = vmatpush2.msra.mxu0 %v1977_v50 }
 0x213   : > { %1756 = vmatprep.mubr.f32.mxu1 %v4120_v36  ;;  %2081 = vmatprep.subr.mxu0 %v1976_v7 }
 0x214   : > { %2083 = vmatprep.mubr.f32.mxu0 %v4098_v45  ;;  %2082 = vmatpush2.msra.mxu0 %v1975_v63  ;;  %v5358_v45 = vld [vmem:[#allocation33_spill] sm:$0xff] }
 0x215   : > { %2084 = vmatmul.mubr.f32.vlgmr.msra.gmra.mxu0 %v4105_v28  ;;  %v5359_v28 = vld [vmem:[#allocation36_spill] sm:$0xff] }
 0x216   : > { %1757 = vmatmul.mubr.f32.gmra.mxu1 %v4131_v40  ;;  %2089 = vmatprep.mubr.f32.mxu0 %v4120_v36  ;;  %v5360_v36 = vld [vmem:[#allocation35_spill] sm:$0xff] }
 0x217   : > { %1762 = vmatprep.mubr.f32.mxu1 %v4139_v51 }
 0x219   : > { %2090 = vmatmul.mubr.f32.gmra.mxu0 %v4131_v40  ;;  %v5361_v40 = vld [vmem:[#allocation48_spill] sm:$0xff] }
 0x21a   : > { %1763 = vmatmul.mubr.f32.gmra.mxu1 %v4156_v55  ;;  %2095 = vmatprep.mubr.f32.mxu0 %v4139_v51  ;;  %v5362_v51 = vld [vmem:[#allocation49_spill] sm:$0xff] }
 0x21b   : > { %1768 = vmatprep.mubr.f32.mxu1 %v4166_v24 }
 0x21d   : > { %2096 = vmatmul.mubr.f32.gmra.mxu0 %v4156_v55  ;;  %v5364_v55 = vld [vmem:[#allocation47_spill] sm:$0xff] }
 0x21e   : > { %1769 = vmatmul.mubr.f32.gmra.mxu1 %v4182_v5  ;;  %2101 = vmatprep.mubr.f32.mxu0 %v4166_v24 }
 0x21f   : > { %1774 = vmatprep.mubr.f32.mxu1 %v4195_v4 }
 0x221   : > { %2102 = vmatmul.mubr.f32.gmra.mxu0 %v4182_v5  ;;  %v5366_v5 = vld [vmem:[#allocation46_spill] sm:$0xff] }
 0x222   : > { %1775 = vmatmul.mubr.f32.gmra.mxu1 %v4209_v27  ;;  %2107 = vmatprep.mubr.f32.mxu0 %v4195_v4  ;;  %v5367_v4 = vld [vmem:[#allocation50_spill] sm:$0xff] }
 0x223   : > { %1780 = vmatprep.mubr.f32.mxu1 %v4222_v52 }
 0x225   : > { %2108 = vmatmul.mubr.f32.gmra.mxu0 %v4209_v27 }
 0x226   : > { %1781 = vmatmul.mubr.f32.gmra.mxu1 %v4235_v18  ;;  %2113 = vmatprep.mubr.f32.mxu0 %v4222_v52  ;;  %v5368_v52 = vld [vmem:[#allocation51_spill] sm:$0xff] }
 0x227   : > { %1786 = vmatprep.mubr.f32.mxu1 %v4250_v25 }
 0x229   : > { %2114 = vmatmul.mubr.f32.gmra.mxu0 %v4235_v18 }
 0x22a   : > { %1787 = vmatmul.mubr.f32.gmra.mxu1 %v4260_v19  ;;  %2119 = vmatprep.mubr.f32.mxu0 %v4250_v25 }
 0x22b   : > { %1792 = vmatprep.mubr.f32.mxu1 %v4275_v48 }
 0x22d   : > { %2120 = vmatmul.mubr.f32.gmra.mxu0 %v4260_v19 }
 0x22e   : > { %1793 = vmatmul.mubr.f32.gmra.mxu1 %v4284_v32  ;;  %2125 = vmatprep.mubr.f32.mxu0 %v4275_v48 }
 0x22f   : > { %1798 = vmatprep.mubr.f32.mxu1 %v4299_v60 }
 0x231   : > { %2126 = vmatmul.mubr.f32.gmra.mxu0 %v4284_v32  ;;  %v5370_v32 = vld [vmem:[#allocation39_spill] sm:$0xff] }
 0x232   : > { %1799 = vmatmul.mubr.f32.gmra.mxu1 %v4308_v6  ;;  %2131 = vmatprep.mubr.f32.mxu0 %v4299_v60 }
 0x233   : > { %1804 = vmatprep.mubr.f32.mxu1 %v4323_v31 }
 0x235   : > { %2132 = vmatmul.mubr.f32.gmra.mxu0 %v4308_v6 }
 0x236   : > { %1805 = vmatmul.mubr.f32.gmra.mxu1 %v4332_v26  ;;  %2137 = vmatprep.mubr.f32.mxu0 %v4323_v31  ;;  %v5371_v31 = vld [vmem:[#allocation41_spill] sm:$0xff] }
 0x237   : > { %1810 = vmatprep.mubr.f32.mxu1 %v4347_v3 }
 0x239   : > { %2138 = vmatmul.mubr.f32.gmra.mxu0 %v4332_v26 }
 0x23a   : > { %1811 = vmatmul.mubr.f32.gmra.mxu1 %v4356_v53  ;;  %2143 = vmatprep.mubr.f32.mxu0 %v4347_v3 }
 0x23b   : > { %1816 = vmatprep.mubr.f32.mxu1 %v4371_v29 }
 0x23d   : > { %2144 = vmatmul.mubr.f32.gmra.mxu0 %v4356_v53 }
 0x23e   : > { %1817 = vmatmul.mubr.f32.gmra.mxu1 %v4380_v58  ;;  %2149 = vmatprep.mubr.f32.mxu0 %v4371_v29 }
 0x23f   : > { %1822 = vmatprep.mubr.f32.mxu1 %v4395_v21 }
 0x241   : > { %2150 = vmatmul.mubr.f32.gmra.mxu0 %v4380_v58 }
 0x242   : > { %1823 = vmatmul.mubr.f32.gmra.mxu1 %v4404_v37  ;;  %2155 = vmatprep.mubr.f32.mxu0 %v4395_v21  ;;  %v5372_v21 = vld [vmem:[#allocation43_spill] sm:$0xff] }
 0x243   : > { %1828 = vmatprep.mubr.f32.mxu1 %v4419_v33 }
 0x245   : > { %2156 = vmatmul.mubr.f32.gmra.mxu0 %v4404_v37 }
 0x246   : > { %1829 = vmatmul.mubr.f32.gmra.mxu1 %v4428_v44  ;;  %2161 = vmatprep.mubr.f32.mxu0 %v4419_v33 }
 0x247   : > { %1834 = vmatprep.mubr.f32.mxu1 %v4442_v9 }
 0x249   : > { %2162 = vmatmul.mubr.f32.gmra.mxu0 %v4428_v44 }
 0x24a   : > { %1835 = vmatmul.mubr.f32.gmra.mxu1 %v4450_v17  ;;  %2167 = vmatprep.mubr.f32.mxu0 %v4442_v9 }
 0x24b   : > { %1840 = vmatprep.mubr.f32.mxu1 %v4462_v43 }
 0x24d   : > { %2168 = vmatmul.mubr.f32.gmra.mxu0 %v4450_v17 }
 0x24e   : > { %1841 = vmatmul.mubr.f32.gmra.mxu1 %v4465_v13  ;;  %2173 = vmatprep.mubr.f32.mxu0 %v4462_v43 }
 0x24f   : > { %1846 = vmatprep.mubr.f32.mxu1 %v5357_v11 }
 0x251   : > { %2174 = vmatmul.mubr.f32.gmra.mxu0 %v4465_v13 }
 0x252   : > { %1847 = vmatmul.mubr.f32.gmra.mxu1 %v5358_v45  ;;  %2179 = vmatprep.mubr.f32.mxu0 %v5357_v11 }
 0x253   : > { %1852 = vmatprep.mubr.f32.mxu1 %v5359_v28 }
 0x255   : > { %2180 = vmatmul.mubr.f32.gmra.mxu0 %v5358_v45 }
 0x256   : > { %1853 = vmatmul.mubr.f32.gmra.mxu1 %v4108_v39  ;;  %2185 = vmatprep.mubr.f32.mxu0 %v5359_v28 }
 0x257   : > { %1858 = vmatprep.mubr.f32.mxu1 %v5360_v36 }
 0x259   : > { %2186 = vmatmul.mubr.f32.gmra.mxu0 %v4108_v39  ;;  %v1277_v39 = vld [vmem:[%s5148_s4] sm:$0x3] }
 0x25a   : > { %1859 = vmatmul.mubr.f32.gmra.mxu1 %v5361_v40  ;;  %2191 = vmatprep.mubr.f32.mxu0 %v5360_v36  ;;  %v4569_v24 = vrot.slane %v1277_v39, %v5364_v55 }
 0x25b   : > { %1864 = vmatprep.mubr.f32.mxu1 %v4151_v46 }
 0x25d   : > { %2192 = vmatmul.mubr.f32.gmra.mxu0 %v5361_v40 }
 0x25e   : > { %1865 = vmatmul.mubr.f32.gmra.mxu1 %v5362_v51  ;;  %2197 = vmatprep.mubr.f32.mxu0 %v4151_v46  ;;  %v5363_v46 = vld [vmem:[#allocation37_spill] sm:$0xff] }
 0x25f   : > { %1870 = vmatprep.mubr.f32.mxu1 %v4178_v41 }
 0x261   : > { %2198 = vmatmul.mubr.f32.gmra.mxu0 %v5362_v51 }
 0x262   : > { %1871 = vmatmul.mubr.f32.gmra.mxu1 %v4189_v59  ;;  %2203 = vmatprep.mubr.f32.mxu0 %v4178_v41  ;;  %v5365_v41 = vld [vmem:[#allocation38_spill] sm:$0xff] }
 0x263   : > { %1876 = vmatprep.mubr.f32.mxu1 %v4205_v34 }
 0x265   : > { %2204 = vmatmul.mubr.f32.gmra.mxu0 %v4189_v59  ;;  %v4575_v59 = vrot.slane %v1277_v39, %v5366_v5 }
 0x266   : > { %1877 = vmatmul.mubr.f32.gmra.mxu1 %v4213_v57  ;;  %2209 = vmatprep.mubr.f32.mxu0 %v4205_v34 }
 0x267   : > { %1882 = vmatprep.mubr.f32.mxu1 %v4231_v61 }
 0x269   : > { %2210 = vmatmul.mubr.f32.gmra.mxu0 %v4213_v57 }
 0x26a   : > { %1883 = vmatmul.mubr.f32.gmra.mxu1 %v4239_v10  ;;  %2215 = vmatprep.mubr.f32.mxu0 %v4231_v61 }
 0x26b   : > { %1888 = vmatprep.mubr.f32.mxu1 %v4256_v1 }
 0x26d   : > { %2216 = vmatmul.mubr.f32.gmra.mxu0 %v4239_v10  ;;  %v5369_v10 = vld [vmem:[#allocation52_spill] sm:$0xff] }
 0x26e   : > { %1889 = vmatmul.mubr.f32.gmra.mxu1 %v4264_v12  ;;  %2221 = vmatprep.mubr.f32.mxu0 %v4256_v1 }
 0x26f   : > { %1894 = vmatprep.mubr.f32.mxu1 %v5363_v46 }
 0x271   : > { %2222 = vmatmul.mubr.f32.gmra.mxu0 %v4264_v12 }
 0x272   : > { %1895 = vmatmul.mubr.f32.gmra.mxu1 %v5365_v41  ;;  %2227 = vmatprep.mubr.f32.mxu0 %v5363_v46 }
 0x273   : > { %1900 = vmatprep.mubr.f32.mxu1 %v5367_v4  ;;  %v1451_v34 = vpop.f32.mrf.mxu1 }
 0x274   : > { %v1452_v27 = vadd.f32 %v1451_v34, %v4569_v24 }
 0x275   : > { %2228 = vmatmul.mubr.f32.gmra.mxu0 %v5365_v41  ;;  %v1453_v57 = vpop.f32.mrf.mxu1 }
 0x276   : > { %1901 = vmatmul.mubr.f32.gmra.mxu1 %v5368_v52  ;;  %2233 = vmatprep.mubr.f32.mxu0 %v5367_v4  ;;  %v1578_v61 = vmul.f32 0.088388346, %v1452_v27  ;;  %v1454_v18 = vadd.f32 %v1453_v57, %v4575_v59 }
 0x277   : > { %1906 = vmatprep.mubr.f32.mxu1 %v5369_v10  ;;  %v1355_v25 = vpop.f32.mrf.mxu0 }
 0x278   : > { %2308 = vst [vmem:[%s4585_s28 + $0x100] sm:$0xff] %v1578_v61  ;;  %v1579_v1 = vmul.f32 0.088388346, %v1454_v18  ;;  %v1356_v19 = vadd.f32 %v1355_v25, %v4569_v24  ;;  %v1457_v12 = vpop.f32.mrf.mxu1 }
 0x279   : > { %2234 = vmatmul.mubr.f32.gmra.mxu0 %v5368_v52  ;;  %v1458_v48 = vadd.f32 %v1457_v12, %v4569_v24  ;;  %v1357_v44 = vpop.f32.mrf.mxu0 }
 0x27a   : > { %1907 = vmatmul.mubr.f32.gmra.mxu1 %v5370_v32  ;;  %2239 = vmatprep.mubr.f32.mxu0 %v5369_v10  ;;  %2309 = vst [vmem:[%s4585_s28 + $0x108] sm:$0xff] %v1579_v1  ;;  %v1546_v37 = vmul.f32 0.088388346, %v1356_v19  ;;  %v1358_v60 = vadd.f32 %v1357_v44, %v4575_v59  ;;  %v1459_v6 = vpop.f32.mrf.mxu1 }
 0x27b   : > { %1912 = vmatprep.mubr.f32.mxu1 %v5371_v31  ;;  %v1580_v26 = vmul.f32 0.088388346, %v1458_v48  ;;  %v1460_v3 = vadd.f32 %v1459_v6, %v4575_v59 }
 0x27c   : > { %2276 = vst [vmem:[%s4585_s28] sm:$0xff] %v1546_v37  ;;  %v1547_v53 = vmul.f32 0.088388346, %v1358_v60 }
 0x27d   : > { %2240 = vmatmul.mubr.f32.gmra.mxu0 %v5370_v32  ;;  %2310 = vst [vmem:[%s4585_s28 + $0x110] sm:$0xff] %v1580_v26  ;;  %v1581_v29 = vmul.f32 0.088388346, %v1460_v3  ;;  %v1361_v58 = vpop.f32.mrf.mxu0 }
 0x27e   : > { %1913 = vmatmul.mubr.f32.gmra.mxu1 %v5372_v21  ;;  %2245 = vmatprep.mubr.f32.mxu0 %v5371_v31  ;;  %2277 = vst [vmem:[%s4585_s28 + $0x8] sm:$0xff] %v1547_v53  ;;  %v1362_v33 = vadd.f32 %v1361_v58, %v4569_v24  ;;  %v1463_v9 = vpop.f32.mrf.mxu1 }
 0x27f   : > { %1918 = vmatprep.mubr.f32.mxu1 %v5373_v38  ;;  %2311 = vst [vmem:[%s4585_s28 + $0x118] sm:$0xff] %v1581_v29  ;;  %v1464_v54 = vadd.f32 %v1463_v9, %v4569_v24  ;;  %v1363_v17 = vpop.f32.mrf.mxu0 }
 0x280   : > { %v1548_v35 = vmul.f32 0.088388346, %v1362_v33  ;;  %v1364_v2 = vadd.f32 %v1363_v17, %v4575_v59  ;;  %v1465_v56 = vpop.f32.mrf.mxu1 }
 0x281   : > { %2246 = vmatmul.mubr.f32.gmra.mxu0 %v5372_v21  ;;  %v1582_v47 = vmul.f32 0.088388346, %v1464_v54  ;;  %v1466_v22 = vadd.f32 %v1465_v56, %v4575_v59 }
 0x282   : > { %1919 = vmatmul.mubr.f32.gmra.mxu1 %v5374_v16  ;;  %2251 = vmatprep.mubr.f32.mxu0 %v5373_v38  ;;  %2278 = vst [vmem:[%s4585_s28 + $0x10] sm:$0xff] %v1548_v35  ;;  %v1549_v14 = vmul.f32 0.088388346, %v1364_v2 }
 0x283   : > { %1924 = vmatprep.mubr.f32.mxu1 %v5375_v49  ;;  %2312 = vst [vmem:[%s4585_s28 + $0x120] sm:$0xff] %v1582_v47  ;;  %v1583_v42 = vmul.f32 0.088388346, %v1466_v22  ;;  %v1367_v43 = vpop.f32.mrf.mxu0 }
 0x284   : > { %2279 = vst [vmem:[%s4585_s28 + $0x18] sm:$0xff] %v1549_v14  ;;  %v1368_v62 = vadd.f32 %v1367_v43, %v4569_v24  ;;  %v1469_v13 = vpop.f32.mrf.mxu1 }
 0x285   : > { %2252 = vmatmul.mubr.f32.gmra.mxu0 %v5374_v16  ;;  %2313 = vst [vmem:[%s4585_s28 + $0x128] sm:$0xff] %v1583_v42  ;;  %v1470_v23 = vadd.f32 %v1469_v13, %v4569_v24  ;;  %v1369_v50 = vpop.f32.mrf.mxu0 }
 0x286   : > { %1925 = vmatmul.mubr.f32.gmra.mxu1 %v4408_v15  ;;  %2257 = vmatprep.mubr.f32.mxu0 %v5375_v49  ;;  %v1550_v7 = vmul.f32 0.088388346, %v1368_v62  ;;  %v1370_v63 = vadd.f32 %v1369_v50, %v4575_v59  ;;  %v1471_v11 = vpop.f32.mrf.mxu1 }
 0x287   : > { %1930 = vmatprep.mubr.f32.mxu1 %v4424_v8  ;;  %v1584_v45 = vmul.f32 0.088388346, %v1470_v23  ;;  %v1472_v28 = vadd.f32 %v1471_v11, %v4575_v59 }
 0x288   : > { %2280 = vst [vmem:[%s4585_s28 + $0x20] sm:$0xff] %v1550_v7  ;;  %v1551_v36 = vmul.f32 0.088388346, %v1370_v63 }
 0x289   : > { %2258 = vmatmul.mubr.f32.gmra.mxu0 %v4408_v15  ;;  %2314 = vst [vmem:[%s4585_s28 + $0x130] sm:$0xff] %v1584_v45  ;;  %v1585_v40 = vmul.f32 0.088388346, %v1472_v28  ;;  %v1373_v51 = vpop.f32.mrf.mxu0 }
 0x28a   : > { %1931 = vmatmul.mubr.f32.gmra.mxu1 %v4432_v20  ;;  %2263 = vmatprep.mubr.f32.mxu0 %v4424_v8  ;;  %2281 = vst [vmem:[%s4585_s28 + $0x28] sm:$0xff] %v1551_v36  ;;  %v1374_v39 = vadd.f32 %v1373_v51, %v4569_v24  ;;  %v1475_v46 = vpop.f32.mrf.mxu1 }
 0x28b   : > { %1936 = vmatprep.mubr.f32.mxu1 %v4447_v30  ;;  %2315 = vst [vmem:[%s4585_s28 + $0x138] sm:$0xff] %v1585_v40  ;;  %v1476_v41 = vadd.f32 %v1475_v46, %v4569_v24  ;;  %v1375_v15 = vpop.f32.mrf.mxu0 }
 0x28c   : > { %v1552_v4 = vmul.f32 0.088388346, %v1374_v39  ;;  %v1376_v34 = vadd.f32 %v1375_v15, %v4575_v59  ;;  %v1477_v27 = vpop.f32.mrf.mxu1 }
 0x28d   : > { %2264 = vmatmul.mubr.f32.gmra.mxu0 %v4432_v20  ;;  %v1586_v8 = vmul.f32 0.088388346, %v1476_v41  ;;  %v1478_v57 = vadd.f32 %v1477_v27, %v4575_v59 }
 0x28e   : > { %1937 = vmatmul.mubr.f32.gmra.mxu1 %v4453_v0  ;;  %2269 = vmatprep.mubr.f32.mxu0 %v4447_v30  ;;  %2282 = vst [vmem:[%s4585_s28 + $0x30] sm:$0xff] %v1552_v4  ;;  %v1553_v52 = vmul.f32 0.088388346, %v1376_v34 }
 0x28f   : > { %2316 = vst [vmem:[%s4585_s28 + $0x140] sm:$0xff] %v1586_v8  ;;  %v1587_v61 = vmul.f32 0.088388346, %v1478_v57  ;;  %v1379_v18 = vpop.f32.mrf.mxu0 }
 0x290   : > { %2283 = vst [vmem:[%s4585_s28 + $0x38] sm:$0xff] %v1553_v52  ;;  %v1380_v10 = vadd.f32 %v1379_v18, %v4569_v24  ;;  %v1481_v25 = vpop.f32.mrf.mxu1 }
 0x291   : > { %2270 = vmatmul.mubr.f32.gmra.mxu0 %v4453_v0  ;;  %2317 = vst [vmem:[%s4585_s28 + $0x148] sm:$0xff] %v1587_v61  ;;  %v1482_v20 = vadd.f32 %v1481_v25, %v4569_v24  ;;  %v1381_v1 = vpop.f32.mrf.mxu0 }
 0x292   : > { %v1554_v30 = vmul.f32 0.088388346, %v1380_v10  ;;  %v1382_v19 = vadd.f32 %v1381_v1, %v4575_v59  ;;  %v1483_v12 = vpop.f32.mrf.mxu1 }
 0x293   : > { %v1588_v48 = vmul.f32 0.088388346, %v1482_v20  ;;  %v1484_v44 = vadd.f32 %v1483_v12, %v4575_v59 }
 0x294   : > { %2284 = vst [vmem:[%s4585_s28 + $0x40] sm:$0xff] %v1554_v30  ;;  %v1555_v32 = vmul.f32 0.088388346, %v1382_v19 }
 0x295   : > { %2318 = vst [vmem:[%s4585_s28 + $0x150] sm:$0xff] %v1588_v48  ;;  %v1589_v37 = vmul.f32 0.088388346, %v1484_v44  ;;  %v1385_v60 = vpop.f32.mrf.mxu0 }
 0x296   : > { %2285 = vst [vmem:[%s4585_s28 + $0x48] sm:$0xff] %v1555_v32  ;;  %v1386_v0 = vadd.f32 %v1385_v60, %v4569_v24  ;;  %v1487_v6 = vpop.f32.mrf.mxu1 }
 0x297   : > { %2319 = vst [vmem:[%s4585_s28 + $0x158] sm:$0xff] %v1589_v37  ;;  %v1488_v31 = vadd.f32 %v1487_v6, %v4569_v24  ;;  %v1387_v26 = vpop.f32.mrf.mxu0 }
 0x298   : > { %v1556_v3 = vmul.f32 0.088388346, %v1386_v0  ;;  %v1388_v53 = vadd.f32 %v1387_v26, %v4575_v59  ;;  %v1489_v29 = vpop.f32.mrf.mxu1 }
 0x299   : > { %v1590_v58 = vmul.f32 0.088388346, %v1488_v31  ;;  %v1490_v21 = vadd.f32 %v1489_v29, %v4575_v59 }
 0x29a   : > { %2286 = vst [vmem:[%s4585_s28 + $0x50] sm:$0xff] %v1556_v3  ;;  %v1557_v33 = vmul.f32 0.088388346, %v1388_v53 }
 0x29b   : > { %2320 = vst [vmem:[%s4585_s28 + $0x160] sm:$0xff] %v1590_v58  ;;  %v1591_v9 = vmul.f32 0.088388346, %v1490_v21  ;;  %v1391_v38 = vpop.f32.mrf.mxu0 }
 0x29c   : > { %2287 = vst [vmem:[%s4585_s28 + $0x58] sm:$0xff] %v1557_v33  ;;  %v1392_v54 = vadd.f32 %v1391_v38, %v4569_v24  ;;  %v1493_v17 = vpop.f32.mrf.mxu1 }
 0x29d   : > { %2321 = vst [vmem:[%s4585_s28 + $0x168] sm:$0xff] %v1591_v9  ;;  %v1494_v35 = vadd.f32 %v1493_v17, %v4569_v24  ;;  %v1393_v2 = vpop.f32.mrf.mxu0 }
 0x29e   : > { %v1558_v56 = vmul.f32 0.088388346, %v1392_v54  ;;  %v1394_v47 = vadd.f32 %v1393_v2, %v4575_v59  ;;  %v1495_v22 = vpop.f32.mrf.mxu1 }
 0x29f   : > { %v1592_v16 = vmul.f32 0.088388346, %v1494_v35  ;;  %v1496_v14 = vadd.f32 %v1495_v22, %v4575_v59 }
 0x2a0   : > { %2288 = vst [vmem:[%s4585_s28 + $0x60] sm:$0xff] %v1558_v56  ;;  %v1559_v49 = vmul.f32 0.088388346, %v1394_v47 }
 0x2a1   : > { %2322 = vst [vmem:[%s4585_s28 + $0x170] sm:$0xff] %v1592_v16  ;;  %v1593_v42 = vmul.f32 0.088388346, %v1496_v14  ;;  %v1397_v43 = vpop.f32.mrf.mxu0 }
 0x2a2   : > { %2289 = vst [vmem:[%s4585_s28 + $0x68] sm:$0xff] %v1559_v49  ;;  %v1398_v62 = vadd.f32 %v1397_v43, %v4569_v24  ;;  %v1499_v13 = vpop.f32.mrf.mxu1 }
 0x2a3   : > { %2323 = vst [vmem:[%s4585_s28 + $0x178] sm:$0xff] %v1593_v42  ;;  %v1500_v23 = vadd.f32 %v1499_v13, %v4569_v24  ;;  %v1399_v50 = vpop.f32.mrf.mxu0 }
 0x2a4   : > { %v1560_v7 = vmul.f32 0.088388346, %v1398_v62  ;;  %v1400_v63 = vadd.f32 %v1399_v50, %v4575_v59  ;;  %v1501_v11 = vpop.f32.mrf.mxu1 }
 0x2a5   : > { %v1594_v45 = vmul.f32 0.088388346, %v1500_v23  ;;  %v1502_v28 = vadd.f32 %v1501_v11, %v4575_v59 }
 0x2a6   : > { %2290 = vst [vmem:[%s4585_s28 + $0x70] sm:$0xff] %v1560_v7  ;;  %v1561_v36 = vmul.f32 0.088388346, %v1400_v63 }
 0x2a7   : > { %2324 = vst [vmem:[%s4585_s28 + $0x180] sm:$0xff] %v1594_v45  ;;  %v1595_v40 = vmul.f32 0.088388346, %v1502_v28  ;;  %v1403_v51 = vpop.f32.mrf.mxu0 }
 0x2a8   : > { %2291 = vst [vmem:[%s4585_s28 + $0x78] sm:$0xff] %v1561_v36  ;;  %v1404_v39 = vadd.f32 %v1403_v51, %v4569_v24  ;;  %v1505_v46 = vpop.f32.mrf.mxu1 }
 0x2a9   : > { %2325 = vst [vmem:[%s4585_s28 + $0x188] sm:$0xff] %v1595_v40  ;;  %v1506_v41 = vadd.f32 %v1505_v46, %v4569_v24  ;;  %v1405_v15 = vpop.f32.mrf.mxu0 }
 0x2aa   : > { %v1562_v4 = vmul.f32 0.088388346, %v1404_v39  ;;  %v1406_v34 = vadd.f32 %v1405_v15, %v4575_v59  ;;  %v1507_v27 = vpop.f32.mrf.mxu1 }
 0x2ab   : > { %v1596_v8 = vmul.f32 0.088388346, %v1506_v41  ;;  %v1508_v57 = vadd.f32 %v1507_v27, %v4575_v59 }
 0x2ac   : > { %2292 = vst [vmem:[%s4585_s28 + $0x80] sm:$0xff] %v1562_v4  ;;  %v1563_v52 = vmul.f32 0.088388346, %v1406_v34 }
 0x2ad   : > { %2326 = vst [vmem:[%s4585_s28 + $0x190] sm:$0xff] %v1596_v8  ;;  %v1597_v61 = vmul.f32 0.088388346, %v1508_v57  ;;  %v1409_v18 = vpop.f32.mrf.mxu0 }
 0x2ae   : > { %2293 = vst [vmem:[%s4585_s28 + $0x88] sm:$0xff] %v1563_v52  ;;  %v1410_v10 = vadd.f32 %v1409_v18, %v4569_v24  ;;  %v1511_v25 = vpop.f32.mrf.mxu1 }
 0x2af   : > { %2327 = vst [vmem:[%s4585_s28 + $0x198] sm:$0xff] %v1597_v61  ;;  %v1512_v20 = vadd.f32 %v1511_v25, %v4569_v24  ;;  %v1411_v1 = vpop.f32.mrf.mxu0 }
 0x2b0   : > { %v1564_v30 = vmul.f32 0.088388346, %v1410_v10  ;;  %v1412_v19 = vadd.f32 %v1411_v1, %v4575_v59  ;;  %v1513_v12 = vpop.f32.mrf.mxu1 }
 0x2b1   : > { %v1598_v48 = vmul.f32 0.088388346, %v1512_v20  ;;  %v1514_v44 = vadd.f32 %v1513_v12, %v4575_v59  ;;  %v1674_v20 = vld [vmem:[%s5150_s6] sm:$0x3] }
 0x2b2   : > { %2294 = vst [vmem:[%s4585_s28 + $0x90] sm:$0xff] %v1564_v30  ;;  %v1565_v32 = vmul.f32 0.088388346, %v1412_v19 }
 0x2b3   : > { %2328 = vst [vmem:[%s4585_s28 + $0x1a0] sm:$0xff] %v1598_v48  ;;  %v1599_v37 = vmul.f32 0.088388346, %v1514_v44  ;;  %v1415_v60 = vpop.f32.mrf.mxu0 }
 0x2b4   : > { %2295 = vst [vmem:[%s4585_s28 + $0x98] sm:$0xff] %v1565_v32  ;;  %v1416_v0 = vadd.f32 %v1415_v60, %v4569_v24  ;;  %v1517_v6 = vpop.f32.mrf.mxu1  ;;  %v2007_v60 = vld [vmem:[%s5152_s8] sm:$0x3] }
 0x2b5   : > { %2329 = vst [vmem:[%s4585_s28 + $0x1a8] sm:$0xff] %v1599_v37  ;;  %v1518_v31 = vadd.f32 %v1517_v6, %v4569_v24  ;;  %v1417_v26 = vpop.f32.mrf.mxu0  ;;  %v4733_v37 = vrot.slane %v1674_v20, %v5364_v55 }
 0x2b6   : > { %v1566_v3 = vmul.f32 0.088388346, %v1416_v0  ;;  %v1418_v53 = vadd.f32 %v1417_v26, %v4575_v59  ;;  %v1519_v29 = vpop.f32.mrf.mxu1  ;;  %v4741_v26 = vrot.slane %v1674_v20, %v5366_v5 }
 0x2b7   : > { %v1600_v58 = vmul.f32 0.088388346, %v1518_v31  ;;  %v1520_v21 = vadd.f32 %v1519_v29, %v4575_v59  ;;  %v4746_v29 = vrot.slane %v2007_v60, %v5364_v55 }
 0x2b8   : > { %2296 = vst [vmem:[%s4585_s28 + $0xa0] sm:$0xff] %v1566_v3  ;;  %v1567_v33 = vmul.f32 0.088388346, %v1418_v53 }
 0x2b9   : > { %2330 = vst [vmem:[%s4585_s28 + $0x1b0] sm:$0xff] %v1600_v58  ;;  %v1601_v9 = vmul.f32 0.088388346, %v1520_v21  ;;  %v1421_v38 = vpop.f32.mrf.mxu0 }
 0x2ba   : > { %2297 = vst [vmem:[%s4585_s28 + $0xa8] sm:$0xff] %v1567_v33  ;;  %v1422_v54 = vadd.f32 %v1421_v38, %v4569_v24  ;;  %v1523_v17 = vpop.f32.mrf.mxu1 }
 0x2bb   : > { %2331 = vst [vmem:[%s4585_s28 + $0x1b8] sm:$0xff] %v1601_v9  ;;  %v1524_v35 = vadd.f32 %v1523_v17, %v4569_v24  ;;  %v1423_v2 = vpop.f32.mrf.mxu0 }
 0x2bc   : > { %v1568_v56 = vmul.f32 0.088388346, %v1422_v54  ;;  %v1424_v47 = vadd.f32 %v1423_v2, %v4575_v59  ;;  %v1525_v22 = vpop.f32.mrf.mxu1  ;;  %v4752_v54 = vrot.slane %v2007_v60, %v5366_v5 }
 0x2bd   : > { %v1602_v16 = vmul.f32 0.088388346, %v1524_v35  ;;  %v1526_v14 = vadd.f32 %v1525_v22, %v4575_v59 }
 0x2be   : > { %2298 = vst [vmem:[%s4585_s28 + $0xb0] sm:$0xff] %v1568_v56  ;;  %v1569_v49 = vmul.f32 0.088388346, %v1424_v47 }
 0x2bf   : > { %2332 = vst [vmem:[%s4585_s28 + $0x1c0] sm:$0xff] %v1602_v16  ;;  %v1603_v42 = vmul.f32 0.088388346, %v1526_v14  ;;  %v1427_v43 = vpop.f32.mrf.mxu0 }
 0x2c0   : > { %2299 = vst [vmem:[%s4585_s28 + $0xb8] sm:$0xff] %v1569_v49  ;;  %v1428_v62 = vadd.f32 %v1427_v43, %v4569_v24  ;;  %v1529_v13 = vpop.f32.mrf.mxu1 }
 0x2c1   : > { %2333 = vst [vmem:[%s4585_s28 + $0x1c8] sm:$0xff] %v1603_v42  ;;  %v1530_v23 = vadd.f32 %v1529_v13, %v4569_v24  ;;  %v1429_v50 = vpop.f32.mrf.mxu0 }
 0x2c2   : > { %v1570_v7 = vmul.f32 0.088388346, %v1428_v62  ;;  %v1430_v63 = vadd.f32 %v1429_v50, %v4575_v59  ;;  %v1531_v11 = vpop.f32.mrf.mxu1 }
 0x2c3   : > { %v1604_v45 = vmul.f32 0.088388346, %v1530_v23  ;;  %v1532_v28 = vadd.f32 %v1531_v11, %v4575_v59 }
 0x2c4   : > { %2300 = vst [vmem:[%s4585_s28 + $0xc0] sm:$0xff] %v1570_v7  ;;  %v1571_v36 = vmul.f32 0.088388346, %v1430_v63 }
 0x2c5   : > { %2334 = vst [vmem:[%s4585_s28 + $0x1d0] sm:$0xff] %v1604_v45  ;;  %v1605_v40 = vmul.f32 0.088388346, %v1532_v28  ;;  %v1433_v51 = vpop.f32.mrf.mxu0 }
 0x2c6   : > { %2301 = vst [vmem:[%s4585_s28 + $0xc8] sm:$0xff] %v1571_v36  ;;  %v1434_v39 = vadd.f32 %v1433_v51, %v4569_v24  ;;  %v1535_v46 = vpop.f32.mrf.mxu1 }
 0x2c7   : > { %2335 = vst [vmem:[%s4585_s28 + $0x1d8] sm:$0xff] %v1605_v40  ;;  %v1536_v41 = vadd.f32 %v1535_v46, %v4569_v24  ;;  %v1435_v15 = vpop.f32.mrf.mxu0 }
 0x2c8   : > { %v1572_v4 = vmul.f32 0.088388346, %v1434_v39  ;;  %v1436_v34 = vadd.f32 %v1435_v15, %v4575_v59  ;;  %v1537_v27 = vpop.f32.mrf.mxu1 }
 0x2c9   : > { %v1606_v8 = vmul.f32 0.088388346, %v1536_v41  ;;  %v1538_v57 = vadd.f32 %v1537_v27, %v4575_v59 }
 0x2ca   : > { %2302 = vst [vmem:[%s4585_s28 + $0xd0] sm:$0xff] %v1572_v4  ;;  %v1573_v52 = vmul.f32 0.088388346, %v1436_v34 }
 0x2cb   : > { %2336 = vst [vmem:[%s4585_s28 + $0x1e0] sm:$0xff] %v1606_v8  ;;  %v1607_v61 = vmul.f32 0.088388346, %v1538_v57  ;;  %v1439_v18 = vpop.f32.mrf.mxu0 }
 0x2cc   : > { %2303 = vst [vmem:[%s4585_s28 + $0xd8] sm:$0xff] %v1573_v52  ;;  %v1440_v10 = vadd.f32 %v1439_v18, %v4569_v24  ;;  %v1541_v25 = vpop.f32.mrf.mxu1 }
 0x2cd   : > { %2337 = vst [vmem:[%s4585_s28 + $0x1e8] sm:$0xff] %v1607_v61  ;;  %v1542_v1 = vadd.f32 %v1541_v25, %v4569_v24  ;;  %v1441_v30 = vpop.f32.mrf.mxu0 }
 0x2ce   : > { %v1574_v19 = vmul.f32 0.088388346, %v1440_v10  ;;  %v1442_v12 = vadd.f32 %v1441_v30, %v4575_v59  ;;  %v1543_v48 = vpop.f32.mrf.mxu1 }
 0x2cf   : > { %v1608_v44 = vmul.f32 0.088388346, %v1542_v1  ;;  %v1544_v32 = vadd.f32 %v1543_v48, %v4575_v59 }
 0x2d0   : > { %2304 = vst [vmem:[%s4585_s28 + $0xe0] sm:$0xff] %v1574_v19  ;;  %v1575_v0 = vmul.f32 0.088388346, %v1442_v12 }
 0x2d1   : > { %2338 = vst [vmem:[%s4585_s28 + $0x1f0] sm:$0xff] %v1608_v44  ;;  %v1609_v6 = vmul.f32 0.088388346, %v1544_v32  ;;  %v1445_v31 = vpop.f32.mrf.mxu0 }
 0x2d2   : > { %2305 = vst [vmem:[%s4585_s28 + $0xe8] sm:$0xff] %v1575_v0  ;;  %v1446_v3 = vadd.f32 %v1445_v31, %v4569_v24  ;;  %v1752_v53 = vpop.f32.mrf.mxu1 }
 0x2d3   : > { %2339 = vst [vmem:[%s4585_s28 + $0x1f8] sm:$0xff] %v1609_v6  ;;  %v1753_v58 = vadd.f32 %v1752_v53, %v4733_v37  ;;  %v1447_v21 = vpop.f32.mrf.mxu0 }
 0x2d4   : > { %v1576_v33 = vmul.f32 0.088388346, %v1446_v3  ;;  %v1448_v9 = vadd.f32 %v1447_v21, %v4575_v59  ;;  %v1754_v38 = vpop.f32.mrf.mxu1 }
 0x2d5   : > { %2340 = vst [vmem:[%s4755_s5] sm:$0xff] %v1753_v58  ;;  %v1755_v55 = vadd.f32 %v1754_v38, %v4741_v26  ;;  %v2085_v24 = vpop.f32.mrf.mxu0 }
 0x2d6   : > { %2306 = vst [vmem:[%s4585_s28 + $0xf0] sm:$0xff] %v1576_v33  ;;  %v1577_v17 = vmul.f32 0.088388346, %v1448_v9  ;;  %v1758_v35 = vpop.f32.mrf.mxu1  ;;  %v2086_v2 = vadd.f32 %v2085_v24, %v4746_v29 }
 0x2d7   : > { %2341 = vst [vmem:[%s4755_s5 + $0x8] sm:$0xff] %v1755_v55  ;;  %v1759_v5 = vadd.f32 %v1758_v35, %v4733_v37  ;;  %v2087_v59 = vpop.f32.mrf.mxu0 }
 0x2d8   : > { %2307 = vst [vmem:[%s4585_s28 + $0xf8] sm:$0xff] %v1577_v17  ;;  %2404 = vst [vmem:[%s4765_s29] sm:$0xff] %v2086_v2  ;;  %v1760_v56 = vpop.f32.mrf.mxu1  ;;  %v2088_v47 = vadd.f32 %v2087_v59, %v4752_v54  ;;  %s3239_s28 = smov [#allocation11]  }
 0x2d9   : > { %2342 = vst [vmem:[%s4755_s5 + $0x10] sm:$0xff] %v1759_v5  ;;  %v1761_v22 = vadd.f32 %v1760_v56, %v4741_v26  ;;  %v2091_v16 = vpop.f32.mrf.mxu0  ;;  %s3106_s27 = sshll.u32 %s3239_s28, 4  ;;  %s3107_s27 = int_to_ptr.vmem [resolvable:$false] %s3106_s27 }
 0x2da   : > { %2405 = vst [vmem:[%s4765_s29 + $0x8] sm:$0xff] %v2088_v47  ;;  %v1764_v14 = vpop.f32.mrf.mxu1  ;;  %v2092_v49 = vadd.f32 %v2091_v16, %v4746_v29  ;;  %s3108_s26 = scalar_lea.vmem %s3107_s27, 16384  ;;  %p3109_p3 = scmp.lt.s32.totalorder %s4787_s23, %s3107_s27 }
 0x2db   : > { %2343 = vst [vmem:[%s4755_s5 + $0x18] sm:$0xff] %v1761_v22  ;;  %v1765_v42 = vadd.f32 %v1764_v14, %v4733_v37  ;;  %v2093_v43 = vpop.f32.mrf.mxu0  ;;  %p3110_p5 = scmp.lt.s32.totalorder %s3108_s26, %s3102_s12 }
 0x2dc   : > { %2406 = vst [vmem:[%s4765_s29 + $0x10] sm:$0xff] %v2092_v49  ;;  %v1766_v62 = vpop.f32.mrf.mxu1  ;;  %v2094_v13 = vadd.f32 %v2093_v43, %v4752_v54 }
 0x2dd   : > { %2344 = vst [vmem:[%s4755_s5 + $0x20] sm:$0xff] %v1765_v42  ;;  %v1767_v23 = vadd.f32 %v1766_v62, %v4741_v26  ;;  %v2097_v50 = vpop.f32.mrf.mxu0  ;;  %p3111_p7 = por %p3110_p5, %p3109_p3 }
 0x2df   : > { %p3112_p13 = pnand %p3111_p7, %p3105_p8 }
 0x2e1   : > { %3115 = shalt.err (!%p3112_p13)
}
 0x2e2   : > { %s3116_s13 = scalar_lea.hbm %s4782_s1, 8192  ;;  %s3120_s15 = scalar_lea.hbm %s5153_s9, 16384 }
 0x2e3   : > { %p3117_p10 = scmp.ne.s32.totalorder %s4782_s1, %s3116_s13  ;;  %p3121_p0 = scmp.lt.s32.totalorder %s4782_s1, %s5153_s9 }
 0x2e4   : > { %p3122_p1 = scmp.lt.s32.totalorder %s3120_s15, %s3116_s13 }
 0x2e5   : > { %p3118_p9 = pnand %p3117_p10, %p5376_p4 }
 0x2e6   : > { %p3123_p2 = por %p3122_p1, %p3121_p0 }
 0x2e7   : > { %p3119_p11 = pneg %p3118_p9 }
 0x2e9   : > { %p3124_p12 = pnand %p3123_p2, %p3119_p11 }
 0x2eb   : > { %3127 = shalt.err (!%p3124_p12)
}
 0x2ec   : > { %s5238_s12 = smov 256   ;;  %s3241_s27 = smov 16   ;;  %2407 = vst [vmem:[%s4765_s29 + $0x18] sm:$0xff] %v2094_v13  ;;  %v1770_v7 = vpop.f32.mrf.mxu1  ;;  %v2098_v63 = vadd.f32 %v2097_v50, %v4746_v29  ;;  %2345 = vst [vmem:[%s4755_s5 + $0x28] sm:$0xff] %v1767_v23  ;;  %v2099_v45 = vpop.f32.mrf.mxu0 }
 0x2ed   : > { %s5377_s25 = scalar_lea.sflag [#allocation4], %s3461_s7  ;;  %v1771_v11 = vadd.f32 %v1770_v7, %v4733_v37  ;;  %v2100_v36 = vadd.f32 %v2099_v45, %v4752_v54  ;;  %s2473_s7 = sand.u32 1, %s3325_s21  }
 0x2ee   : > { %2823 = dma.vmem_to_hbm [thread:$0]  (%p5376_p4), %s4787_s23, 8192, %s4782_s1, %s5377_s25, %s5238_s12, %s5238_s12, %s3241_s27   ;;  %v1772_v28 = vpop.f32.mrf.mxu1  ;;  %v2103_v51 = vpop.f32.mrf.mxu0 }
 0x2ef   : > { %2408 = vst [vmem:[%s4765_s29 + $0x20] sm:$0xff] %v2098_v63  ;;  %2346 = vst [vmem:[%s4755_s5 + $0x30] sm:$0xff] %v1771_v11  ;;  %v1773_v40 = vadd.f32 %v1772_v28, %v4741_v26  ;;  %v2104_v46 = vadd.f32 %v2103_v51, %v4746_v29  ;;  %s2510_s1 = sshll.u32 %s4755_s5, 4  ;;  %s2527_s23 = sshll.u32 %s4765_s29, 4  ;;  %s5058_s1 = int_to_ptr.vmem [resolvable:$true] %s2510_s1  ;;  %s5069_s23 = int_to_ptr.vmem [resolvable:$true] %s2527_s23 }
 0x2f0   : > { %2409 = vst [vmem:[%s4765_s29 + $0x28] sm:$0xff] %v2100_v36  ;;  %v1776_v39 = vpop.f32.mrf.mxu1  ;;  %v2105_v15 = vpop.f32.mrf.mxu0  ;;  %s5056_s13 = scalar_lea.hbm %s5154_s10, %s4770_s3  ;;  %s5067_s15 = scalar_lea.hbm %s5155_s11, %s4770_s3 }
 0x2f1   : > { %2347 = vst [vmem:[%s4755_s5 + $0x38] sm:$0xff] %v1773_v40  ;;  %v1777_v41 = vadd.f32 %v1776_v39, %v4733_v37  ;;  %2410 = vst [vmem:[%s4765_s29 + $0x30] sm:$0xff] %v2104_v46  ;;  %v2106_v34 = vadd.f32 %v2105_v15, %v4752_v54  ;;  %s5073_s28 = scalar_lea.sflag [#allocation13], %s2473_s7  ;;  %s3128_s25 = scalar_lea.vmem %s5058_s1, 8192 }
 0x2f2   : > { %v1778_v4 = vpop.f32.mrf.mxu1  ;;  %v2109_v8 = vpop.f32.mrf.mxu0  ;;  %p3129_p6 = scmp.ne.s32.totalorder %s5058_s1, %s3128_s25  ;;  %s3242_s21 = smov [#allocation12]  }
 0x2f3   : > { %2348 = vst [vmem:[%s4755_s5 + $0x40] sm:$0xff] %v1777_v41  ;;  %v1779_v27 = vadd.f32 %v1778_v4, %v4741_v26  ;;  %2411 = vst [vmem:[%s4765_s29 + $0x38] sm:$0xff] %v2106_v34  ;;  %v2110_v52 = vadd.f32 %v2109_v8, %v4746_v29 }
 0x2f4   : > { %v1782_v57 = vpop.f32.mrf.mxu1  ;;  %v2111_v18 = vpop.f32.mrf.mxu0  ;;  %p3130_p8 = pnand %p3129_p6, %p5376_p4 }
 0x2f5   : > { %2349 = vst [vmem:[%s4755_s5 + $0x48] sm:$0xff] %v1779_v27  ;;  %v1783_v61 = vadd.f32 %v1782_v57, %v4733_v37  ;;  %2412 = vst [vmem:[%s4765_s29 + $0x40] sm:$0xff] %v2110_v52  ;;  %v2112_v25 = vadd.f32 %v2111_v18, %v4752_v54 }
 0x2f6   : > { %v1784_v10 = vpop.f32.mrf.mxu1  ;;  %v2115_v1 = vpop.f32.mrf.mxu0  ;;  %p3131_p3 = pneg %p3130_p8 }
 0x2f7   : > { %2350 = vst [vmem:[%s4755_s5 + $0x50] sm:$0xff] %v1783_v61  ;;  %v1785_v20 = vadd.f32 %v1784_v10, %v4741_v26  ;;  %2413 = vst [vmem:[%s4765_s29 + $0x48] sm:$0xff] %v2112_v25  ;;  %v2116_v19 = vadd.f32 %v2115_v1, %v4746_v29 }
 0x2f8   : > { %v1788_v30 = vpop.f32.mrf.mxu1  ;;  %v2117_v48 = vpop.f32.mrf.mxu0 }
 0x2f9   : > { %2351 = vst [vmem:[%s4755_s5 + $0x58] sm:$0xff] %v1785_v20  ;;  %v1789_v12 = vadd.f32 %v1788_v30, %v4733_v37  ;;  %2414 = vst [vmem:[%s4765_s29 + $0x50] sm:$0xff] %v2116_v19  ;;  %v2118_v32 = vadd.f32 %v2117_v48, %v4752_v54 }
 0x2fa   : > { %v1790_v44 = vpop.f32.mrf.mxu1  ;;  %v2121_v0 = vpop.f32.mrf.mxu0 }
 0x2fb   : > { %2352 = vst [vmem:[%s4755_s5 + $0x60] sm:$0xff] %v1789_v12  ;;  %v1791_v60 = vadd.f32 %v1790_v44, %v4741_v26  ;;  %2415 = vst [vmem:[%s4765_s29 + $0x58] sm:$0xff] %v2118_v32  ;;  %v2122_v31 = vadd.f32 %v2121_v0, %v4746_v29 }
 0x2fc   : > { %v1794_v6 = vpop.f32.mrf.mxu1  ;;  %v2123_v53 = vpop.f32.mrf.mxu0 }
 0x2fd   : > { %2353 = vst [vmem:[%s4755_s5 + $0x68] sm:$0xff] %v1791_v60  ;;  %v1795_v3 = vadd.f32 %v1794_v6, %v4733_v37  ;;  %2416 = vst [vmem:[%s4765_s29 + $0x60] sm:$0xff] %v2122_v31  ;;  %v2124_v21 = vadd.f32 %v2123_v53, %v4752_v54 }
 0x2fe   : > { %v1796_v58 = vpop.f32.mrf.mxu1  ;;  %v2127_v9 = vpop.f32.mrf.mxu0 }
 0x2ff   : > { %2354 = vst [vmem:[%s4755_s5 + $0x70] sm:$0xff] %v1795_v3  ;;  %v1797_v33 = vadd.f32 %v1796_v58, %v4741_v26  ;;  %2417 = vst [vmem:[%s4765_s29 + $0x68] sm:$0xff] %v2124_v21  ;;  %v2128_v55 = vadd.f32 %v2127_v9, %v4746_v29 }
 0x300   : > { %v1800_v38 = vpop.f32.mrf.mxu1  ;;  %v2129_v17 = vpop.f32.mrf.mxu0 }
 0x301   : > { %2355 = vst [vmem:[%s4755_s5 + $0x78] sm:$0xff] %v1797_v33  ;;  %v1801_v24 = vadd.f32 %v1800_v38, %v4733_v37  ;;  %2418 = vst [vmem:[%s4765_s29 + $0x70] sm:$0xff] %v2128_v55  ;;  %v2130_v2 = vadd.f32 %v2129_v17, %v4752_v54 }
 0x302   : > { %v1802_v35 = vpop.f32.mrf.mxu1  ;;  %v2133_v59 = vpop.f32.mrf.mxu0 }
 0x303   : > { %2356 = vst [vmem:[%s4755_s5 + $0x80] sm:$0xff] %v1801_v24  ;;  %v1803_v5 = vadd.f32 %v1802_v35, %v4741_v26  ;;  %2419 = vst [vmem:[%s4765_s29 + $0x78] sm:$0xff] %v2130_v2  ;;  %v2134_v47 = vadd.f32 %v2133_v59, %v4746_v29 }
 0x304   : > { %v1806_v56 = vpop.f32.mrf.mxu1  ;;  %v2135_v16 = vpop.f32.mrf.mxu0 }
 0x305   : > { %2357 = vst [vmem:[%s4755_s5 + $0x88] sm:$0xff] %v1803_v5  ;;  %v1807_v22 = vadd.f32 %v1806_v56, %v4733_v37  ;;  %2420 = vst [vmem:[%s4765_s29 + $0x80] sm:$0xff] %v2134_v47  ;;  %v2136_v49 = vadd.f32 %v2135_v16, %v4752_v54 }
 0x306   : > { %v1808_v14 = vpop.f32.mrf.mxu1  ;;  %v2139_v43 = vpop.f32.mrf.mxu0 }
 0x307   : > { %2358 = vst [vmem:[%s4755_s5 + $0x90] sm:$0xff] %v1807_v22  ;;  %v1809_v42 = vadd.f32 %v1808_v14, %v4741_v26  ;;  %2421 = vst [vmem:[%s4765_s29 + $0x88] sm:$0xff] %v2136_v49  ;;  %v2140_v13 = vadd.f32 %v2139_v43, %v4746_v29 }
 0x308   : > { %v1812_v62 = vpop.f32.mrf.mxu1  ;;  %v2141_v50 = vpop.f32.mrf.mxu0 }
 0x309   : > { %2359 = vst [vmem:[%s4755_s5 + $0x98] sm:$0xff] %v1809_v42  ;;  %v1813_v23 = vadd.f32 %v1812_v62, %v4733_v37  ;;  %2422 = vst [vmem:[%s4765_s29 + $0x90] sm:$0xff] %v2140_v13  ;;  %v2142_v63 = vadd.f32 %v2141_v50, %v4752_v54 }
 0x30a   : > { %v1814_v7 = vpop.f32.mrf.mxu1  ;;  %v2145_v45 = vpop.f32.mrf.mxu0 }
 0x30b   : > { %2360 = vst [vmem:[%s4755_s5 + $0xa0] sm:$0xff] %v1813_v23  ;;  %v1815_v11 = vadd.f32 %v1814_v7, %v4741_v26  ;;  %2423 = vst [vmem:[%s4765_s29 + $0x98] sm:$0xff] %v2142_v63  ;;  %v2146_v36 = vadd.f32 %v2145_v45, %v4746_v29 }
 0x30c   : > { %v1818_v28 = vpop.f32.mrf.mxu1  ;;  %v2147_v51 = vpop.f32.mrf.mxu0 }
 0x30d   : > { %2361 = vst [vmem:[%s4755_s5 + $0xa8] sm:$0xff] %v1815_v11  ;;  %v1819_v40 = vadd.f32 %v1818_v28, %v4733_v37  ;;  %2424 = vst [vmem:[%s4765_s29 + $0xa0] sm:$0xff] %v2146_v36  ;;  %v2148_v46 = vadd.f32 %v2147_v51, %v4752_v54 }
 0x30e   : > { %v1820_v39 = vpop.f32.mrf.mxu1  ;;  %v2151_v15 = vpop.f32.mrf.mxu0 }
 0x30f   : > { %2362 = vst [vmem:[%s4755_s5 + $0xb0] sm:$0xff] %v1819_v40  ;;  %v1821_v41 = vadd.f32 %v1820_v39, %v4741_v26  ;;  %2425 = vst [vmem:[%s4765_s29 + $0xa8] sm:$0xff] %v2148_v46  ;;  %v2152_v34 = vadd.f32 %v2151_v15, %v4746_v29 }
 0x310   : > { %v1824_v4 = vpop.f32.mrf.mxu1  ;;  %v2153_v8 = vpop.f32.mrf.mxu0 }
 0x311   : > { %2363 = vst [vmem:[%s4755_s5 + $0xb8] sm:$0xff] %v1821_v41  ;;  %v1825_v27 = vadd.f32 %v1824_v4, %v4733_v37  ;;  %2426 = vst [vmem:[%s4765_s29 + $0xb0] sm:$0xff] %v2152_v34  ;;  %v2154_v52 = vadd.f32 %v2153_v8, %v4752_v54 }
 0x312   : > { %v1826_v57 = vpop.f32.mrf.mxu1  ;;  %v2157_v18 = vpop.f32.mrf.mxu0 }
 0x313   : > { %2364 = vst [vmem:[%s4755_s5 + $0xc0] sm:$0xff] %v1825_v27  ;;  %v1827_v61 = vadd.f32 %v1826_v57, %v4741_v26  ;;  %2427 = vst [vmem:[%s4765_s29 + $0xb8] sm:$0xff] %v2154_v52  ;;  %v2158_v25 = vadd.f32 %v2157_v18, %v4746_v29 }
 0x314   : > { %v1830_v10 = vpop.f32.mrf.mxu1  ;;  %v2159_v1 = vpop.f32.mrf.mxu0 }
 0x315   : > { %2365 = vst [vmem:[%s4755_s5 + $0xc8] sm:$0xff] %v1827_v61  ;;  %v1831_v20 = vadd.f32 %v1830_v10, %v4733_v37  ;;  %2428 = vst [vmem:[%s4765_s29 + $0xc0] sm:$0xff] %v2158_v25  ;;  %v2160_v19 = vadd.f32 %v2159_v1, %v4752_v54 }
 0x316   : > { %v1832_v30 = vpop.f32.mrf.mxu1  ;;  %v2163_v48 = vpop.f32.mrf.mxu0 }
 0x317   : > { %2366 = vst [vmem:[%s4755_s5 + $0xd0] sm:$0xff] %v1831_v20  ;;  %v1833_v12 = vadd.f32 %v1832_v30, %v4741_v26  ;;  %2429 = vst [vmem:[%s4765_s29 + $0xc8] sm:$0xff] %v2160_v19  ;;  %v2164_v32 = vadd.f32 %v2163_v48, %v4746_v29 }
 0x318   : > { %v1836_v44 = vpop.f32.mrf.mxu1  ;;  %v2165_v0 = vpop.f32.mrf.mxu0 }
 0x319   : > { %2367 = vst [vmem:[%s4755_s5 + $0xd8] sm:$0xff] %v1833_v12  ;;  %v1837_v60 = vadd.f32 %v1836_v44, %v4733_v37  ;;  %2430 = vst [vmem:[%s4765_s29 + $0xd0] sm:$0xff] %v2164_v32  ;;  %v2166_v31 = vadd.f32 %v2165_v0, %v4752_v54 }
 0x31a   : > { %v1838_v6 = vpop.f32.mrf.mxu1  ;;  %v2169_v53 = vpop.f32.mrf.mxu0 }
 0x31b   : > { %2368 = vst [vmem:[%s4755_s5 + $0xe0] sm:$0xff] %v1837_v60  ;;  %v1839_v3 = vadd.f32 %v1838_v6, %v4741_v26  ;;  %2431 = vst [vmem:[%s4765_s29 + $0xd8] sm:$0xff] %v2166_v31  ;;  %v2170_v21 = vadd.f32 %v2169_v53, %v4746_v29 }
 0x31c   : > { %v1842_v58 = vpop.f32.mrf.mxu1  ;;  %v2171_v9 = vpop.f32.mrf.mxu0 }
 0x31d   : > { %2369 = vst [vmem:[%s4755_s5 + $0xe8] sm:$0xff] %v1839_v3  ;;  %v1843_v33 = vadd.f32 %v1842_v58, %v4733_v37  ;;  %2432 = vst [vmem:[%s4765_s29 + $0xe0] sm:$0xff] %v2170_v21  ;;  %v2172_v55 = vadd.f32 %v2171_v9, %v4752_v54 }
 0x31e   : > { %v1844_v38 = vpop.f32.mrf.mxu1  ;;  %v2175_v17 = vpop.f32.mrf.mxu0 }
 0x31f   : > { %2370 = vst [vmem:[%s4755_s5 + $0xf0] sm:$0xff] %v1843_v33  ;;  %v1845_v24 = vadd.f32 %v1844_v38, %v4741_v26  ;;  %2433 = vst [vmem:[%s4765_s29 + $0xe8] sm:$0xff] %v2172_v55  ;;  %v2176_v2 = vadd.f32 %v2175_v17, %v4746_v29 }
 0x320   : > { %v1848_v35 = vpop.f32.mrf.mxu1  ;;  %v2177_v59 = vpop.f32.mrf.mxu0 }
 0x321   : > { %2371 = vst [vmem:[%s4755_s5 + $0xf8] sm:$0xff] %v1845_v24  ;;  %v1849_v5 = vadd.f32 %v1848_v35, %v4733_v37  ;;  %2434 = vst [vmem:[%s4765_s29 + $0xf0] sm:$0xff] %v2176_v2  ;;  %v2178_v47 = vadd.f32 %v2177_v59, %v4752_v54 }
 0x322   : > { %v1850_v56 = vpop.f32.mrf.mxu1  ;;  %v2181_v16 = vpop.f32.mrf.mxu0 }
 0x323   : > { %2372 = vst [vmem:[%s4755_s5 + $0x100] sm:$0xff] %v1849_v5  ;;  %v1851_v22 = vadd.f32 %v1850_v56, %v4741_v26  ;;  %2435 = vst [vmem:[%s4765_s29 + $0xf8] sm:$0xff] %v2178_v47  ;;  %v2182_v49 = vadd.f32 %v2181_v16, %v4746_v29 }
 0x324   : > { %v1854_v14 = vpop.f32.mrf.mxu1  ;;  %v2183_v43 = vpop.f32.mrf.mxu0 }
 0x325   : > { %2373 = vst [vmem:[%s4755_s5 + $0x108] sm:$0xff] %v1851_v22  ;;  %v1855_v42 = vadd.f32 %v1854_v14, %v4733_v37  ;;  %2436 = vst [vmem:[%s4765_s29 + $0x100] sm:$0xff] %v2182_v49  ;;  %v2184_v13 = vadd.f32 %v2183_v43, %v4752_v54 }
 0x326   : > { %v1856_v62 = vpop.f32.mrf.mxu1  ;;  %v2187_v50 = vpop.f32.mrf.mxu0 }
 0x327   : > { %2374 = vst [vmem:[%s4755_s5 + $0x110] sm:$0xff] %v1855_v42  ;;  %v1857_v23 = vadd.f32 %v1856_v62, %v4741_v26  ;;  %2437 = vst [vmem:[%s4765_s29 + $0x108] sm:$0xff] %v2184_v13  ;;  %v2188_v63 = vadd.f32 %v2187_v50, %v4746_v29 }
 0x328   : > { %v1860_v7 = vpop.f32.mrf.mxu1  ;;  %v2189_v45 = vpop.f32.mrf.mxu0 }
 0x329   : > { %2375 = vst [vmem:[%s4755_s5 + $0x118] sm:$0xff] %v1857_v23  ;;  %v1861_v11 = vadd.f32 %v1860_v7, %v4733_v37  ;;  %2438 = vst [vmem:[%s4765_s29 + $0x110] sm:$0xff] %v2188_v63  ;;  %v2190_v36 = vadd.f32 %v2189_v45, %v4752_v54 }
 0x32a   : > { %v1862_v28 = vpop.f32.mrf.mxu1  ;;  %v2193_v51 = vpop.f32.mrf.mxu0 }
 0x32b   : > { %2376 = vst [vmem:[%s4755_s5 + $0x120] sm:$0xff] %v1861_v11  ;;  %v1863_v40 = vadd.f32 %v1862_v28, %v4741_v26  ;;  %2439 = vst [vmem:[%s4765_s29 + $0x118] sm:$0xff] %v2190_v36  ;;  %v2194_v46 = vadd.f32 %v2193_v51, %v4746_v29 }
 0x32c   : > { %v1866_v39 = vpop.f32.mrf.mxu1  ;;  %v2195_v15 = vpop.f32.mrf.mxu0 }
 0x32d   : > { %2377 = vst [vmem:[%s4755_s5 + $0x128] sm:$0xff] %v1863_v40  ;;  %v1867_v41 = vadd.f32 %v1866_v39, %v4733_v37  ;;  %2440 = vst [vmem:[%s4765_s29 + $0x120] sm:$0xff] %v2194_v46  ;;  %v2196_v34 = vadd.f32 %v2195_v15, %v4752_v54 }
 0x32e   : > { %v1868_v4 = vpop.f32.mrf.mxu1  ;;  %v2199_v8 = vpop.f32.mrf.mxu0 }
 0x32f   : > { %2378 = vst [vmem:[%s4755_s5 + $0x130] sm:$0xff] %v1867_v41  ;;  %v1869_v27 = vadd.f32 %v1868_v4, %v4741_v26  ;;  %2441 = vst [vmem:[%s4765_s29 + $0x128] sm:$0xff] %v2196_v34  ;;  %v2200_v52 = vadd.f32 %v2199_v8, %v4746_v29 }
 0x330   : > { %v1872_v57 = vpop.f32.mrf.mxu1  ;;  %v2201_v18 = vpop.f32.mrf.mxu0 }
 0x331   : > { %2379 = vst [vmem:[%s4755_s5 + $0x138] sm:$0xff] %v1869_v27  ;;  %v1873_v61 = vadd.f32 %v1872_v57, %v4733_v37  ;;  %2442 = vst [vmem:[%s4765_s29 + $0x130] sm:$0xff] %v2200_v52  ;;  %v2202_v25 = vadd.f32 %v2201_v18, %v4752_v54 }
 0x332   : > { %v1874_v10 = vpop.f32.mrf.mxu1  ;;  %v2205_v1 = vpop.f32.mrf.mxu0 }
 0x333   : > { %2380 = vst [vmem:[%s4755_s5 + $0x140] sm:$0xff] %v1873_v61  ;;  %v1875_v20 = vadd.f32 %v1874_v10, %v4741_v26  ;;  %2443 = vst [vmem:[%s4765_s29 + $0x138] sm:$0xff] %v2202_v25  ;;  %v2206_v19 = vadd.f32 %v2205_v1, %v4746_v29 }
 0x334   : > { %v1878_v30 = vpop.f32.mrf.mxu1  ;;  %v2207_v48 = vpop.f32.mrf.mxu0 }
 0x335   : > { %2381 = vst [vmem:[%s4755_s5 + $0x148] sm:$0xff] %v1875_v20  ;;  %v1879_v12 = vadd.f32 %v1878_v30, %v4733_v37  ;;  %2444 = vst [vmem:[%s4765_s29 + $0x140] sm:$0xff] %v2206_v19  ;;  %v2208_v32 = vadd.f32 %v2207_v48, %v4752_v54 }
 0x336   : > { %v1880_v44 = vpop.f32.mrf.mxu1  ;;  %v2211_v0 = vpop.f32.mrf.mxu0 }
 0x337   : > { %2382 = vst [vmem:[%s4755_s5 + $0x150] sm:$0xff] %v1879_v12  ;;  %v1881_v60 = vadd.f32 %v1880_v44, %v4741_v26  ;;  %2445 = vst [vmem:[%s4765_s29 + $0x148] sm:$0xff] %v2208_v32  ;;  %v2212_v31 = vadd.f32 %v2211_v0, %v4746_v29 }
 0x338   : > { %v1884_v6 = vpop.f32.mrf.mxu1  ;;  %v2213_v53 = vpop.f32.mrf.mxu0 }
 0x339   : > { %2383 = vst [vmem:[%s4755_s5 + $0x158] sm:$0xff] %v1881_v60  ;;  %v1885_v3 = vadd.f32 %v1884_v6, %v4733_v37  ;;  %2446 = vst [vmem:[%s4765_s29 + $0x150] sm:$0xff] %v2212_v31  ;;  %v2214_v21 = vadd.f32 %v2213_v53, %v4752_v54 }
 0x33a   : > { %v1886_v58 = vpop.f32.mrf.mxu1  ;;  %v2217_v9 = vpop.f32.mrf.mxu0 }
 0x33b   : > { %2384 = vst [vmem:[%s4755_s5 + $0x160] sm:$0xff] %v1885_v3  ;;  %v1887_v33 = vadd.f32 %v1886_v58, %v4741_v26  ;;  %2447 = vst [vmem:[%s4765_s29 + $0x158] sm:$0xff] %v2214_v21  ;;  %v2218_v55 = vadd.f32 %v2217_v9, %v4746_v29 }
 0x33c   : > { %v1890_v38 = vpop.f32.mrf.mxu1  ;;  %v2219_v17 = vpop.f32.mrf.mxu0 }
 0x33d   : > { %2385 = vst [vmem:[%s4755_s5 + $0x168] sm:$0xff] %v1887_v33  ;;  %v1891_v24 = vadd.f32 %v1890_v38, %v4733_v37  ;;  %2448 = vst [vmem:[%s4765_s29 + $0x160] sm:$0xff] %v2218_v55  ;;  %v2220_v2 = vadd.f32 %v2219_v17, %v4752_v54 }
 0x33e   : > { %v1892_v35 = vpop.f32.mrf.mxu1  ;;  %v2223_v59 = vpop.f32.mrf.mxu0 }
 0x33f   : > { %2386 = vst [vmem:[%s4755_s5 + $0x170] sm:$0xff] %v1891_v24  ;;  %v1893_v5 = vadd.f32 %v1892_v35, %v4741_v26  ;;  %2449 = vst [vmem:[%s4765_s29 + $0x168] sm:$0xff] %v2220_v2  ;;  %v2224_v47 = vadd.f32 %v2223_v59, %v4746_v29 }
 0x340   : > { %v1896_v56 = vpop.f32.mrf.mxu1  ;;  %v2225_v16 = vpop.f32.mrf.mxu0 }
 0x341   : > { %2387 = vst [vmem:[%s4755_s5 + $0x178] sm:$0xff] %v1893_v5  ;;  %v1897_v22 = vadd.f32 %v1896_v56, %v4733_v37  ;;  %2450 = vst [vmem:[%s4765_s29 + $0x170] sm:$0xff] %v2224_v47  ;;  %v2226_v49 = vadd.f32 %v2225_v16, %v4752_v54 }
 0x342   : > { %v1898_v14 = vpop.f32.mrf.mxu1  ;;  %v2229_v43 = vpop.f32.mrf.mxu0 }
 0x343   : > { %2388 = vst [vmem:[%s4755_s5 + $0x180] sm:$0xff] %v1897_v22  ;;  %v1899_v42 = vadd.f32 %v1898_v14, %v4741_v26  ;;  %2451 = vst [vmem:[%s4765_s29 + $0x178] sm:$0xff] %v2226_v49  ;;  %v2230_v13 = vadd.f32 %v2229_v43, %v4746_v29 }
 0x344   : > { %v1902_v62 = vpop.f32.mrf.mxu1  ;;  %v2231_v50 = vpop.f32.mrf.mxu0 }
 0x345   : > { %2389 = vst [vmem:[%s4755_s5 + $0x188] sm:$0xff] %v1899_v42  ;;  %v1903_v23 = vadd.f32 %v1902_v62, %v4733_v37  ;;  %2452 = vst [vmem:[%s4765_s29 + $0x180] sm:$0xff] %v2230_v13  ;;  %v2232_v63 = vadd.f32 %v2231_v50, %v4752_v54 }
 0x346   : > { %v1904_v7 = vpop.f32.mrf.mxu1  ;;  %v2235_v45 = vpop.f32.mrf.mxu0 }
 0x347   : > { %2390 = vst [vmem:[%s4755_s5 + $0x190] sm:$0xff] %v1903_v23  ;;  %v1905_v11 = vadd.f32 %v1904_v7, %v4741_v26  ;;  %2453 = vst [vmem:[%s4765_s29 + $0x188] sm:$0xff] %v2232_v63  ;;  %v2236_v36 = vadd.f32 %v2235_v45, %v4746_v29 }
 0x348   : > { %v1908_v28 = vpop.f32.mrf.mxu1  ;;  %v2237_v51 = vpop.f32.mrf.mxu0 }
 0x349   : > { %2391 = vst [vmem:[%s4755_s5 + $0x198] sm:$0xff] %v1905_v11  ;;  %v1909_v40 = vadd.f32 %v1908_v28, %v4733_v37  ;;  %2454 = vst [vmem:[%s4765_s29 + $0x190] sm:$0xff] %v2236_v36  ;;  %v2238_v46 = vadd.f32 %v2237_v51, %v4752_v54 }
 0x34a   : > { %v1910_v39 = vpop.f32.mrf.mxu1  ;;  %v2241_v15 = vpop.f32.mrf.mxu0 }
 0x34b   : > { %2392 = vst [vmem:[%s4755_s5 + $0x1a0] sm:$0xff] %v1909_v40  ;;  %v1911_v41 = vadd.f32 %v1910_v39, %v4741_v26  ;;  %2455 = vst [vmem:[%s4765_s29 + $0x198] sm:$0xff] %v2238_v46  ;;  %v2242_v34 = vadd.f32 %v2241_v15, %v4746_v29 }
 0x34c   : > { %v1914_v4 = vpop.f32.mrf.mxu1  ;;  %v2243_v8 = vpop.f32.mrf.mxu0 }
 0x34d   : > { %2393 = vst [vmem:[%s4755_s5 + $0x1a8] sm:$0xff] %v1911_v41  ;;  %v1915_v27 = vadd.f32 %v1914_v4, %v4733_v37  ;;  %2456 = vst [vmem:[%s4765_s29 + $0x1a0] sm:$0xff] %v2242_v34  ;;  %v2244_v52 = vadd.f32 %v2243_v8, %v4752_v54 }
 0x34e   : > { %v1916_v57 = vpop.f32.mrf.mxu1  ;;  %v2247_v18 = vpop.f32.mrf.mxu0 }
 0x34f   : > { %2394 = vst [vmem:[%s4755_s5 + $0x1b0] sm:$0xff] %v1915_v27  ;;  %v1917_v61 = vadd.f32 %v1916_v57, %v4741_v26  ;;  %2457 = vst [vmem:[%s4765_s29 + $0x1a8] sm:$0xff] %v2244_v52  ;;  %v2248_v25 = vadd.f32 %v2247_v18, %v4746_v29 }
 0x350   : > { %v1920_v10 = vpop.f32.mrf.mxu1  ;;  %v2249_v1 = vpop.f32.mrf.mxu0 }
 0x351   : > { %2395 = vst [vmem:[%s4755_s5 + $0x1b8] sm:$0xff] %v1917_v61  ;;  %v1921_v20 = vadd.f32 %v1920_v10, %v4733_v37  ;;  %2458 = vst [vmem:[%s4765_s29 + $0x1b0] sm:$0xff] %v2248_v25  ;;  %v2250_v19 = vadd.f32 %v2249_v1, %v4752_v54 }
 0x352   : > { %v1922_v30 = vpop.f32.mrf.mxu1  ;;  %v2253_v48 = vpop.f32.mrf.mxu0 }
 0x353   : > { %2396 = vst [vmem:[%s4755_s5 + $0x1c0] sm:$0xff] %v1921_v20  ;;  %v1923_v12 = vadd.f32 %v1922_v30, %v4741_v26  ;;  %2459 = vst [vmem:[%s4765_s29 + $0x1b8] sm:$0xff] %v2250_v19  ;;  %v2254_v32 = vadd.f32 %v2253_v48, %v4746_v29 }
 0x354   : > { %v1926_v44 = vpop.f32.mrf.mxu1  ;;  %v2255_v0 = vpop.f32.mrf.mxu0 }
 0x355   : > { %2397 = vst [vmem:[%s4755_s5 + $0x1c8] sm:$0xff] %v1923_v12  ;;  %v1927_v60 = vadd.f32 %v1926_v44, %v4733_v37  ;;  %2460 = vst [vmem:[%s4765_s29 + $0x1c0] sm:$0xff] %v2254_v32  ;;  %v2256_v31 = vadd.f32 %v2255_v0, %v4752_v54 }
 0x356   : > { %v1928_v6 = vpop.f32.mrf.mxu1  ;;  %v2259_v53 = vpop.f32.mrf.mxu0 }
 0x357   : > { %2398 = vst [vmem:[%s4755_s5 + $0x1d0] sm:$0xff] %v1927_v60  ;;  %v1929_v3 = vadd.f32 %v1928_v6, %v4741_v26  ;;  %2461 = vst [vmem:[%s4765_s29 + $0x1c8] sm:$0xff] %v2256_v31  ;;  %v2260_v21 = vadd.f32 %v2259_v53, %v4746_v29 }
 0x358   : > { %v1932_v58 = vpop.f32.mrf.mxu1  ;;  %v2261_v9 = vpop.f32.mrf.mxu0 }
 0x359   : > { %2399 = vst [vmem:[%s4755_s5 + $0x1d8] sm:$0xff] %v1929_v3  ;;  %v1933_v33 = vadd.f32 %v1932_v58, %v4733_v37  ;;  %2462 = vst [vmem:[%s4765_s29 + $0x1d0] sm:$0xff] %v2260_v21  ;;  %v2262_v55 = vadd.f32 %v2261_v9, %v4752_v54 }
 0x35a   : > { %v1934_v38 = vpop.f32.mrf.mxu1  ;;  %v2265_v17 = vpop.f32.mrf.mxu0 }
 0x35b   : > { %2400 = vst [vmem:[%s4755_s5 + $0x1e0] sm:$0xff] %v1933_v33  ;;  %v1935_v24 = vadd.f32 %v1934_v38, %v4741_v26  ;;  %2463 = vst [vmem:[%s4765_s29 + $0x1d8] sm:$0xff] %v2262_v55  ;;  %v2266_v2 = vadd.f32 %v2265_v17, %v4746_v29 }
 0x35c   : > { %v1938_v35 = vpop.f32.mrf.mxu1  ;;  %v2267_v59 = vpop.f32.mrf.mxu0 }
 0x35d   : > { %2401 = vst [vmem:[%s4755_s5 + $0x1e8] sm:$0xff] %v1935_v24  ;;  %v1939_v5 = vadd.f32 %v1938_v35, %v4733_v37  ;;  %2464 = vst [vmem:[%s4765_s29 + $0x1e0] sm:$0xff] %v2266_v2  ;;  %v2268_v47 = vadd.f32 %v2267_v59, %v4752_v54 }
 0x35e   : > { %v1940_v56 = vpop.f32.mrf.mxu1  ;;  %v2271_v16 = vpop.f32.mrf.mxu0 }
 0x35f   : > { %2402 = vst [vmem:[%s4755_s5 + $0x1f0] sm:$0xff] %v1939_v5  ;;  %v1941_v22 = vadd.f32 %v1940_v56, %v4741_v26  ;;  %2465 = vst [vmem:[%s4765_s29 + $0x1e8] sm:$0xff] %v2268_v47  ;;  %v2272_v37 = vadd.f32 %v2271_v16, %v4746_v29 }
 0x360   : > { %v2273_v14 = vpop.f32.mrf.mxu0 }
 0x361   : > { %2403 = vst [vmem:[%s4755_s5 + $0x1f8] sm:$0xff] %v1941_v22  ;;  %2466 = vst [vmem:[%s4765_s29 + $0x1f0] sm:$0xff] %v2272_v37  ;;  %v2274_v26 = vadd.f32 %v2273_v14, %v4752_v54  ;;  %s3132_s5 = sshll.u32 %s3242_s21, 4  ;;  %s3133_s5 = int_to_ptr.vmem [resolvable:$false] %s3132_s5 }
 0x362   : > { %s3134_s26 = scalar_lea.vmem %s3133_s5, 16384  ;;  %p3135_p5 = scmp.lt.s32.totalorder %s5058_s1, %s3133_s5 }
 0x363   : > { %p3136_p7 = scmp.lt.s32.totalorder %s3134_s26, %s3128_s25 }
 0x365   : > { %p3137_p13 = por %p3136_p7, %p3135_p5 }
 0x367   : > { %p3138_p10 = pnand %p3137_p13, %p3131_p3 }
 0x369   : > { %3141 = shalt.err (!%p3138_p10)
}
 0x36a   : > { %s3142_s3 = scalar_lea.hbm %s5056_s13, 8192  ;;  %s3146_s14 = scalar_lea.hbm %s5154_s10, 16384 }
 0x36b   : > { %p3143_p9 = scmp.ne.s32.totalorder %s5056_s13, %s3142_s3  ;;  %p3147_p1 = scmp.lt.s32.totalorder %s5056_s13, %s5154_s10 }
 0x36c   : > { %p3148_p2 = scmp.lt.s32.totalorder %s3146_s14, %s3142_s3 }
 0x36d   : > { %p3144_p11 = pnand %p3143_p9, %p5376_p4 }
 0x36e   : > { %p3149_p12 = por %p3148_p2, %p3147_p1 }
 0x36f   : > { %p3145_p0 = pneg %p3144_p11 }
 0x371   : > { %p3150_p6 = pnand %p3149_p12, %p3145_p0 }
 0x373   : > { %3153 = shalt.err (!%p3150_p6)
}
 0x374   : > { %s5378_s25 = smov 256   ;;  %2467 = vst [vmem:[%s4765_s29 + $0x1f8] sm:$0xff] %v2274_v26  ;;  %s3154_s12 = scalar_lea.vmem %s5069_s23, 8192 }
 0x375   : > { %2824 = dma.vmem_to_hbm [thread:$0]  (%p5376_p4), %s5058_s1, 8192, %s5056_s13, %s5073_s28, %s5378_s25, %s5378_s25, %s3241_s27  }
 0x376   : > { %p3155_p8 = scmp.ne.s32.totalorder %s5069_s23, %s3154_s12  ;;  %s3243_s5 = smov [#allocation14]  }
 0x377   : > { %s3158_s26 = sshll.u32 %s3243_s5, 4  ;;  %s3159_s26 = int_to_ptr.vmem [resolvable:$false] %s3158_s26 }
 0x378   : > { %p3156_p3 = pnand %p3155_p8, %p5376_p4  ;;  %s3160_s3 = scalar_lea.vmem %s3159_s26, 16384 }
 0x379   : > { %p3161_p7 = scmp.lt.s32.totalorder %s5069_s23, %s3159_s26  ;;  %p3162_p13 = scmp.lt.s32.totalorder %s3160_s3, %s3154_s12 }
 0x37a   : > { %p3157_p5 = pneg %p3156_p3 }
 0x37b   : > { %p3163_p10 = por %p3162_p13, %p3161_p7 }
 0x37d   : > { %p3164_p9 = pnand %p3163_p10, %p3157_p5 }
 0x37f   : > { %3167 = shalt.err (!%p3164_p9)
}
 0x380   : > { %s3168_s1 = scalar_lea.hbm %s5067_s15, 8192  ;;  %s3172_s7 = scalar_lea.hbm %s5155_s11, 16384 }
 0x381   : > { %p3169_p11 = scmp.ne.s32.totalorder %s5067_s15, %s3168_s1  ;;  %p3173_p2 = scmp.lt.s32.totalorder %s5067_s15, %s5155_s11 }
 0x382   : > { %p3174_p12 = scmp.lt.s32.totalorder %s3172_s7, %s3168_s1 }
 0x383   : > { %p3170_p0 = pnand %p3169_p11, %p5376_p4 }
 0x384   : > { %p3175_p6 = por %p3174_p12, %p3173_p2 }
 0x385   : > { %p3171_p1 = pneg %p3170_p0 }
 0x387   : > { %p3176_p8 = pnand %p3175_p6, %p3171_p1 }
 0x389   : > { %3179 = shalt.err (!%p3176_p8)
}
 0x38a   : > { %2825 = dma.vmem_to_hbm [thread:$0]  (%p5376_p4), %s5069_s23, 8192, %s5067_s15, %s5073_s28, %s5378_s25, %s5378_s25, %s3241_s27  }
 0x38b PF: > { %s2542_s21 = sand.u32 1, %s3218_s17   ;;  %p5379_p3 = scmp.ne.s32.totalorder %s5245_s24, 0 }
 0x38c   : > { %p5380_p5 = scmp.ge.s32.totalorder %s3230_s20, 2  ;;  %s2543_s12 = scalar_lea.sflag [#allocation4], %s2542_s21 }
 0x38e   : > { %p2847_p7 = pnand %p5380_p5, %p5379_p3 }
 0x390   : > { %p2848_p13 = pneg %p2847_p7 }
 0x392   : > { %3209 = dma.done.wait (%p2848_p13), %s2543_s12, 8192  }
 0x393   : > { %3211 = vsyncadd (%p2848_p13), %s2543_s12, 4294959104  ;;  %s5381_s30 = sadd.s32 4294967294, %s3230_s20  }
 0x394   : > { %s2551_s5 = sand.u32 1, %s5381_s30  }
 0x395   : > { %s2552_s26 = scalar_lea.sflag [#allocation13], %s2551_s5 }
 0x396   : > { %3213 = dma.done.wait (%p2848_p13), %s2552_s26, 16384  }
 0x397   : > { %3215 = vsyncadd (%p2848_p13), %s2552_s26, 4294950912  ;;  %s5382_s27 = sld [smem:[#allocation20_spill]]  ;;  %p30_p4 = scmp.ge.s32.totalorder %s3403_s16, 4  }
 0x398   : > { %s5383_s17 = smov %s3222_s18  ;;  %s5384_s18 = smov %s3226_s19 }
 0x399   : > { %s5386_s20 = smov %s3403_s16  ;;  %32 = sbr.rel (!%p30_p4) target bundleno = 14 (0xe), region = 149 }
 0x39d   : > { %s5385_s19 = smov %s5382_s27 }
 0x39e   :  { %2566 = vsyncpa [#allocation3], 1 }
 0x39f   :  { %2568 = vsyncpa [#allocation3 + $0x1], 1 }
 0x3a0   :  { %2569 = vsyncpa [#allocation6], 1 }
 0x3a1   :  { %2570 = vsyncpa [#allocation9], 1 }
 0x3a2   :  { %2571 = vsyncpa [#allocation4], 1 }
 0x3a3   :  { %2573 = vsyncpa [#allocation4 + $0x1], 1 }
 0x3a4   :  { %2574 = vsyncpa [#allocation13], 1 }
 0x3a5   :  { %2576 = vsyncpa [#allocation13 + $0x1], 1 }

</bundles_post_ra>
